<compile_context>
chip_gen: v7x
topology: tpu7x:2x2x1
jax: 0.10.0
libtpu: 0.0.40
codegen_flags: <defaults>
</compile_context>

<pallas_src>
import jax
import jax.numpy as jnp
from jax import lax
from jax.experimental import pallas as pl
from jax.experimental.pallas import tpu as pltpu

LANE = 128


def _round_up(x, m):
    return (x + m - 1) // m * m


def _vmem_capacity_bytes():
    try:
        cap = getattr(pltpu.get_tpu_info(), "vmem_capacity_bytes", None)
        if cap:
            return int(cap)
    except Exception:
        pass
    return 64 << 20  # conservative (v7x-sized) fallback


def _pick_tile_h(H, W, Cp, Wp, Cop, budget_bytes=None):
    """Largest divisor of H whose per-tile working set fits the VMEM budget,
    floored at 16 rows (conv1 halo recompute is 2/tile_h and each grid step
    costs ~0.35us of fixed overhead)."""
    if budget_bytes is None:
        budget_bytes = max(8 << 20, int(0.35 * _vmem_capacity_bytes()))
    per_row = W * (2 * 4 * Cp        # double-buffered f32 input block
                   + 2 * 4 * Cop     # double-buffered f32 output block
                   + 6 * 4 * Wp      # h1 scratch + rolled/masked copies + acc/h2
                   + 3 * 2 * Wp      # bf16 slab / matmul operand copies
                   + 4 * Cop)        # h3
    weights = 2 * 2 * (Cp * Wp + 9 * Wp * Wp + Wp * Cop)  # bf16, 2 buffers
    avail = max(budget_bytes - weights, per_row)
    t = int(max(1, min(H, avail // max(per_row, 1))))
    while H % t:
        t -= 1
    floor = min(H, 16)
    if t < floor:  # TODO(synk): support a ragged last tile instead of rounding up
        t = floor
        while H % t:
            t += 1
    return t


def bottleneck_forward_nhwc(x_nhwc, kp, tile_h=None, pack_conv2=None):
    """Fused bottleneck forward, NHWC in / NHWC out (preferred entry point)."""
    N, H, W0, Cin = x_nhwc.shape
    Cp, Wp, Cop = kp["cp"], kp["wp"], kp["cop"]
    cout = kp["cout"]
    assert kp["cin"] == Cin
    # downsample=None (identity residual) => inplanes == planes * 4, stride=1
    assert Cin == cout and Cp == Cop

    # Pad W to a multiple of 8 so flattened row offsets (dy*W, +-1 roll, halo
    # slices) stay sublane-aligned; channels are padded to 128 lanes in
    # make_params (zero lanes / pad columns are inert, masked, or sliced off).
    W = _round_up(W0, 8)
    if pack_conv2 is None:
        # K = 3*Wp packing fills the 256-deep MXU (v6e/v7x) when Wp == 128; for
        # wide stages (Wp >= 256) -- and always on v5e (128-deep MXU) -- the
        # 9-matmul path avoids the slab traffic.  Pass pack_conv2=False on v5e.
        pack_conv2 = (Wp == 128)

    if tile_h is None:
        tile_h = _pick_tile_h(H, W, Cp, Wp, Cop)
    assert H % tile_h == 0, "tile_h must divide H"
    n_rows = H // tile_h          # note: on v7x keep N * n_rows even for 2-TC balance
    last_r = n_rows - 1

    He = tile_h + 2
    M = He * W
    Mo = tile_h * W

    pad_w, pad_c = W - W0, Cp - Cin
    xp = x_nhwc
    if pad_w or pad_c:
        xp = jnp.pad(x_nhwc, ((0, 0), (0, 0), (0, pad_w), (0, pad_c)))

    # 1-row top/bottom halos per row tile, gathered with a strided row slice
    # plus one zero border row (no full-tensor pad/copy in HBM).
    zero_row = jnp.zeros((N, 1, W, Cp), xp.dtype)
    if n_rows > 1:
        x_top = jnp.concatenate([zero_row, xp[:, tile_h - 1:H - 1:tile_h]], axis=1)
        x_bot = jnp.concatenate([xp[:, tile_h:H:tile_h], zero_row], axis=1)
    else:
        x_top, x_bot = zero_row, zero_row

    def kernel(xc_ref, xt_ref, xb_ref, w1_ref, b1_ref, w2_ref, b2_ref,
               w3_ref, b3_ref, o_ref, h1_ref, *extra):
        r = pl.program_id(1)
        w1 = w1_ref[...]
        b1 = b1_ref[...]

        # ---- conv1 (1x1) + folded-bn1 bias + relu, written straight into the
        # h1 scratch: rows [0:W] top halo, [W:W+Mo] center, [W+Mo:M] bottom.
        xc = xc_ref[...].reshape(Mo, Cp)
        h1_ref[W:W + Mo, :] = jnp.maximum(
            jnp.dot(xc.astype(jnp.bfloat16), w1,
                    preferred_element_type=jnp.float32) + b1, 0.0)

        # Halo rows outside the image must act like conv2's zero padding.
        @pl.when(r == 0)
        def _():
            h1_ref[0:W, :] = jnp.zeros((W, Wp), jnp.float32)

        @pl.when(r > 0)
        def _():
            h1_ref[0:W, :] = jnp.maximum(
                jnp.dot(xt_ref[...].astype(jnp.bfloat16), w1,
                        preferred_element_type=jnp.float32) + b1, 0.0)

        @pl.when(r == last_r)
        def _():
            h1_ref[W + Mo:M, :] = jnp.zeros((W, Wp), jnp.float32)

        @pl.when(r < last_r)
        def _():
            h1_ref[W + Mo:M, :] = jnp.maximum(
                jnp.dot(xb_ref[...].astype(jnp.bfloat16), w1,
                        preferred_element_type=jnp.float32) + b1, 0.0)

        # ---- conv2 (3x3, pad=1) + folded-bn2 bias + relu ---------------------
        # dx = -1/+1 taps: rotate the flattened row axis on the XLU and zero the
        # wrapped column with a (M, 1) boundary mask (== zero padding along W,
        # using the real width W0 so W-pad columns never leak into real pixels).
        h1 = h1_ref[...]
        wcol = lax.broadcasted_iota(jnp.int32, (He, W, 1), 1).reshape(M, 1)
        o1 = h1.astype(jnp.bfloat16)
        o1_l = jnp.where(wcol > 0,
                         pltpu.roll(h1, shift=1, axis=0), 0.0).astype(jnp.bfloat16)
        o1_r = jnp.where(wcol < W0 - 1,
                         pltpu.roll(h1, shift=M - 1, axis=0), 0.0).astype(jnp.bfloat16)

        acc = jnp.zeros((Mo, Wp), jnp.float32)
        if pack_conv2:
            # K packed [dx-1 | dx0 | dx+1]: build the slab once in a bf16 VMEM
            # scratch (no per-dy lane concats) -> 3 matmuls with K = 3*Wp.
            slab_ref = extra[0]
            slab_ref[:, 0:Wp] = o1_l
            slab_ref[:, Wp:2 * Wp] = o1
            slab_ref[:, 2 * Wp:3 * Wp] = o1_r
            for dy in range(3):
                acc = acc + jnp.dot(slab_ref[dy * W:dy * W + Mo, :], w2_ref[dy],
                                    preferred_element_type=jnp.float32)
        else:
            # 9 accumulating matmuls, K = Wp each (v5e / wide stages).
            for dy in range(3):
                lo = dy * W
                acc = acc + jnp.dot(o1_l[lo:lo + Mo], w2_ref[dy, 0:Wp, :],
                                    preferred_element_type=jnp.float32)
                acc = acc + jnp.dot(o1[lo:lo + Mo], w2_ref[dy, Wp:2 * Wp, :],
                                    preferred_element_type=jnp.float32)
                acc = acc + jnp.dot(o1_r[lo:lo + Mo], w2_ref[dy, 2 * Wp:3 * Wp, :],
                                    preferred_element_type=jnp.float32)
        h2 = jnp.maximum(acc + b2_ref[...], 0.0)

        # ---- conv3 (1x1) + folded-bn3 bias -----------------------------------
        h3 = jnp.dot(h2.astype(jnp.bfloat16), w3_ref[...],
                     preferred_element_type=jnp.float32) + b3_ref[...]

        # ---- identity residual + relu (re-read x just before the add) --------
        res = xc_ref[...].reshape(Mo, Cp)               # Cp == Cop
        out = jnp.maximum(h3 + res, 0.0)
        o_ref[...] = out.reshape(tile_h, W, Cop).astype(o_ref.dtype)

    flops = 2 * N * H * W * (Cp * Wp + 9 * Wp * Wp + Wp * Cop)
    bytes_accessed = (
        4 * (xp.size + x_top.size + x_bot.size + N * H * W * Cop)
        + 2 * (kp["w1"].size + kp["w2"].size + kp["w3"].size)
        + 4 * (kp["b1"].size + kp["b2"].size + kp["b3"].size))

    vmem_limit = int(min(0.75 * _vmem_capacity_bytes(), 100 << 20))

    scratch_shapes = [pltpu.VMEM((M, Wp), jnp.float32)]
    if pack_conv2:
        scratch_shapes.append(pltpu.VMEM((M, 3 * Wp), jnp.bfloat16))

    def run(weight_mode):
        # Constant-index weight/bias blocks: single-buffer them when supported
        # so deep stages don't burn 2x weight VMEM (matters most on v7x, 64 MiB).
        wkw = {} if weight_mode is None else dict(pipeline_mode=weight_mode)
        in_specs = [
            pl.BlockSpec((None, tile_h, W, Cp), lambda n, r: (n, r, 0, 0)),
            pl.BlockSpec((None, None, W, Cp), lambda n, r: (n, r, 0, 0)),
            pl.BlockSpec((None, None, W, Cp), lambda n, r: (n, r, 0, 0)),
            pl.BlockSpec((Cp, Wp), lambda n, r: (0, 0), **wkw),
            pl.BlockSpec((1, Wp), lambda n, r: (0, 0), **wkw),
            pl.BlockSpec((3, 3 * Wp, Wp), lambda n, r: (0, 0, 0), **wkw),
            pl.BlockSpec((1, Wp), lambda n, r: (0, 0), **wkw),
            pl.BlockSpec((Wp, Cop), lambda n, r: (0, 0), **wkw),
            pl.BlockSpec((1, Cop), lambda n, r: (0, 0), **wkw),
        ]
        return pl.pallas_call(
            kernel,
            out_shape=jax.ShapeDtypeStruct((N, H, W, Cop), x_nhwc.dtype),
            grid=(N, n_rows),
            in_specs=in_specs,
            out_specs=pl.BlockSpec((None, tile_h, W, Cop),
                                   lambda n, r: (n, r, 0, 0)),
            scratch_shapes=scratch_shapes,
            compiler_params=pltpu.CompilerParams(
                dimension_semantics=("parallel", "parallel"),
                vmem_limit_bytes=vmem_limit),
            cost_estimate=pl.CostEstimate(flops=flops, transcendentals=0,
                                          bytes_accessed=bytes_accessed),
        )(xp, x_top, x_bot, kp["w1"], kp["b1"], kp["w2"], kp["b2"],
          kp["w3"], kp["b3"])

    try:
        out_padded = run(pl.Buffered(1))
    except Exception:
        out_padded = run(None)   # pipeline_mode unsupported: default buffering
    return out_padded[:, :, :W0, :cout]


def bottleneck_forward(x_nchw, kp, tile_h=None, pack_conv2=None):
    """NCHW wrapper matching the PyTorch module.  For best performance keep the
    surrounding model in NHWC and call bottleneck_forward_nhwc directly (the
    two full-tensor transposes here are an extra HBM round trip)."""
    y = bottleneck_forward_nhwc(jnp.transpose(x_nchw, (0, 2, 3, 1)), kp,
                                tile_h=tile_h, pack_conv2=pack_conv2)
    return jnp.transpose(y, (0, 3, 1, 2))


def make_params(key, inplanes, planes, base_width=64, groups=1, eps=1e-5):
    """Synthetic Bottleneck_ parameters.  Returns (raw, kparams):
       raw     -- f32 PyTorch-layout conv weights + eval-mode BN scale/bias
       kparams -- BN folded into the conv weights, repacked / lane-padded /
                  bf16-cast for the Pallas kernel."""
    width = int(planes * (base_width / 64.0)) * groups
    out_c = planes * 4  # expansion = 4
    ks = jax.random.split(key, 15)

    conv1_w = 0.1 * jax.random.normal(ks[0], (width, inplanes, 1, 1), jnp.float32)
    conv2_w = 0.1 * jax.random.normal(ks[1], (width, width, 3, 3), jnp.float32)
    conv3_w = 0.1 * jax.random.normal(ks[2], (out_c, width, 1, 1), jnp.float32)

    def bn_fold(kg, kb, km, kv, c):
        gamma = 1.0 + 0.1 * jax.random.normal(kg, (c,), jnp.float32)
        beta = 0.1 * jax.random.normal(kb, (c,), jnp.float32)
        mean = 0.1 * jax.random.normal(km, (c,), jnp.float32)
        var = jnp.abs(jax.random.normal(kv, (c,), jnp.float32)) + 0.5
        scale = gamma / jnp.sqrt(var + eps)
        return scale, beta - mean * scale

    s1, b1 = bn_fold(ks[3], ks[4], ks[5], ks[6], width)
    s2, b2 = bn_fold(ks[7], ks[8], ks[9], ks[10], width)
    s3, b3 = bn_fold(ks[11], ks[12], ks[13], ks[14], out_c)

    raw = (conv1_w, s1, b1, conv2_w, s2, b2, conv3_w, s3, b3)

    # --- fold BN scales into conv weights, pad channels to 128 lanes, bf16 ---
    Cp = _round_up(inplanes, LANE)
    Wp = _round_up(width, LANE)
    Cop = _round_up(out_c, LANE)

    w1 = (conv1_w[:, :, 0, 0] * s1[:, None]).T                      # (in, out)
    w1p = jnp.zeros((Cp, Wp), jnp.float32).at[:inplanes, :width].set(w1)

    w2_rows = []
    for dy in range(3):
        taps = []
        for dx in range(3):
            t = (conv2_w[:, :, dy, dx] * s2[:, None]).T             # (in, out)
            taps.append(jnp.zeros((Wp, Wp), jnp.float32)
                        .at[:width, :width].set(t))
        w2_rows.append(jnp.concatenate(taps, axis=0))   # K packed: [dx0|dx1|dx2]
    w2p = jnp.stack(w2_rows, axis=0)                                # (3,3Wp,Wp)

    w3 = (conv3_w[:, :, 0, 0] * s3[:, None]).T                      # (width,out)
    w3p = jnp.zeros((Wp, Cop), jnp.float32).at[:width, :out_c].set(w3)

    kparams = dict(
        w1=w1p.astype(jnp.bfloat16),
        b1=jnp.zeros((1, Wp), jnp.float32).at[0, :width].set(b1),
        w2=w2p.astype(jnp.bfloat16),
        b2=jnp.zeros((1, Wp), jnp.float32).at[0, :width].set(b2),
        w3=w3p.astype(jnp.bfloat16),
        b3=jnp.zeros((1, Cop), jnp.float32).at[0, :out_c].set(b3),
        cin=inplanes, width=width, cout=out_c, cp=Cp, wp=Wp, cop=Cop)
    return raw, kparams


def reference_forward(x, raw):
    """Pure-JAX NCHW f32 reference (eval-mode BN as scale/bias)."""
    (c1, s1, b1, c2, s2, b2, c3, s3, b3) = raw
    dn = ('NCHW', 'OIHW', 'NCHW')

    def bn(y, s, b):
        return y * s[None, :, None, None] + b[None, :, None, None]

    out = lax.conv_general_dilated(x, c1, (1, 1), 'VALID', dimension_numbers=dn)
    out = jnp.maximum(bn(out, s1, b1), 0.0)
    out = lax.conv_general_dilated(out, c2, (1, 1), ((1, 1), (1, 1)),
                                   dimension_numbers=dn)
    out = jnp.maximum(bn(out, s2, b2), 0.0)
    out = lax.conv_general_dilated(out, c3, (1, 1), 'VALID', dimension_numbers=dn)
    out = bn(out, s3, b3)
    return jnp.maximum(out + x, 0.0)


if __name__ == "__main__":
    # downsample=None requires stride=1 and inplanes == planes * expansion
    N, inplanes, planes, H, W = 2, 32, 8, 16, 16

    key = jax.random.PRNGKey(0)
    kx, kparam = jax.random.split(key)
    x = jax.random.normal(kx, (N, inplanes, H, W), jnp.float32)
    raw, kparams = make_params(kparam, inplanes, planes)

    ref = jax.block_until_ready(reference_forward(x, raw))

    # tile_h=4 -> grid (2, 4): exercises the row tiling + halo handling.
    # Run both conv2 paths: the K-packed slab (Wp==128, v6e/v7x default) and
    # the 9-matmul path used on v5e / wide stages.
    out_packed = jax.block_until_ready(bottleneck_forward(x, kparams, tile_h=4))
    out_split = jax.block_until_ready(
        bottleneck_forward(x, kparams, tile_h=4, pack_conv2=False))

    for out in (out_packed, out_split):
        assert out.shape == ref.shape == (N, planes * 4, H, W)
        err = float(jnp.max(jnp.abs(out - ref)))
        # bf16 MXU operands (f32 accumulation) vs. f32 reference -> relaxed tol
        assert jnp.allclose(out, ref, rtol=5e-2, atol=5e-2), f"max abs err {err}"

    # TODO(synk): training-mode BatchNorm (batch statistics), stride>1 and the
    # non-identity downsample branch are not implemented (module defaults).
    # TODO(synk): optionally accept/emit bf16 activations at the HBM boundary
    # for v5e's memory-bound small-channel stages.
    print("KERNEL_OK")
</pallas_src>

<mosaic_0001>
module attributes {stable_mosaic.version = 11 : i64} {
  func.func @kernel(%arg0: i32, %arg1: i32, %arg2: memref<1x4x16x128xf32, #tpu.memory_space<vmem>>, %arg3: memref<1x1x16x128xf32, #tpu.memory_space<vmem>>, %arg4: memref<1x1x16x128xf32, #tpu.memory_space<vmem>>, %arg5: memref<128x128xbf16, #tpu.memory_space<vmem>>, %arg6: memref<1x128xf32, #tpu.memory_space<vmem>>, %arg7: memref<3x384x128xbf16, #tpu.memory_space<vmem>>, %arg8: memref<1x128xf32, #tpu.memory_space<vmem>>, %arg9: memref<128x128xbf16, #tpu.memory_space<vmem>>, %arg10: memref<1x128xf32, #tpu.memory_space<vmem>>, %arg11: memref<1x4x16x128xf32, #tpu.memory_space<vmem>>, %arg12: memref<96x128xf32, #tpu.memory_space<vmem>>, %arg13: memref<96x384xbf16, #tpu.memory_space<vmem>>) attributes {dimension_semantics = [#tpu.dimension_semantics<parallel>, #tpu.dimension_semantics<parallel>], iteration_bounds = array<i64: 2, 4>, scalar_prefetch = 0 : i64, scratch_operands = 2 : i64, tpu.core_type = #tpu.core_type<tc>, window_params = [{transform_indices = @transform_0, window_bounds = array<i64: 1, 4, 16, 128>}, {transform_indices = @transform_1, window_bounds = array<i64: 1, 1, 16, 128>}, {transform_indices = @transform_2, window_bounds = array<i64: 1, 1, 16, 128>}, {pipeline_mode = #tpu.pipeline_mode<synchronous>, transform_indices = @transform_3, window_bounds = array<i64: 128, 128>}, {pipeline_mode = #tpu.pipeline_mode<synchronous>, transform_indices = @transform_4, window_bounds = array<i64: 1, 128>}, {pipeline_mode = #tpu.pipeline_mode<synchronous>, transform_indices = @transform_5, window_bounds = array<i64: 3, 384, 128>}, {pipeline_mode = #tpu.pipeline_mode<synchronous>, transform_indices = @transform_6, window_bounds = array<i64: 1, 128>}, {pipeline_mode = #tpu.pipeline_mode<synchronous>, transform_indices = @transform_7, window_bounds = array<i64: 128, 128>}, {pipeline_mode = #tpu.pipeline_mode<synchronous>, transform_indices = @transform_8, window_bounds = array<i64: 1, 128>}, {transform_indices = @transform_9, window_bounds = array<i64: 1, 4, 16, 128>}]} {
    %c0 = arith.constant 0 : index
    %c0_0 = arith.constant 0 : index
    %0 = vector.load %arg5[%c0, %c0_0] : memref<128x128xbf16, #tpu.memory_space<vmem>>, vector<128x128xbf16>
    %c0_1 = arith.constant 0 : index
    %c0_2 = arith.constant 0 : index
    %1 = vector.load %arg6[%c0_1, %c0_2] : memref<1x128xf32, #tpu.memory_space<vmem>>, vector<1x128xf32>
    %c0_3 = arith.constant 0 : index
    %c0_4 = arith.constant 0 : index
    %c0_5 = arith.constant 0 : index
    %c0_6 = arith.constant 0 : index
    %2 = vector.load %arg2[%c0_3, %c0_4, %c0_5, %c0_6] : memref<1x4x16x128xf32, #tpu.memory_space<vmem>>, vector<1x4x16x128xf32>
    %3 = vector.shape_cast %2 : vector<1x4x16x128xf32> to vector<4x16x128xf32>
    %4 = vector.shape_cast %3 : vector<4x16x128xf32> to vector<64x128xf32>
    %5 = arith.truncf %4 : vector<64x128xf32> to vector<64x128xbf16>
    %cst = arith.constant dense<0.000000e+00> : vector<64x128xf32>
    %6 = tpu.matmul %5, %0, %cst {dimension_numbers = #tpu.dot_dimension_numbers<[1], [0], [0], [1], [0, 0, 1, 1], [], []>} : vector<64x128xbf16>, vector<128x128xbf16>, vector<64x128xf32> -> vector<64x128xf32>
    %7 = vector.broadcast %1 : vector<1x128xf32> to vector<64x128xf32>
    %8 = arith.addf %6, %7 : vector<64x128xf32>
    %cst_7 = arith.constant 0.000000e+00 : f32
    %9 = vector.broadcast %cst_7 : f32 to vector<64x128xf32>
    %10 = arith.maximumf %8, %9 : vector<64x128xf32>
    %c16 = arith.constant 16 : index
    %c0_8 = arith.constant 0 : index
    %11 = vector.load %arg12[%c16, %c0_8] : memref<96x128xf32, #tpu.memory_space<vmem>>, vector<64x128xf32>
    tpu.vector_store %arg12[%c16, %c0_8], %10 {strides = array<i32>} : memref<96x128xf32, #tpu.memory_space<vmem>>, vector<64x128xf32>,
    %c0_i32 = arith.constant 0 : i32
    %12 = arith.cmpi eq, %arg1, %c0_i32 : i32
    %13 = arith.extui %12 : i1 to i32
    %c0_i32_9 = arith.constant 0 : i32
    %14 = arith.cmpi ne, %13, %c0_i32_9 : i32
    scf.if %14 {
      %cst_57 = arith.constant 0.000000e+00 : f32
      %84 = vector.broadcast %cst_57 : f32 to vector<16x128xf32>
      %c0_58 = arith.constant 0 : index
      %c0_59 = arith.constant 0 : index
      %85 = vector.load %arg12[%c0_58, %c0_59] : memref<96x128xf32, #tpu.memory_space<vmem>>, vector<16x128xf32>
      tpu.vector_store %arg12[%c0_58, %c0_59], %84 {strides = array<i32>} : memref<96x128xf32, #tpu.memory_space<vmem>>, vector<16x128xf32>,
    } else {
    }
    %c0_i32_10 = arith.constant 0 : i32
    %15 = arith.cmpi sgt, %arg1, %c0_i32_10 : i32
    %16 = arith.extui %15 : i1 to i32
    %c0_i32_11 = arith.constant 0 : i32
    %17 = arith.cmpi ne, %16, %c0_i32_11 : i32
    scf.if %17 {
      %c0_57 = arith.constant 0 : index
      %c0_58 = arith.constant 0 : index
      %c0_59 = arith.constant 0 : index
      %c0_60 = arith.constant 0 : index
      %84 = vector.load %arg3[%c0_57, %c0_58, %c0_59, %c0_60] : memref<1x1x16x128xf32, #tpu.memory_space<vmem>>, vector<1x1x16x128xf32>
      %85 = vector.shape_cast %84 : vector<1x1x16x128xf32> to vector<16x128xf32>
      %86 = arith.truncf %85 : vector<16x128xf32> to vector<16x128xbf16>
      %cst_61 = arith.constant dense<0.000000e+00> : vector<16x128xf32>
      %87 = tpu.matmul %86, %0, %cst_61 {dimension_numbers = #tpu.dot_dimension_numbers<[1], [0], [0], [1], [0, 0, 1, 1], [], []>} : vector<16x128xbf16>, vector<128x128xbf16>, vector<16x128xf32> -> vector<16x128xf32>
      %88 = vector.broadcast %1 : vector<1x128xf32> to vector<16x128xf32>
      %89 = arith.addf %87, %88 : vector<16x128xf32>
      %cst_62 = arith.constant 0.000000e+00 : f32
      %90 = vector.broadcast %cst_62 : f32 to vector<16x128xf32>
      %91 = arith.maximumf %89, %90 : vector<16x128xf32>
      %c0_63 = arith.constant 0 : index
      %c0_64 = arith.constant 0 : index
      %92 = vector.load %arg12[%c0_63, %c0_64] : memref<96x128xf32, #tpu.memory_space<vmem>>, vector<16x128xf32>
      tpu.vector_store %arg12[%c0_63, %c0_64], %91 {strides = array<i32>} : memref<96x128xf32, #tpu.memory_space<vmem>>, vector<16x128xf32>,
    } else {
    }
    %c3_i32 = arith.constant 3 : i32
    %18 = arith.cmpi eq, %arg1, %c3_i32 : i32
    %19 = arith.extui %18 : i1 to i32
    %c0_i32_12 = arith.constant 0 : i32
    %20 = arith.cmpi ne, %19, %c0_i32_12 : i32
    scf.if %20 {
      %cst_57 = arith.constant 0.000000e+00 : f32
      %84 = vector.broadcast %cst_57 : f32 to vector<16x128xf32>
      %c80 = arith.constant 80 : index
      %c0_58 = arith.constant 0 : index
      %85 = vector.load %arg12[%c80, %c0_58] : memref<96x128xf32, #tpu.memory_space<vmem>>, vector<16x128xf32>
      tpu.vector_store %arg12[%c80, %c0_58], %84 {strides = array<i32>} : memref<96x128xf32, #tpu.memory_space<vmem>>, vector<16x128xf32>,
    } else {
    }
    %c3_i32_13 = arith.constant 3 : i32
    %21 = arith.cmpi slt, %arg1, %c3_i32_13 : i32
    %22 = arith.extui %21 : i1 to i32
    %c0_i32_14 = arith.constant 0 : i32
    %23 = arith.cmpi ne, %22, %c0_i32_14 : i32
    scf.if %23 {
      %c0_57 = arith.constant 0 : index
      %c0_58 = arith.constant 0 : index
      %c0_59 = arith.constant 0 : index
      %c0_60 = arith.constant 0 : index
      %84 = vector.load %arg4[%c0_57, %c0_58, %c0_59, %c0_60] : memref<1x1x16x128xf32, #tpu.memory_space<vmem>>, vector<1x1x16x128xf32>
      %85 = vector.shape_cast %84 : vector<1x1x16x128xf32> to vector<16x128xf32>
      %86 = arith.truncf %85 : vector<16x128xf32> to vector<16x128xbf16>
      %cst_61 = arith.constant dense<0.000000e+00> : vector<16x128xf32>
      %87 = tpu.matmul %86, %0, %cst_61 {dimension_numbers = #tpu.dot_dimension_numbers<[1], [0], [0], [1], [0, 0, 1, 1], [], []>} : vector<16x128xbf16>, vector<128x128xbf16>, vector<16x128xf32> -> vector<16x128xf32>
      %88 = vector.broadcast %1 : vector<1x128xf32> to vector<16x128xf32>
      %89 = arith.addf %87, %88 : vector<16x128xf32>
      %cst_62 = arith.constant 0.000000e+00 : f32
      %90 = vector.broadcast %cst_62 : f32 to vector<16x128xf32>
      %91 = arith.maximumf %89, %90 : vector<16x128xf32>
      %c80 = arith.constant 80 : index
      %c0_63 = arith.constant 0 : index
      %92 = vector.load %arg12[%c80, %c0_63] : memref<96x128xf32, #tpu.memory_space<vmem>>, vector<16x128xf32>
      tpu.vector_store %arg12[%c80, %c0_63], %91 {strides = array<i32>} : memref<96x128xf32, #tpu.memory_space<vmem>>, vector<16x128xf32>,
    } else {
    }
    %c0_15 = arith.constant 0 : index
    %c0_16 = arith.constant 0 : index
    %24 = vector.load %arg12[%c0_15, %c0_16] : memref<96x128xf32, #tpu.memory_space<vmem>>, vector<96x128xf32>
    %25 = tpu.iota {dimensions = array<i32: 1>} : vector<6x16x1xi32>
    %26 = vector.shape_cast %25 : vector<6x16x1xi32> to vector<96x1xi32>
    %27 = arith.truncf %24 : vector<96x128xf32> to vector<96x128xbf16>
    %c0_i32_17 = arith.constant 0 : i32
    %28 = vector.broadcast %c0_i32_17 : i32 to vector<96x1xi32>
    %29 = arith.cmpi sgt, %26, %28 : vector<96x1xi32>
    %c1_i32 = arith.constant 1 : i32
    %30 = tpu.dynamic_rotate %24 by %c1_i32 dim 0 : vector<96x128xf32>, i32 -> vector<96x128xf32>
    %cst_18 = arith.constant 0.000000e+00 : f32
    %31 = vector.shape_cast %29 : vector<96x1xi1> to vector<96x1xi1>
    %32 = vector.broadcast %31 : vector<96x1xi1> to vector<96x128xi1>
    %33 = vector.broadcast %cst_18 : f32 to vector<96x128xf32>
    %34 = arith.select %32, %30, %33 : vector<96x128xi1>, vector<96x128xf32>
    %35 = arith.truncf %34 : vector<96x128xf32> to vector<96x128xbf16>
    %c15_i32 = arith.constant 15 : i32
    %36 = vector.broadcast %c15_i32 : i32 to vector<96x1xi32>
    %37 = arith.cmpi slt, %26, %36 : vector<96x1xi32>
    %c95_i32 = arith.constant 95 : i32
    %38 = tpu.dynamic_rotate %24 by %c95_i32 dim 0 : vector<96x128xf32>, i32 -> vector<96x128xf32>
    %cst_19 = arith.constant 0.000000e+00 : f32
    %39 = vector.shape_cast %37 : vector<96x1xi1> to vector<96x1xi1>
    %40 = vector.broadcast %39 : vector<96x1xi1> to vector<96x128xi1>
    %41 = vector.broadcast %cst_19 : f32 to vector<96x128xf32>
    %42 = arith.select %40, %38, %41 : vector<96x128xi1>, vector<96x128xf32>
    %43 = arith.truncf %42 : vector<96x128xf32> to vector<96x128xbf16>
    %cst_20 = arith.constant 0.000000e+00 : f32
    %44 = vector.broadcast %cst_20 : f32 to vector<64x128xf32>
    %c0_21 = arith.constant 0 : index
    %c0_22 = arith.constant 0 : index
    %45 = vector.load %arg13[%c0_21, %c0_22] : memref<96x384xbf16, #tpu.memory_space<vmem>>, vector<96x128xbf16>
    tpu.vector_store %arg13[%c0_21, %c0_22], %35 {strides = array<i32>} : memref<96x384xbf16, #tpu.memory_space<vmem>>, vector<96x128xbf16>,
    %c0_23 = arith.constant 0 : index
    %c128 = arith.constant 128 : index
    %46 = vector.load %arg13[%c0_23, %c128] : memref<96x384xbf16, #tpu.memory_space<vmem>>, vector<96x128xbf16>
    tpu.vector_store %arg13[%c0_23, %c128], %27 {strides = array<i32>} : memref<96x384xbf16, #tpu.memory_space<vmem>>, vector<96x128xbf16>,
    %c0_24 = arith.constant 0 : index
    %c256 = arith.constant 256 : index
    %47 = vector.load %arg13[%c0_24, %c256] : memref<96x384xbf16, #tpu.memory_space<vmem>>, vector<96x128xbf16>
    tpu.vector_store %arg13[%c0_24, %c256], %43 {strides = array<i32>} : memref<96x384xbf16, #tpu.memory_space<vmem>>, vector<96x128xbf16>,
    %c0_25 = arith.constant 0 : index
    %c0_26 = arith.constant 0 : index
    %48 = vector.load %arg13[%c0_25, %c0_26] : memref<96x384xbf16, #tpu.memory_space<vmem>>, vector<64x384xbf16>
    %c0_27 = arith.constant 0 : index
    %c0_28 = arith.constant 0 : index
    %c0_29 = arith.constant 0 : index
    %49 = vector.load %arg7[%c0_27, %c0_28, %c0_29] : memref<3x384x128xbf16, #tpu.memory_space<vmem>>, vector<1x384x128xbf16>
    %50 = vector.shape_cast %49 : vector<1x384x128xbf16> to vector<384x128xbf16>
    %cst_30 = arith.constant dense<0.000000e+00> : vector<64x128xf32>
    %51 = tpu.matmul %48, %50, %cst_30 {dimension_numbers = #tpu.dot_dimension_numbers<[1], [0], [0], [1], [0, 0, 1, 1], [], []>} : vector<64x384xbf16>, vector<384x128xbf16>, vector<64x128xf32> -> vector<64x128xf32>
    %52 = arith.addf %44, %51 : vector<64x128xf32>
    %c16_31 = arith.constant 16 : index
    %c0_32 = arith.constant 0 : index
    %53 = vector.load %arg13[%c16_31, %c0_32] : memref<96x384xbf16, #tpu.memory_space<vmem>>, vector<64x384xbf16>
    %c1 = arith.constant 1 : index
    %c0_33 = arith.constant 0 : index
    %c0_34 = arith.constant 0 : index
    %54 = vector.load %arg7[%c1, %c0_33, %c0_34] : memref<3x384x128xbf16, #tpu.memory_space<vmem>>, vector<1x384x128xbf16>
    %55 = vector.shape_cast %54 : vector<1x384x128xbf16> to vector<384x128xbf16>
    %cst_35 = arith.constant dense<0.000000e+00> : vector<64x128xf32>
    %56 = tpu.matmul %53, %55, %cst_35 {dimension_numbers = #tpu.dot_dimension_numbers<[1], [0], [0], [1], [0, 0, 1, 1], [], []>} : vector<64x384xbf16>, vector<384x128xbf16>, vector<64x128xf32> -> vector<64x128xf32>
    %57 = arith.addf %52, %56 : vector<64x128xf32>
    %c32 = arith.constant 32 : index
    %c0_36 = arith.constant 0 : index
    %58 = vector.load %arg13[%c32, %c0_36] : memref<96x384xbf16, #tpu.memory_space<vmem>>, vector<64x384xbf16>
    %c2 = arith.constant 2 : index
    %c0_37 = arith.constant 0 : index
    %c0_38 = arith.constant 0 : index
    %59 = vector.load %arg7[%c2, %c0_37, %c0_38] : memref<3x384x128xbf16, #tpu.memory_space<vmem>>, vector<1x384x128xbf16>
    %60 = vector.shape_cast %59 : vector<1x384x128xbf16> to vector<384x128xbf16>
    %cst_39 = arith.constant dense<0.000000e+00> : vector<64x128xf32>
    %61 = tpu.matmul %58, %60, %cst_39 {dimension_numbers = #tpu.dot_dimension_numbers<[1], [0], [0], [1], [0, 0, 1, 1], [], []>} : vector<64x384xbf16>, vector<384x128xbf16>, vector<64x128xf32> -> vector<64x128xf32>
    %62 = arith.addf %57, %61 : vector<64x128xf32>
    %c0_40 = arith.constant 0 : index
    %c0_41 = arith.constant 0 : index
    %63 = vector.load %arg8[%c0_40, %c0_41] : memref<1x128xf32, #tpu.memory_space<vmem>>, vector<1x128xf32>
    %64 = vector.broadcast %63 : vector<1x128xf32> to vector<64x128xf32>
    %65 = arith.addf %62, %64 : vector<64x128xf32>
    %cst_42 = arith.constant 0.000000e+00 : f32
    %66 = vector.broadcast %cst_42 : f32 to vector<64x128xf32>
    %67 = arith.maximumf %65, %66 : vector<64x128xf32>
    %68 = arith.truncf %67 : vector<64x128xf32> to vector<64x128xbf16>
    %c0_43 = arith.constant 0 : index
    %c0_44 = arith.constant 0 : index
    %69 = vector.load %arg9[%c0_43, %c0_44] : memref<128x128xbf16, #tpu.memory_space<vmem>>, vector<128x128xbf16>
    %cst_45 = arith.constant dense<0.000000e+00> : vector<64x128xf32>
    %70 = tpu.matmul %68, %69, %cst_45 {dimension_numbers = #tpu.dot_dimension_numbers<[1], [0], [0], [1], [0, 0, 1, 1], [], []>} : vector<64x128xbf16>, vector<128x128xbf16>, vector<64x128xf32> -> vector<64x128xf32>
    %c0_46 = arith.constant 0 : index
    %c0_47 = arith.constant 0 : index
    %71 = vector.load %arg10[%c0_46, %c0_47] : memref<1x128xf32, #tpu.memory_space<vmem>>, vector<1x128xf32>
    %72 = vector.broadcast %71 : vector<1x128xf32> to vector<64x128xf32>
    %73 = arith.addf %70, %72 : vector<64x128xf32>
    %c0_48 = arith.constant 0 : index
    %c0_49 = arith.constant 0 : index
    %c0_50 = arith.constant 0 : index
    %c0_51 = arith.constant 0 : index
    %74 = vector.load %arg2[%c0_48, %c0_49, %c0_50, %c0_51] : memref<1x4x16x128xf32, #tpu.memory_space<vmem>>, vector<1x4x16x128xf32>
    %75 = vector.shape_cast %74 : vector<1x4x16x128xf32> to vector<4x16x128xf32>
    %76 = vector.shape_cast %75 : vector<4x16x128xf32> to vector<64x128xf32>
    %77 = arith.addf %73, %76 : vector<64x128xf32>
    %cst_52 = arith.constant 0.000000e+00 : f32
    %78 = vector.broadcast %cst_52 : f32 to vector<64x128xf32>
    %79 = arith.maximumf %77, %78 : vector<64x128xf32>
    %80 = vector.shape_cast %79 : vector<64x128xf32> to vector<4x16x128xf32>
    %c0_53 = arith.constant 0 : index
    %c0_54 = arith.constant 0 : index
    %c0_55 = arith.constant 0 : index
    %c0_56 = arith.constant 0 : index
    %81 = vector.load %arg11[%c0_53, %c0_54, %c0_55, %c0_56] : memref<1x4x16x128xf32, #tpu.memory_space<vmem>>, vector<1x4x16x128xf32>
    %82 = vector.shape_cast %81 : vector<1x4x16x128xf32> to vector<4x16x128xf32>
    %83 = vector.shape_cast %80 : vector<4x16x128xf32> to vector<1x4x16x128xf32>
    tpu.vector_store %arg11[%c0_53, %c0_54, %c0_55, %c0_56], %83 {strides = array<i32>} : memref<1x4x16x128xf32, #tpu.memory_space<vmem>>, vector<1x4x16x128xf32>,
    return
  }
  func.func @transform_0(%arg0: i32, %arg1: i32) -> (i32, i32, i32, i32) {
    %c0_i32 = arith.constant 0 : i32
    %c0_i32_0 = arith.constant 0 : i32
    %c0_i32_1 = arith.constant 0 : i32
    return %arg0, %arg1, %c0_i32, %c0_i32_0 : i32, i32, i32, i32
  }
  func.func @transform_1(%arg0: i32, %arg1: i32) -> (i32, i32, i32, i32) {
    %c0_i32 = arith.constant 0 : i32
    %c0_i32_0 = arith.constant 0 : i32
    %c0_i32_1 = arith.constant 0 : i32
    return %arg0, %arg1, %c0_i32, %c0_i32_0 : i32, i32, i32, i32
  }
  func.func @transform_2(%arg0: i32, %arg1: i32) -> (i32, i32, i32, i32) {
    %c0_i32 = arith.constant 0 : i32
    %c0_i32_0 = arith.constant 0 : i32
    %c0_i32_1 = arith.constant 0 : i32
    return %arg0, %arg1, %c0_i32, %c0_i32_0 : i32, i32, i32, i32
  }
  func.func @transform_3(%arg0: i32, %arg1: i32) -> (i32, i32) {
    %c0_i32 = arith.constant 0 : i32
    %c0_i32_0 = arith.constant 0 : i32
    %c0_i32_1 = arith.constant 0 : i32
    return %c0_i32, %c0_i32_0 : i32, i32
  }
  func.func @transform_4(%arg0: i32, %arg1: i32) -> (i32, i32) {
    %c0_i32 = arith.constant 0 : i32
    %c0_i32_0 = arith.constant 0 : i32
    %c0_i32_1 = arith.constant 0 : i32
    return %c0_i32, %c0_i32_0 : i32, i32
  }
  func.func @transform_5(%arg0: i32, %arg1: i32) -> (i32, i32, i32) {
    %c0_i32 = arith.constant 0 : i32
    %c0_i32_0 = arith.constant 0 : i32
    %c0_i32_1 = arith.constant 0 : i32
    %c0_i32_2 = arith.constant 0 : i32
    return %c0_i32, %c0_i32_0, %c0_i32_1 : i32, i32, i32
  }
  func.func @transform_6(%arg0: i32, %arg1: i32) -> (i32, i32) {
    %c0_i32 = arith.constant 0 : i32
    %c0_i32_0 = arith.constant 0 : i32
    %c0_i32_1 = arith.constant 0 : i32
    return %c0_i32, %c0_i32_0 : i32, i32
  }
  func.func @transform_7(%arg0: i32, %arg1: i32) -> (i32, i32) {
    %c0_i32 = arith.constant 0 : i32
    %c0_i32_0 = arith.constant 0 : i32
    %c0_i32_1 = arith.constant 0 : i32
    return %c0_i32, %c0_i32_0 : i32, i32
  }
  func.func @transform_8(%arg0: i32, %arg1: i32) -> (i32, i32) {
    %c0_i32 = arith.constant 0 : i32
    %c0_i32_0 = arith.constant 0 : i32
    %c0_i32_1 = arith.constant 0 : i32
    return %c0_i32, %c0_i32_0 : i32, i32
  }
  func.func @transform_9(%arg0: i32, %arg1: i32) -> (i32, i32, i32, i32) {
    %c0_i32 = arith.constant 0 : i32
    %c0_i32_0 = arith.constant 0 : i32
    %c0_i32_1 = arith.constant 0 : i32
    return %arg0, %arg1, %c0_i32, %c0_i32_0 : i32, i32, i32, i32
  }
}

module attributes {stable_mosaic.version = 11 : i64} {
  func.func @kernel(%arg0: i32, %arg1: i32, %arg2: memref<1x4x16x128xf32, #tpu.memory_space<vmem>>, %arg3: memref<1x1x16x128xf32, #tpu.memory_space<vmem>>, %arg4: memref<1x1x16x128xf32, #tpu.memory_space<vmem>>, %arg5: memref<128x128xbf16, #tpu.memory_space<vmem>>, %arg6: memref<1x128xf32, #tpu.memory_space<vmem>>, %arg7: memref<3x384x128xbf16, #tpu.memory_space<vmem>>, %arg8: memref<1x128xf32, #tpu.memory_space<vmem>>, %arg9: memref<128x128xbf16, #tpu.memory_space<vmem>>, %arg10: memref<1x128xf32, #tpu.memory_space<vmem>>, %arg11: memref<1x4x16x128xf32, #tpu.memory_space<vmem>>, %arg12: memref<96x128xf32, #tpu.memory_space<vmem>>, %arg13: memref<96x384xbf16, #tpu.memory_space<vmem>>) attributes {dimension_semantics = [#tpu.dimension_semantics<parallel>, #tpu.dimension_semantics<parallel>], iteration_bounds = array<i64: 2, 4>, scalar_prefetch = 0 : i64, scratch_operands = 2 : i64, tpu.core_type = #tpu.core_type<tc>, window_params = [{transform_indices = @transform_0, window_bounds = array<i64: 1, 4, 16, 128>}, {transform_indices = @transform_1, window_bounds = array<i64: 1, 1, 16, 128>}, {transform_indices = @transform_2, window_bounds = array<i64: 1, 1, 16, 128>}, {pipeline_mode = #tpu.pipeline_mode<synchronous>, transform_indices = @transform_3, window_bounds = array<i64: 128, 128>}, {pipeline_mode = #tpu.pipeline_mode<synchronous>, transform_indices = @transform_4, window_bounds = array<i64: 1, 128>}, {pipeline_mode = #tpu.pipeline_mode<synchronous>, transform_indices = @transform_5, window_bounds = array<i64: 3, 384, 128>}, {pipeline_mode = #tpu.pipeline_mode<synchronous>, transform_indices = @transform_6, window_bounds = array<i64: 1, 128>}, {pipeline_mode = #tpu.pipeline_mode<synchronous>, transform_indices = @transform_7, window_bounds = array<i64: 128, 128>}, {pipeline_mode = #tpu.pipeline_mode<synchronous>, transform_indices = @transform_8, window_bounds = array<i64: 1, 128>}, {transform_indices = @transform_9, window_bounds = array<i64: 1, 4, 16, 128>}]} {
    %c0 = arith.constant 0 : index
    %c0_0 = arith.constant 0 : index
    %0 = vector.load %arg5[%c0, %c0_0] : memref<128x128xbf16, #tpu.memory_space<vmem>>, vector<128x128xbf16>
    %c0_1 = arith.constant 0 : index
    %c0_2 = arith.constant 0 : index
    %1 = vector.load %arg6[%c0_1, %c0_2] : memref<1x128xf32, #tpu.memory_space<vmem>>, vector<1x128xf32>
    %c0_3 = arith.constant 0 : index
    %c0_4 = arith.constant 0 : index
    %c0_5 = arith.constant 0 : index
    %c0_6 = arith.constant 0 : index
    %2 = vector.load %arg2[%c0_3, %c0_4, %c0_5, %c0_6] : memref<1x4x16x128xf32, #tpu.memory_space<vmem>>, vector<1x4x16x128xf32>
    %3 = vector.shape_cast %2 : vector<1x4x16x128xf32> to vector<4x16x128xf32>
    %4 = vector.shape_cast %3 : vector<4x16x128xf32> to vector<64x128xf32>
    %5 = arith.truncf %4 : vector<64x128xf32> to vector<64x128xbf16>
    %cst = arith.constant dense<0.000000e+00> : vector<64x128xf32>
    %6 = tpu.matmul %5, %0, %cst {dimension_numbers = #tpu.dot_dimension_numbers<[1], [0], [0], [1], [0, 0, 1, 1], [], []>} : vector<64x128xbf16>, vector<128x128xbf16>, vector<64x128xf32> -> vector<64x128xf32>
    %7 = vector.broadcast %1 : vector<1x128xf32> to vector<64x128xf32>
    %8 = arith.addf %6, %7 : vector<64x128xf32>
    %cst_7 = arith.constant 0.000000e+00 : f32
    %9 = vector.broadcast %cst_7 : f32 to vector<64x128xf32>
    %10 = arith.maximumf %8, %9 : vector<64x128xf32>
    %c16 = arith.constant 16 : index
    %c0_8 = arith.constant 0 : index
    %11 = vector.load %arg12[%c16, %c0_8] : memref<96x128xf32, #tpu.memory_space<vmem>>, vector<64x128xf32>
    tpu.vector_store %arg12[%c16, %c0_8], %10 {strides = array<i32>} : memref<96x128xf32, #tpu.memory_space<vmem>>, vector<64x128xf32>,
    %c0_i32 = arith.constant 0 : i32
    %12 = arith.cmpi eq, %arg1, %c0_i32 : i32
    %13 = arith.extui %12 : i1 to i32
    %c0_i32_9 = arith.constant 0 : i32
    %14 = arith.cmpi ne, %13, %c0_i32_9 : i32
    scf.if %14 {
      %cst_57 = arith.constant 0.000000e+00 : f32
      %84 = vector.broadcast %cst_57 : f32 to vector<16x128xf32>
      %c0_58 = arith.constant 0 : index
      %c0_59 = arith.constant 0 : index
      %85 = vector.load %arg12[%c0_58, %c0_59] : memref<96x128xf32, #tpu.memory_space<vmem>>, vector<16x128xf32>
      tpu.vector_store %arg12[%c0_58, %c0_59], %84 {strides = array<i32>} : memref<96x128xf32, #tpu.memory_space<vmem>>, vector<16x128xf32>,
    } else {
    }
    %c0_i32_10 = arith.constant 0 : i32
    %15 = arith.cmpi sgt, %arg1, %c0_i32_10 : i32
    %16 = arith.extui %15 : i1 to i32
    %c0_i32_11 = arith.constant 0 : i32
    %17 = arith.cmpi ne, %16, %c0_i32_11 : i32
    scf.if %17 {
      %c0_57 = arith.constant 0 : index
      %c0_58 = arith.constant 0 : index
      %c0_59 = arith.constant 0 : index
      %c0_60 = arith.constant 0 : index
      %84 = vector.load %arg3[%c0_57, %c0_58, %c0_59, %c0_60] : memref<1x1x16x128xf32, #tpu.memory_space<vmem>>, vector<1x1x16x128xf32>
      %85 = vector.shape_cast %84 : vector<1x1x16x128xf32> to vector<16x128xf32>
      %86 = arith.truncf %85 : vector<16x128xf32> to vector<16x128xbf16>
      %cst_61 = arith.constant dense<0.000000e+00> : vector<16x128xf32>
      %87 = tpu.matmul %86, %0, %cst_61 {dimension_numbers = #tpu.dot_dimension_numbers<[1], [0], [0], [1], [0, 0, 1, 1], [], []>} : vector<16x128xbf16>, vector<128x128xbf16>, vector<16x128xf32> -> vector<16x128xf32>
      %88 = vector.broadcast %1 : vector<1x128xf32> to vector<16x128xf32>
      %89 = arith.addf %87, %88 : vector<16x128xf32>
      %cst_62 = arith.constant 0.000000e+00 : f32
      %90 = vector.broadcast %cst_62 : f32 to vector<16x128xf32>
      %91 = arith.maximumf %89, %90 : vector<16x128xf32>
      %c0_63 = arith.constant 0 : index
      %c0_64 = arith.constant 0 : index
      %92 = vector.load %arg12[%c0_63, %c0_64] : memref<96x128xf32, #tpu.memory_space<vmem>>, vector<16x128xf32>
      tpu.vector_store %arg12[%c0_63, %c0_64], %91 {strides = array<i32>} : memref<96x128xf32, #tpu.memory_space<vmem>>, vector<16x128xf32>,
    } else {
    }
    %c3_i32 = arith.constant 3 : i32
    %18 = arith.cmpi eq, %arg1, %c3_i32 : i32
    %19 = arith.extui %18 : i1 to i32
    %c0_i32_12 = arith.constant 0 : i32
    %20 = arith.cmpi ne, %19, %c0_i32_12 : i32
    scf.if %20 {
      %cst_57 = arith.constant 0.000000e+00 : f32
      %84 = vector.broadcast %cst_57 : f32 to vector<16x128xf32>
      %c80 = arith.constant 80 : index
      %c0_58 = arith.constant 0 : index
      %85 = vector.load %arg12[%c80, %c0_58] : memref<96x128xf32, #tpu.memory_space<vmem>>, vector<16x128xf32>
      tpu.vector_store %arg12[%c80, %c0_58], %84 {strides = array<i32>} : memref<96x128xf32, #tpu.memory_space<vmem>>, vector<16x128xf32>,
    } else {
    }
    %c3_i32_13 = arith.constant 3 : i32
    %21 = arith.cmpi slt, %arg1, %c3_i32_13 : i32
    %22 = arith.extui %21 : i1 to i32
    %c0_i32_14 = arith.constant 0 : i32
    %23 = arith.cmpi ne, %22, %c0_i32_14 : i32
    scf.if %23 {
      %c0_57 = arith.constant 0 : index
      %c0_58 = arith.constant 0 : index
      %c0_59 = arith.constant 0 : index
      %c0_60 = arith.constant 0 : index
      %84 = vector.load %arg4[%c0_57, %c0_58, %c0_59, %c0_60] : memref<1x1x16x128xf32, #tpu.memory_space<vmem>>, vector<1x1x16x128xf32>
      %85 = vector.shape_cast %84 : vector<1x1x16x128xf32> to vector<16x128xf32>
      %86 = arith.truncf %85 : vector<16x128xf32> to vector<16x128xbf16>
      %cst_61 = arith.constant dense<0.000000e+00> : vector<16x128xf32>
      %87 = tpu.matmul %86, %0, %cst_61 {dimension_numbers = #tpu.dot_dimension_numbers<[1], [0], [0], [1], [0, 0, 1, 1], [], []>} : vector<16x128xbf16>, vector<128x128xbf16>, vector<16x128xf32> -> vector<16x128xf32>
      %88 = vector.broadcast %1 : vector<1x128xf32> to vector<16x128xf32>
      %89 = arith.addf %87, %88 : vector<16x128xf32>
      %cst_62 = arith.constant 0.000000e+00 : f32
      %90 = vector.broadcast %cst_62 : f32 to vector<16x128xf32>
      %91 = arith.maximumf %89, %90 : vector<16x128xf32>
      %c80 = arith.constant 80 : index
      %c0_63 = arith.constant 0 : index
      %92 = vector.load %arg12[%c80, %c0_63] : memref<96x128xf32, #tpu.memory_space<vmem>>, vector<16x128xf32>
      tpu.vector_store %arg12[%c80, %c0_63], %91 {strides = array<i32>} : memref<96x128xf32, #tpu.memory_space<vmem>>, vector<16x128xf32>,
    } else {
    }
    %c0_15 = arith.constant 0 : index
    %c0_16 = arith.constant 0 : index
    %24 = vector.load %arg12[%c0_15, %c0_16] : memref<96x128xf32, #tpu.memory_space<vmem>>, vector<96x128xf32>
    %25 = tpu.iota {dimensions = array<i32: 1>} : vector<6x16x1xi32>
    %26 = vector.shape_cast %25 : vector<6x16x1xi32> to vector<96x1xi32>
    %27 = arith.truncf %24 : vector<96x128xf32> to vector<96x128xbf16>
    %c0_i32_17 = arith.constant 0 : i32
    %28 = vector.broadcast %c0_i32_17 : i32 to vector<96x1xi32>
    %29 = arith.cmpi sgt, %26, %28 : vector<96x1xi32>
    %c1_i32 = arith.constant 1 : i32
    %30 = tpu.dynamic_rotate %24 by %c1_i32 dim 0 : vector<96x128xf32>, i32 -> vector<96x128xf32>
    %cst_18 = arith.constant 0.000000e+00 : f32
    %31 = vector.shape_cast %29 : vector<96x1xi1> to vector<96x1xi1>
    %32 = vector.broadcast %31 : vector<96x1xi1> to vector<96x128xi1>
    %33 = vector.broadcast %cst_18 : f32 to vector<96x128xf32>
    %34 = arith.select %32, %30, %33 : vector<96x128xi1>, vector<96x128xf32>
    %35 = arith.truncf %34 : vector<96x128xf32> to vector<96x128xbf16>
    %c15_i32 = arith.constant 15 : i32
    %36 = vector.broadcast %c15_i32 : i32 to vector<96x1xi32>
    %37 = arith.cmpi slt, %26, %36 : vector<96x1xi32>
    %c95_i32 = arith.constant 95 : i32
    %38 = tpu.dynamic_rotate %24 by %c95_i32 dim 0 : vector<96x128xf32>, i32 -> vector<96x128xf32>
    %cst_19 = arith.constant 0.000000e+00 : f32
    %39 = vector.shape_cast %37 : vector<96x1xi1> to vector<96x1xi1>
    %40 = vector.broadcast %39 : vector<96x1xi1> to vector<96x128xi1>
    %41 = vector.broadcast %cst_19 : f32 to vector<96x128xf32>
    %42 = arith.select %40, %38, %41 : vector<96x128xi1>, vector<96x128xf32>
    %43 = arith.truncf %42 : vector<96x128xf32> to vector<96x128xbf16>
    %cst_20 = arith.constant 0.000000e+00 : f32
    %44 = vector.broadcast %cst_20 : f32 to vector<64x128xf32>
    %c0_21 = arith.constant 0 : index
    %c0_22 = arith.constant 0 : index
    %45 = vector.load %arg13[%c0_21, %c0_22] : memref<96x384xbf16, #tpu.memory_space<vmem>>, vector<96x128xbf16>
    tpu.vector_store %arg13[%c0_21, %c0_22], %35 {strides = array<i32>} : memref<96x384xbf16, #tpu.memory_space<vmem>>, vector<96x128xbf16>,
    %c0_23 = arith.constant 0 : index
    %c128 = arith.constant 128 : index
    %46 = vector.load %arg13[%c0_23, %c128] : memref<96x384xbf16, #tpu.memory_space<vmem>>, vector<96x128xbf16>
    tpu.vector_store %arg13[%c0_23, %c128], %27 {strides = array<i32>} : memref<96x384xbf16, #tpu.memory_space<vmem>>, vector<96x128xbf16>,
    %c0_24 = arith.constant 0 : index
    %c256 = arith.constant 256 : index
    %47 = vector.load %arg13[%c0_24, %c256] : memref<96x384xbf16, #tpu.memory_space<vmem>>, vector<96x128xbf16>
    tpu.vector_store %arg13[%c0_24, %c256], %43 {strides = array<i32>} : memref<96x384xbf16, #tpu.memory_space<vmem>>, vector<96x128xbf16>,
    %c0_25 = arith.constant 0 : index
    %c0_26 = arith.constant 0 : index
    %48 = vector.load %arg13[%c0_25, %c0_26] : memref<96x384xbf16, #tpu.memory_space<vmem>>, vector<64x384xbf16>
    %c0_27 = arith.constant 0 : index
    %c0_28 = arith.constant 0 : index
    %c0_29 = arith.constant 0 : index
    %49 = vector.load %arg7[%c0_27, %c0_28, %c0_29] : memref<3x384x128xbf16, #tpu.memory_space<vmem>>, vector<1x384x128xbf16>
    %50 = vector.shape_cast %49 : vector<1x384x128xbf16> to vector<384x128xbf16>
    %cst_30 = arith.constant dense<0.000000e+00> : vector<64x128xf32>
    %51 = tpu.matmul %48, %50, %cst_30 {dimension_numbers = #tpu.dot_dimension_numbers<[1], [0], [0], [1], [0, 0, 1, 1], [], []>} : vector<64x384xbf16>, vector<384x128xbf16>, vector<64x128xf32> -> vector<64x128xf32>
    %52 = arith.addf %44, %51 : vector<64x128xf32>
    %c16_31 = arith.constant 16 : index
    %c0_32 = arith.constant 0 : index
    %53 = vector.load %arg13[%c16_31, %c0_32] : memref<96x384xbf16, #tpu.memory_space<vmem>>, vector<64x384xbf16>
    %c1 = arith.constant 1 : index
    %c0_33 = arith.constant 0 : index
    %c0_34 = arith.constant 0 : index
    %54 = vector.load %arg7[%c1, %c0_33, %c0_34] : memref<3x384x128xbf16, #tpu.memory_space<vmem>>, vector<1x384x128xbf16>
    %55 = vector.shape_cast %54 : vector<1x384x128xbf16> to vector<384x128xbf16>
    %cst_35 = arith.constant dense<0.000000e+00> : vector<64x128xf32>
    %56 = tpu.matmul %53, %55, %cst_35 {dimension_numbers = #tpu.dot_dimension_numbers<[1], [0], [0], [1], [0, 0, 1, 1], [], []>} : vector<64x384xbf16>, vector<384x128xbf16>, vector<64x128xf32> -> vector<64x128xf32>
    %57 = arith.addf %52, %56 : vector<64x128xf32>
    %c32 = arith.constant 32 : index
    %c0_36 = arith.constant 0 : index
    %58 = vector.load %arg13[%c32, %c0_36] : memref<96x384xbf16, #tpu.memory_space<vmem>>, vector<64x384xbf16>
    %c2 = arith.constant 2 : index
    %c0_37 = arith.constant 0 : index
    %c0_38 = arith.constant 0 : index
    %59 = vector.load %arg7[%c2, %c0_37, %c0_38] : memref<3x384x128xbf16, #tpu.memory_space<vmem>>, vector<1x384x128xbf16>
    %60 = vector.shape_cast %59 : vector<1x384x128xbf16> to vector<384x128xbf16>
    %cst_39 = arith.constant dense<0.000000e+00> : vector<64x128xf32>
    %61 = tpu.matmul %58, %60, %cst_39 {dimension_numbers = #tpu.dot_dimension_numbers<[1], [0], [0], [1], [0, 0, 1, 1], [], []>} : vector<64x384xbf16>, vector<384x128xbf16>, vector<64x128xf32> -> vector<64x128xf32>
    %62 = arith.addf %57, %61 : vector<64x128xf32>
    %c0_40 = arith.constant 0 : index
    %c0_41 = arith.constant 0 : index
    %63 = vector.load %arg8[%c0_40, %c0_41] : memref<1x128xf32, #tpu.memory_space<vmem>>, vector<1x128xf32>
    %64 = vector.broadcast %63 : vector<1x128xf32> to vector<64x128xf32>
    %65 = arith.addf %62, %64 : vector<64x128xf32>
    %cst_42 = arith.constant 0.000000e+00 : f32
    %66 = vector.broadcast %cst_42 : f32 to vector<64x128xf32>
    %67 = arith.maximumf %65, %66 : vector<64x128xf32>
    %68 = arith.truncf %67 : vector<64x128xf32> to vector<64x128xbf16>
    %c0_43 = arith.constant 0 : index
    %c0_44 = arith.constant 0 : index
    %69 = vector.load %arg9[%c0_43, %c0_44] : memref<128x128xbf16, #tpu.memory_space<vmem>>, vector<128x128xbf16>
    %cst_45 = arith.constant dense<0.000000e+00> : vector<64x128xf32>
    %70 = tpu.matmul %68, %69, %cst_45 {dimension_numbers = #tpu.dot_dimension_numbers<[1], [0], [0], [1], [0, 0, 1, 1], [], []>} : vector<64x128xbf16>, vector<128x128xbf16>, vector<64x128xf32> -> vector<64x128xf32>
    %c0_46 = arith.constant 0 : index
    %c0_47 = arith.constant 0 : index
    %71 = vector.load %arg10[%c0_46, %c0_47] : memref<1x128xf32, #tpu.memory_space<vmem>>, vector<1x128xf32>
    %72 = vector.broadcast %71 : vector<1x128xf32> to vector<64x128xf32>
    %73 = arith.addf %70, %72 : vector<64x128xf32>
    %c0_48 = arith.constant 0 : index
    %c0_49 = arith.constant 0 : index
    %c0_50 = arith.constant 0 : index
    %c0_51 = arith.constant 0 : index
    %74 = vector.load %arg2[%c0_48, %c0_49, %c0_50, %c0_51] : memref<1x4x16x128xf32, #tpu.memory_space<vmem>>, vector<1x4x16x128xf32>
    %75 = vector.shape_cast %74 : vector<1x4x16x128xf32> to vector<4x16x128xf32>
    %76 = vector.shape_cast %75 : vector<4x16x128xf32> to vector<64x128xf32>
    %77 = arith.addf %73, %76 : vector<64x128xf32>
    %cst_52 = arith.constant 0.000000e+00 : f32
    %78 = vector.broadcast %cst_52 : f32 to vector<64x128xf32>
    %79 = arith.maximumf %77, %78 : vector<64x128xf32>
    %80 = vector.shape_cast %79 : vector<64x128xf32> to vector<4x16x128xf32>
    %c0_53 = arith.constant 0 : index
    %c0_54 = arith.constant 0 : index
    %c0_55 = arith.constant 0 : index
    %c0_56 = arith.constant 0 : index
    %81 = vector.load %arg11[%c0_53, %c0_54, %c0_55, %c0_56] : memref<1x4x16x128xf32, #tpu.memory_space<vmem>>, vector<1x4x16x128xf32>
    %82 = vector.shape_cast %81 : vector<1x4x16x128xf32> to vector<4x16x128xf32>
    %83 = vector.shape_cast %80 : vector<4x16x128xf32> to vector<1x4x16x128xf32>
    tpu.vector_store %arg11[%c0_53, %c0_54, %c0_55, %c0_56], %83 {strides = array<i32>} : memref<1x4x16x128xf32, #tpu.memory_space<vmem>>, vector<1x4x16x128xf32>,
    return
  }
  func.func @transform_0(%arg0: i32, %arg1: i32) -> (i32, i32, i32, i32) {
    %c0_i32 = arith.constant 0 : i32
    %c0_i32_0 = arith.constant 0 : i32
    %c0_i32_1 = arith.constant 0 : i32
    return %arg0, %arg1, %c0_i32, %c0_i32_0 : i32, i32, i32, i32
  }
  func.func @transform_1(%arg0: i32, %arg1: i32) -> (i32, i32, i32, i32) {
    %c0_i32 = arith.constant 0 : i32
    %c0_i32_0 = arith.constant 0 : i32
    %c0_i32_1 = arith.constant 0 : i32
    return %arg0, %arg1, %c0_i32, %c0_i32_0 : i32, i32, i32, i32
  }
  func.func @transform_2(%arg0: i32, %arg1: i32) -> (i32, i32, i32, i32) {
    %c0_i32 = arith.constant 0 : i32
    %c0_i32_0 = arith.constant 0 : i32
    %c0_i32_1 = arith.constant 0 : i32
    return %arg0, %arg1, %c0_i32, %c0_i32_0 : i32, i32, i32, i32
  }
  func.func @transform_3(%arg0: i32, %arg1: i32) -> (i32, i32) {
    %c0_i32 = arith.constant 0 : i32
    %c0_i32_0 = arith.constant 0 : i32
    %c0_i32_1 = arith.constant 0 : i32
    return %c0_i32, %c0_i32_0 : i32, i32
  }
  func.func @transform_4(%arg0: i32, %arg1: i32) -> (i32, i32) {
    %c0_i32 = arith.constant 0 : i32
    %c0_i32_0 = arith.constant 0 : i32
    %c0_i32_1 = arith.constant 0 : i32
    return %c0_i32, %c0_i32_0 : i32, i32
  }
  func.func @transform_5(%arg0: i32, %arg1: i32) -> (i32, i32, i32) {
    %c0_i32 = arith.constant 0 : i32
    %c0_i32_0 = arith.constant 0 : i32
    %c0_i32_1 = arith.constant 0 : i32
    %c0_i32_2 = arith.constant 0 : i32
    return %c0_i32, %c0_i32_0, %c0_i32_1 : i32, i32, i32
  }
  func.func @transform_6(%arg0: i32, %arg1: i32) -> (i32, i32) {
    %c0_i32 = arith.constant 0 : i32
    %c0_i32_0 = arith.constant 0 : i32
    %c0_i32_1 = arith.constant 0 : i32
    return %c0_i32, %c0_i32_0 : i32, i32
  }
  func.func @transform_7(%arg0: i32, %arg1: i32) -> (i32, i32) {
    %c0_i32 = arith.constant 0 : i32
    %c0_i32_0 = arith.constant 0 : i32
    %c0_i32_1 = arith.constant 0 : i32
    return %c0_i32, %c0_i32_0 : i32, i32
  }
  func.func @transform_8(%arg0: i32, %arg1: i32) -> (i32, i32) {
    %c0_i32 = arith.constant 0 : i32
    %c0_i32_0 = arith.constant 0 : i32
    %c0_i32_1 = arith.constant 0 : i32
    return %c0_i32, %c0_i32_0 : i32, i32
  }
  func.func @transform_9(%arg0: i32, %arg1: i32) -> (i32, i32, i32, i32) {
    %c0_i32 = arith.constant 0 : i32
    %c0_i32_0 = arith.constant 0 : i32
    %c0_i32_1 = arith.constant 0 : i32
    return %arg0, %arg1, %c0_i32, %c0_i32_0 : i32, i32, i32, i32
  }
}

</mosaic_0001>

<bundles_post_ra>
// kernel: tpu_custom_call.1
= control target key start
LH: loop header
LB: loop body
LE: loop exit
PB: predicated region body
PF: predicated region fallthrough
CT: control target
= control target key end

     0   :  { %s4260_s0 = inlined_call_operand.hbm [shape: f32[2,16,16,128], index: 0, kind: input, shape index: {}]   ;;  %s4261_s1 = inlined_call_operand.hbm [shape: f32[2,4,16,128], index: 1, kind: input, shape index: {}]   ;;  %s4262_s2 = inlined_call_operand.hbm [shape: f32[2,4,16,128], index: 2, kind: input, shape index: {}]   ;;  %s4263_s3 = inlined_call_operand.hbm [shape: bf16[128,128], index: 3, kind: input, shape index: {}]   ;;  %s4264_s4 = inlined_call_operand.vmem [shape: f32[1,128], index: 4, kind: input, shape index: {}]   ;;  %s4265_s5 = inlined_call_operand.hbm [shape: bf16[3,384,128], index: 5, kind: input, shape index: {}]   ;;  %s4266_s6 = inlined_call_operand.vmem [shape: f32[1,128], index: 6, kind: input, shape index: {}]   ;;  %s4267_s7 = inlined_call_operand.hbm [shape: bf16[128,128], index: 7, kind: input, shape index: {}]   ;;  %s4268_s8 = inlined_call_operand.vmem [shape: f32[1,128], index: 8, kind: input, shape index: {}]   ;;  %s4269_s9 = inlined_call_operand.hbm [shape: f32[2,16,16,128], index: 9, kind: output, shape index: {}]  }
   0x1   :  { %4301 = sst [smem:[#allocation34_spill]] %s4261_s1 }
   0x2   :  { %4302 = sst [smem:[#allocation35_spill]] %s4263_s3 }
   0x3   :  { %4303 = sst [smem:[#allocation36_spill]] %s4264_s4 }
   0x4   :  { %4304 = sst [smem:[#allocation37_spill]] %s4266_s6 }
   0x5   :  { %4305 = sst [smem:[#allocation38_spill]] %s4268_s8 }
   0x6   :  { %4306 = sst [smem:[#allocation39_spill]] %s4269_s9 }
   0x7   :  { %14 = vsyncpa [#allocation5], 0 }
   0x8   :  { %16 = vsyncpa [#allocation5 + $0x1], 0 }
   0x9   :  { %17 = vsyncpa [#allocation8], 0 }
   0xa   :  { %19 = vsyncpa [#allocation8 + $0x1], 0 }
   0xb   :  { %20 = vsyncpa [#allocation11], 0 }
   0xc   :  { %21 = vsyncpa [#allocation14], 0 }
   0xd   :  { %22 = vsyncpa [#allocation6], 0 }
   0xe   :  { %24 = vsyncpa [#allocation6 + $0x1], 0  ;;  %s3512_s30 = smov 0   ;;  %s3514_s10 = smov 0  }
   0xf   :  { %s3516_s11 = smov 0   ;;  %s3518_s12 = smov 0  }
  0x10   :  { %s3520_s13 = smov 0   ;;  %s3522_s14 = smov 0  }
  0x11   :  { %s3524_s15 = smov 0   ;;  %s3526_s16 = smov 0  }
  0x12 LB: > { %4307 = sst [smem:[#allocation21_spill]] %s3412_s30  ;;  %s3553_s17 = sadd.s32 4294967295, %s3440_s16   ;;  %s3440_s16 = sphi %s3526_s16, %s30_s16   ;;  %s3436_s15 = sphi %s3524_s15, %s4376_s15   ;;  %s3432_s14 = sphi %s3522_s14, %s4375_s14   ;;  %s3428_s13 = sphi %s3520_s13, %s4374_s13   ;;  %s3424_s12 = sphi %s3518_s12, %s4373_s12   ;;  %s3420_s11 = sphi %s3516_s11, %s4370_s11   ;;  %s3416_s10 = sphi %s3514_s10, %s4369_s10   ;;  %s3412_s30 = sphi %s3512_s30, %s4368_s30  }
  0x13   : > { %4308 = sst [smem:[#allocation22_spill]] %s3416_s10  ;;  %s2303_s18 = sadd.s32 4294967294, %s3440_s16  }
  0x14   : > { %4309 = sst [smem:[#allocation23_spill]] %s3420_s11  ;;  %p58_p0 = scmp.ne.s32.totalorder %s3420_s11, %s3416_s10 }
  0x15   : > { %4310 = sst [smem:[#allocation24_spill]] %s3424_s12  ;;  %p59_p1 = scmp.eq.s32.totalorder %s3440_s16, 0 }
  0x16   : > { %4311 = sst [smem:[#allocation25_spill]] %s3428_s13  ;;  %p64_p2 = scmp.ne.s32.totalorder %s3416_s10, %s3412_s30 }
  0x17   : > { %4312 = sst [smem:[#allocation26_spill]] %s3440_s16  ;;  %p4275_p3 = scmp.eq.s32.totalorder %s3553_s17, 0 }
  0x18   : > { %4313 = sst [smem:[#allocation27_spill]] %s3553_s17  ;;  %p272_p4 = scmp.eq.s32.totalorder %s3553_s17, 7 }
  0x19   : > { %p3564_p5 = por %p59_p1, %p58_p0  ;;  %p278_p6 = scmp.eq.s32.totalorder %s2303_s18, 7 }
  0x1a   : > { %p3570_p7 = por %p4275_p3, %p64_p2  ;;  %p3574_p8 = por %p272_p4, %p58_p0 }
  0x1b   : > { %s4314_s20 = scalar_select %p3564_p5, 1, 0 }
  0x1c   : > { %s4315_s21 = scalar_select %p3570_p7, 1, 0 }
  0x1d   : > { %s4317_s22 = scalar_select %p3574_p8, 1, 0 }
  0x1e   : > { %4316 = sst [smem:[#allocation28_spill]] %s4315_s21  ;;  %p3578_p9 = por %p278_p6, %p64_p2 }
  0x1f   : > { %4318 = sst [smem:[#allocation29_spill]] %s4317_s22  ;;  %p2304_p10 = scmp.ge.s32.totalorder %s3440_s16, 1 }
  0x20   : > { %s4319_s23 = scalar_select %p3578_p9, 1, 0 }
  0x21   : > { %p285_p11 = scmp.lt.s32.totalorder %s3440_s16, 9  ;;  %s3442_s25 = smov [#allocation10]  }
  0x22   : > { %4320 = sst [smem:[#allocation30_spill]] %s4319_s23  ;;  %s297_s26 = sshll.u32 %s3442_s25, 4  ;;  %s298_s26 = int_to_ptr.vmem [resolvable:$true] %s297_s26 }
  0x23   : > { %p3584_p12 = pnand %p2304_p10, %p285_p11  ;;  %s42_s28 = sadd.s32 1, %s3436_s15 }
  0x24   : > { %s39_s29 = sadd.s32 1, %s3432_s14  ;;  %s4323_s3 = sld [smem:[#allocation35_spill]] }
  0x25   : > { %s4321_s24 = scalar_select %p3584_p12, 1, 0 }
  0x26   : > { %p2956_p13 = pneg %p3584_p12 }
  0x28   : > { %p3592_p0 = pnand %p2956_p13, %p4275_p3 }
  0x2a   : > { %s4322_s27 = scalar_select %p3592_p0, 1, 0 }
  0x2b   : > { %s3156_s23 = scalar_lea.hbm %s4323_s3, 1024  ;;  %p3606_p2 = pneg %p3592_p0 }
  0x2c   : > { %p3157_p1 = scmp.ne.s32.totalorder %s4323_s3, %s3156_s23  ;;  %p3163_p10 = scmp.lt.u32.totalorder %s3156_s23, %s4323_s3 }
  0x2d   : > { %s4324_s25 = scalar_select %p3606_p2, 1, 0 }
  0x2e   : > { %p3159_p4 = pnand %p3606_p2, %p3157_p1 }
  0x30   : > { %p3160_p6 = pneg %p3159_p4 }
  0x32   : > { %p3165_p11 = pnand %p3163_p10, %p3160_p6 }
  0x34   : > { %3168 = shalt.err (!%p3165_p11)
}
  0x35   : > { %s3169_s19 = scalar_lea.vmem %s298_s26, 1024  ;;  %p3177_p8 = scmp.lt.s32.totalorder %s298_s26, %s298_s26 }
  0x36   : > { %p3170_p13 = scmp.ne.s32.totalorder %s298_s26, %s3169_s19  ;;  %p3178_p7 = scmp.lt.s32.totalorder %s3169_s19, %s3169_s19 }
  0x38   : > { %p3172_p3 = pnand %p3170_p13, %p3606_p2  ;;  %p3179_p12 = por %p3178_p7, %p3177_p8 }
  0x3a   : > { %p3173_p9 = pneg %p3172_p3 }
  0x3c   : > { %p3180_p5 = pnand %p3179_p12, %p3173_p9 }
  0x3e   : > { %3183 = shalt.err (!%p3180_p5)
}
  0x3f   : > { %s4279_s9 = smov 64   ;;  %s4281_s30 = smov 4  }
  0x40   : > { %2959 = dma.hbm_to_vmem [thread:$0]  (!%p3592_p0), %s4323_s3, 1024, %s298_s26, [#allocation11], %s4279_s9, %s4279_s9, %s4281_s30  }
  0x41   : > { %p40_p3 = scmp.ge.s32.totalorder %s39_s29, 4  ;;  %p2983_p5 = scmp.lt.s32.totalorder %s3440_s16, 8 }
  0x42   : > { %s3627_s23 = sand.u32 1, %s3420_s11   ;;  %p4326_p7 = scmp.ne.s32.totalorder %s4314_s20, 0 }
  0x43   : > { %s4378_s29 = smov (%p40_p3, %s39_s29), 0  ;;  %s4380_s28 = smov (!%p40_p3, %s42_s28), %s3436_s15 }
  0x44   : > { %4325 = sst [smem:[#allocation31_spill]] %s4378_s29  ;;  %s47_s18 = ssub.s32 %s3432_s14, %s4378_s29 }
  0x45   : > { %p3636_p8 = pnand %p2983_p5, %p4326_p7  ;;  %p44_p9 = scmp.ge.s32.totalorder %s4380_s28, 2 }
  0x46   : > { %s370_s26 = sand.u32 1, %s3440_s16   ;;  %s2314_s13 = sshll.u32 %s3627_s23, 4 }
  0x47   : > { %s4327_s19 = scalar_select %p3636_p8, 1, 0 }
  0x48   : > { %s4382_s28 = smov (%p44_p9, %s4380_s28), 0  ;;  %s2315_s30 = sshll.u32 %s3432_s14, 1 }
  0x49   : > { %4328 = sst [smem:[#allocation32_spill]] %s4382_s28  ;;  %s46_s22 = ssub.s32 %s3436_s15, %s4382_s28 }
  0x4a   : > { %s48_s9 = sor.u32 %s47_s18, %s46_s22  ;;  %s2316_s3 = sshll.u32 %s3436_s15, 3 }
  0x4b   : > { %p49_p12 = scmp.eq.s32.totalorder %s48_s9, 0  ;;  %s3648_s8 = sadd.s32 %s2316_s3, %s2315_s30 }
  0x4c   : > { %s374_s20 = scalar_lea.vmem [#allocation7], %s2314_s13  ;;  %s4329_s6 = sadd.s32 1, %s3420_s11 }
  0x4d   : > { %s383_s29 = sshll.u32 %s374_s20, 4  ;;  %s2317_s16 = sshll.u32 %s3648_s8, 7  ;;  %s3658_s29 = int_to_ptr.vmem [resolvable:$true] %s383_s29 }
  0x4e   : > { %s3655_s12 = scalar_select %p49_p12, %s3420_s11, %s4329_s6  }
  0x4f   : > { %s4331_s1 = sld [smem:[#allocation34_spill]]  ;;  %s3667_s3 = scalar_lea.sflag [#allocation8], %s370_s26 }
  0x50   : > { %4330 = sst [smem:[#allocation33_spill]] %s3655_s12  ;;  %p3673_p4 = pneg %p3636_p8 }
  0x52   : > { %s4332_s6 = scalar_select %p3673_p4, 1, 0 }
  0x55   : > { %s3665_s18 = scalar_lea.hbm %s4331_s1, %s2317_s16  ;;  %s3189_s30 = scalar_lea.hbm %s4331_s1, 2048 }
  0x56   : > { %s3184_s9 = scalar_lea.hbm %s3665_s18, 256  ;;  %p3190_p11 = scmp.lt.u32.totalorder %s3665_s18, %s4331_s1 }
  0x57   : > { %p3185_p1 = scmp.ne.s32.totalorder %s3665_s18, %s3184_s9  ;;  %p3191_p13 = scmp.lt.u32.totalorder %s3189_s30, %s3184_s9 }
  0x58   : > { %p3193_p5 = scmp.lt.u32.totalorder %s3184_s9, %s3665_s18 }
  0x59   : > { %p3187_p6 = pnand %p3673_p4, %p3185_p1  ;;  %p3192_p3 = por %p3191_p13, %p3190_p11 }
  0x5b   : > { %p3188_p10 = pneg %p3187_p6  ;;  %p3194_p7 = por %p3193_p5, %p3192_p3 }
  0x5d   : > { %p3195_p9 = pnand %p3194_p7, %p3188_p10 }
  0x5f   : > { %3198 = shalt.err (!%p3195_p9)
}
  0x60   : > { %s3199_s26 = scalar_lea.vmem %s3658_s29, 256  ;;  %s3445_s4 = smov [#allocation7]  }
  0x61   : > { %p3200_p12 = scmp.ne.s32.totalorder %s3658_s29, %s3199_s26  ;;  %s3204_s28 = sshll.u32 %s3445_s4, 4  ;;  %s3205_s28 = int_to_ptr.vmem [resolvable:$false] %s3204_s28 }
  0x62   : > { %s3206_s22 = scalar_lea.vmem %s3205_s28, 512  ;;  %p3207_p0 = scmp.lt.s32.totalorder %s3658_s29, %s3205_s28 }
  0x63   : > { %p3202_p1 = pnand %p3200_p12, %p3673_p4  ;;  %p3208_p2 = scmp.lt.s32.totalorder %s3206_s22, %s3199_s26 }
  0x65   : > { %p3203_p6 = pneg %p3202_p1  ;;  %p3209_p11 = por %p3208_p2, %p3207_p0 }
  0x67   : > { %p3210_p13 = pnand %p3209_p11, %p3203_p6 }
  0x69   : > { %3213 = shalt.err (!%p3210_p13)
}
  0x6a   : > { %s3446_s9 = smov 128   ;;  %s3447_s30 = smov 8  }
  0x6b   : > { %2972 = dma.hbm_to_vmem [thread:$0]  (!%p3636_p8), %s3665_s18, 256, %s3658_s29, %s3667_s3, %s3446_s9, %s3446_s9, %s3447_s30  }
  0x6c   : > { %s3705_s4 = scalar_lea.hbm %s4262_s2, %s2317_s16  ;;  %s397_s28 = scalar_lea.vmem [#allocation9], %s2314_s13 }
  0x6d   : > { %s406_s22 = sshll.u32 %s397_s28, 4  ;;  %s3448_s1 = smov [#allocation12]   ;;  %s3709_s22 = int_to_ptr.vmem [resolvable:$true] %s406_s22 }
  0x6e   : > { %s313_s12 = sshll.u32 %s3448_s1, 4  ;;  %s3449_s11 = smov [#allocation13]   ;;  %s314_s12 = int_to_ptr.vmem [resolvable:$true] %s313_s12 }
  0x6f   : > { %s329_s17 = sshll.u32 %s3449_s11, 4  ;;  %s3214_s29 = scalar_lea.hbm %s4265_s5, 9216  ;;  %s330_s17 = int_to_ptr.vmem [resolvable:$true] %s329_s17 }
  0x70   : > { %p3215_p0 = scmp.ne.s32.totalorder %s4265_s5, %s3214_s29  ;;  %p4333_p2 = scmp.ne.s32.totalorder %s4324_s25, 0 }
  0x71   : > { %p3221_p5 = scmp.lt.u32.totalorder %s3214_s29, %s4265_s5 }
  0x72   : > { %p3217_p10 = pnand %p3215_p0, %p4333_p2 }
  0x74   : > { %p3218_p3 = pneg %p3217_p10 }
  0x76   : > { %p3223_p7 = pnand %p3221_p5, %p3218_p3 }
  0x78   : > { %3226 = shalt.err (!%p3223_p7)
}
  0x79   : > { %s3227_s1 = scalar_lea.vmem %s314_s12, 9216  ;;  %p3235_p6 = scmp.lt.s32.totalorder %s314_s12, %s314_s12 }
  0x7a   : > { %p3228_p9 = scmp.ne.s32.totalorder %s314_s12, %s3227_s1  ;;  %p3236_p11 = scmp.lt.s32.totalorder %s3227_s1, %s3227_s1 }
  0x7c   : > { %p3230_p12 = pnand %p3228_p9, %p4333_p2  ;;  %p3237_p13 = por %p3236_p11, %p3235_p6 }
  0x7e   : > { %p3231_p1 = pneg %p3230_p12 }
  0x80   : > { %p3238_p8 = pnand %p3237_p13, %p3231_p1 }
  0x82   : > { %3241 = shalt.err (!%p3238_p8)
}
  0x83   : > { %p4334_p0 = scmp.ne.s32.totalorder %s4322_s27, 0  ;;  %s4335_s10 = smov 4  }
  0x84   : > { %s4336_s11 = smov 64   ;;  %s3242_s29 = scalar_lea.hbm %s4267_s7, 1024 }
  0x85   : > { %2962 = dma.hbm_to_vmem [thread:$0]  (!%p4334_p0), %s4265_s5, 9216, %s314_s12, [#allocation11], %s4336_s11, %s4336_s11, %s4335_s10  }
  0x86   : > { %p3243_p10 = scmp.ne.s32.totalorder %s4267_s7, %s3242_s29  ;;  %p3249_p5 = scmp.lt.u32.totalorder %s3242_s29, %s4267_s7 }
  0x88   : > { %p3245_p8 = pnand %p3243_p10, %p4333_p2 }
  0x8a   : > { %p3246_p3 = pneg %p3245_p8 }
  0x8c   : > { %p3251_p7 = pnand %p3249_p5, %p3246_p3 }
  0x8e   : > { %3254 = shalt.err (!%p3251_p7)
}
  0x8f   : > { %s3255_s1 = scalar_lea.vmem %s330_s17, 1024  ;;  %p3263_p6 = scmp.lt.s32.totalorder %s330_s17, %s330_s17 }
  0x90   : > { %p3256_p9 = scmp.ne.s32.totalorder %s330_s17, %s3255_s1  ;;  %p3264_p11 = scmp.lt.s32.totalorder %s3255_s1, %s3255_s1 }
  0x92   : > { %p3258_p12 = pnand %p3256_p9, %p4333_p2  ;;  %p3265_p13 = por %p3264_p11, %p3263_p6 }
  0x94   : > { %p3259_p1 = pneg %p3258_p12 }
  0x96   : > { %p3266_p4 = pnand %p3265_p13, %p3259_p1 }
  0x98   : > { %3269 = shalt.err (!%p3266_p4)
}
  0x99   : > { %2965 = dma.hbm_to_vmem [thread:$0]  (!%p4334_p0), %s4267_s7, 1024, %s330_s17, [#allocation14], %s4336_s11, %s4336_s11, %s4335_s10  }
  0x9a   : > { %s2309_s25 = sshll.u32 %s3627_s23, 6  ;;  %s2432_s20 = sshll.u32 %s3432_s14, 3 }
  0x9b   : > { %s2312_s26 = sshll.u32 %s3436_s15, 5  ;;  %s350_s29 = scalar_lea.vmem [#allocation4], %s2309_s25 }
  0x9c   : > { %s357_s28 = sadd.s32 %s2432_s20, %s2312_s26  ;;  %s360_s8 = sshll.u32 %s350_s29, 4  ;;  %s3756_s8 = int_to_ptr.vmem [resolvable:$true] %s360_s8 }
  0x9d   : > { %s2313_s18 = sshll.u32 %s357_s28, 7  ;;  %s347_s1 = scalar_lea.sflag [#allocation5], %s3627_s23 }
  0x9e   : > { %s3761_s13 = scalar_lea.hbm %s4260_s0, %s2313_s18  ;;  %p4337_p2 = scmp.ne.s32.totalorder %s4332_s6, 0 }
  0x9f   : > { %s3270_s17 = scalar_lea.hbm %s3761_s13, 1024  ;;  %s3275_s12 = scalar_lea.hbm %s4260_s0, 8192 }
  0xa0   : > { %p3271_p4 = scmp.ne.s32.totalorder %s3761_s13, %s3270_s17  ;;  %p3276_p8 = scmp.lt.u32.totalorder %s3761_s13, %s4260_s0 }
  0xa1   : > { %p3277_p3 = scmp.lt.u32.totalorder %s3275_s12, %s3270_s17  ;;  %p3279_p7 = scmp.lt.u32.totalorder %s3270_s17, %s3761_s13 }
  0xa2   : > { %p3273_p0 = pnand %p3271_p4, %p4337_p2 }
  0xa3   : > { %p3278_p5 = por %p3277_p3, %p3276_p8 }
  0xa4   : > { %p3274_p10 = pneg %p3273_p0 }
  0xa5   : > { %p3280_p9 = por %p3279_p7, %p3278_p5 }
  0xa7   : > { %p3281_p12 = pnand %p3280_p9, %p3274_p10 }
  0xa9   : > { %3284 = shalt.err (!%p3281_p12)
}
  0xaa   : > { %s3285_s20 = scalar_lea.vmem %s3756_s8, 1024  ;;  %s3450_s26 = smov [#allocation4]  }
  0xab   : > { %p3286_p1 = scmp.ne.s32.totalorder %s3756_s8, %s3285_s20  ;;  %s3290_s28 = sshll.u32 %s3450_s26, 4  ;;  %s3291_s28 = int_to_ptr.vmem [resolvable:$false] %s3290_s28 }
  0xac   : > { %s3292_s29 = scalar_lea.vmem %s3291_s28, 2048  ;;  %p3293_p13 = scmp.lt.s32.totalorder %s3756_s8, %s3291_s28 }
  0xad   : > { %p3288_p6 = pnand %p3286_p1, %p4337_p2  ;;  %p3294_p4 = scmp.lt.s32.totalorder %s3292_s29, %s3285_s20 }
  0xaf   : > { %p3289_p11 = pneg %p3288_p6  ;;  %p3295_p0 = por %p3294_p4, %p3293_p13 }
  0xb1   : > { %p3296_p8 = pnand %p3295_p0, %p3289_p11 }
  0xb3   : > { %3299 = shalt.err (!%p3296_p8)
}
  0xb4   : > { %p4338_p10 = scmp.ne.s32.totalorder %s4327_s19, 0  ;;  %s3300_s18 = scalar_lea.hbm %s3705_s4, 256 }
  0xb5   : > { %p3301_p3 = scmp.ne.s32.totalorder %s3705_s4, %s3300_s18  ;;  %s3305_s17 = scalar_lea.hbm %s4262_s2, 2048 }
  0xb6   : > { %2969 = dma.hbm_to_vmem [thread:$0]  (!%p4338_p10), %s3761_s13, 1024, %s3756_s8, %s347_s1, %s3446_s9, %s3446_s9, %s3447_s30  }
  0xb7   : > { %p3303_p5 = pnand %p3301_p3, %p4337_p2  ;;  %p3306_p9 = scmp.lt.u32.totalorder %s3705_s4, %s4262_s2 }
  0xb8   : > { %p3307_p12 = scmp.lt.u32.totalorder %s3305_s17, %s3300_s18  ;;  %p3309_p6 = scmp.lt.u32.totalorder %s3300_s18, %s3705_s4 }
  0xb9   : > { %p3304_p7 = pneg %p3303_p5 }
  0xba   : > { %p3308_p1 = por %p3307_p12, %p3306_p9 }
  0xbc   : > { %p3310_p11 = por %p3309_p6, %p3308_p1 }
  0xbe   : > { %p3311_p13 = pnand %p3310_p11, %p3304_p7 }
  0xc0   : > { %3314 = shalt.err (!%p3311_p13)
}
  0xc1   : > { %s3315_s23 = scalar_lea.vmem %s3709_s22, 256  ;;  %s3451_s8 = smov [#allocation9]  }
  0xc2   : > { %p3316_p4 = scmp.ne.s32.totalorder %s3709_s22, %s3315_s23  ;;  %s3320_s13 = sshll.u32 %s3451_s8, 4  ;;  %s3321_s13 = int_to_ptr.vmem [resolvable:$false] %s3320_s13 }
  0xc3   : > { %s3322_s1 = scalar_lea.vmem %s3321_s13, 512  ;;  %p3323_p3 = scmp.lt.s32.totalorder %s3709_s22, %s3321_s13 }
  0xc4   : > { %p3318_p0 = pnand %p3316_p4, %p4337_p2  ;;  %p3324_p5 = scmp.lt.s32.totalorder %s3322_s1, %s3315_s23 }
  0xc6   : > { %p3319_p8 = pneg %p3318_p0  ;;  %p3325_p9 = por %p3324_p5, %p3323_p3 }
  0xc8   : > { %p3326_p12 = pnand %p3325_p9, %p3319_p8 }
  0xca   : > { %3329 = shalt.err (!%p3326_p12)
}
  0xcb   : > { %2975 = dma.hbm_to_vmem [thread:$0]  (!%p4338_p10), %s3705_s4, 256, %s3709_s22, %s3667_s3, %s3446_s9, %s3446_s9, %s3447_s30  }
  0xcc   : > { %p4339_p2 = scmp.ne.s32.totalorder %s4321_s24, 0 }
  0xcd   : > { %s4340_s6 = sld [smem:[#allocation22_spill]] (!%p4339_p2)  ;;  %s4341_s12 = sld [smem:[#allocation28_spill]] (!%p4339_p2) }
  0xce   : > { %418 = sbr.rel (%p4339_p2) target bundleno = 1602 (0x642), region = 56 }
  0xd3   : > { %s3818_s21 = sand.u32 (!%p4339_p2), 1, %s4340_s6   ;;  %p4342_p7 = scmp.ne.s32.totalorder (!%p4339_p2), %s4341_s12, 0 }
  0xd4   : > { %s2323_s25 = sshll.u32 (!%p4339_p2), %s3818_s21, 6  ;;  %s421_s20 = scalar_lea.sflag (!%p4339_p2), [#allocation5], %s3818_s21 }
  0xd5   : > { %s3824_s19 = scalar_lea.vmem [#allocation4], %s2323_s25 }
  0xd6   : > { %3391 = dma.done.wait (%p4342_p7), %s421_s20, 1024  }
  0xd7   : > { %3393 = vsyncadd (%p4342_p7), %s421_s20, 4294966272  ;;  %s4343_s3 = sld [smem:[#allocation27_spill]]  ;;  %s2324_s9 = sshll.u32 %s3818_s21, 4 }
  0xd8   : > { %s3832_s4 = scalar_lea.vmem [#allocation7], %s2324_s9 }
  0xdd   : > { %s429_s24 = sand.u32 1, %s4343_s3  }
  0xde   : > { %s430_s30 = scalar_lea.sflag [#allocation8], %s429_s24 }
  0xdf   : > { %3395 = dma.done.wait (%p4342_p7), %s430_s30, 512  }
  0xe0   : > { %3397 = vsyncadd (%p4342_p7), %s430_s30, 4294966784  ;;  %s3838_s22 = scalar_lea.vmem [#allocation9], %s2324_s9  ;;  %p4344_p10 = scmp.eq.s32.totalorder %s4343_s3, 0 }
  0xe2   : > { %3399 = dma.done.wait (%p4344_p10), [#allocation11], 10240   ;;  %p4345_p1 = pmov %p4344_p10 }
  0xe4   : > { %3401 = vsyncadd (%p4345_p1), [#allocation11], 4294957056  ;;  %p4346_p6 = pmov %p4345_p1 }
  0xe5   : > { %p4347_p11 = pmov %p4345_p1 }
  0xe6   : > { %3403 = dma.done.wait (%p4346_p6), [#allocation14], 1024  }
  0xe7   : > { %3405 = vsyncadd (%p4347_p11), [#allocation14], 4294966272  ;;  %v3848_v0 = vld [vmem:[#allocation10] sm:$0xff]   ;;  %v3850_v1 = vld [vmem:[#allocation10 + $0x8] sm:$0xff]   ;;  %s4348_s29 = sld [smem:[#allocation36_spill]]  ;;  %s3919_s18 = scalar_lea.vmem [#allocation15], %s2323_s25 }
  0xe8   : > { %2704 = vmatprep.subr.bf16.mxu0 %v3848_v0  ;;  %2864 = vmatprep.subr.bf16.mxu1 %v3848_v0  ;;  %v3858_v2 = vld [vmem:[#allocation10 + $0x10] sm:$0xff]   ;;  %v3862_v3 = vld [vmem:[#allocation10 + $0x18] sm:$0xff]   ;;  %v519_v4 = vld [vmem:[%s3824_s19] sm:$0xff]  ;;  %s4349_s27 = sld [smem:[#allocation24_spill]] }
  0xe9   : > { %2705 = vmatpush3.bf16.msra.mxu0 %v3848_v0  ;;  %2872 = vmatpush3.bf16.msra.mxu1 %v3848_v0  ;;  %v520_v5 = vld [vmem:[%s3824_s19 + $0x8] sm:$0xff]  ;;  %v523_v6 = vld [vmem:[%s3824_s19 + $0x20] sm:$0xff]  ;;  %v3886_v12 = vld [vmem:[#allocation10 + $0x30] sm:$0xff]  }
  0xea   : > { %2706 = vmatprep.subr.bf16.mxu0 %v3850_v1  ;;  %2865 = vmatprep.subr.bf16.mxu1 %v3850_v1  ;;  %v527_v7 = vpack.c.bf16 %v520_v5, %v519_v4  ;;  %v524_v8 = vld [vmem:[%s3824_s19 + $0x28] sm:$0xff]  ;;  %v3874_v10 = vld [vmem:[#allocation10 + $0x20] sm:$0xff]   ;;  %v3892_v13 = vld [vmem:[#allocation10 + $0x38] sm:$0xff]  }
  0xeb   : > { %v529_v9 = vpack.c.bf16 %v524_v8, %v523_v6  ;;  %v3880_v11 = vld [vmem:[#allocation10 + $0x28] sm:$0xff]   ;;  %v521_v14 = vld [vmem:[%s3824_s19 + $0x10] sm:$0xff]  ;;  %v522_v15 = vld [vmem:[%s3824_s19 + $0x18] sm:$0xff] }
  0xec   : > { %2720 = vmatprep.mubr.bf16.mxu0 %v527_v7  ;;  %v525_v16 = vld [vmem:[%s3824_s19 + $0x30] sm:$0xff]  ;;  %v526_v17 = vld [vmem:[%s3824_s19 + $0x38] sm:$0xff]  ;;  %v528_v18 = vpack.c.bf16 %v522_v15, %v521_v14 }
  0xed   : > { %2707 = vmatpush3.bf16.msra.mxu0 %v3850_v1  ;;  %2873 = vmatpush3.bf16.msra.mxu1 %v3850_v1  ;;  %v530_v19 = vpack.c.bf16 %v526_v17, %v525_v16  ;;  %v3907_v20 = vld [vmem:[%s4348_s29] ss:$0 sm:$0xff] }
  0xee   : > { %2708 = vmatprep.subr.bf16.mxu0 %v3858_v2  ;;  %2866 = vmatprep.subr.bf16.mxu1 %v3858_v2  ;;  %p2339_p13 = scmp.ne.s32.totalorder %s4349_s27, 0 }
  0xef   : > { %2724 = vmatprep.mubr.bf16.mxu1 %v529_v9  ;;  %v3452_v45 = vmov (!%p2339_p13), 0.0  }
  0xf0   : > { %670 = vst [vmem:[#allocation2] sm:$0xff] (!%p2339_p13), %v3452_v45  ;;  %671 = vst [vmem:[#allocation2 + $0x8] sm:$0xff] (!%p2339_p13), %v3452_v45 }
  0xf1   : > { %2709 = vmatpush3.bf16.msra.mxu0 %v3858_v2  ;;  %2874 = vmatpush3.bf16.msra.mxu1 %v3858_v2 }
  0xf2   : > { %2710 = vmatprep.subr.bf16.mxu0 %v3862_v3  ;;  %2867 = vmatprep.subr.bf16.mxu1 %v3862_v3 }
  0xf5   : > { %2711 = vmatpush3.bf16.msra.mxu0 %v3862_v3  ;;  %2875 = vmatpush3.bf16.msra.mxu1 %v3862_v3 }
  0xf6   : > { %2712 = vmatprep.subr.bf16.mxu0 %v3874_v10  ;;  %2868 = vmatprep.subr.bf16.mxu1 %v3874_v10 }
  0xf9   : > { %2713 = vmatpush3.bf16.msra.mxu0 %v3874_v10  ;;  %2876 = vmatpush3.bf16.msra.mxu1 %v3874_v10 }
  0xfa   : > { %2714 = vmatprep.subr.bf16.mxu0 %v3880_v11  ;;  %2869 = vmatprep.subr.bf16.mxu1 %v3880_v11 }
  0xfd   : > { %2715 = vmatpush3.bf16.msra.mxu0 %v3880_v11  ;;  %2877 = vmatpush3.bf16.msra.mxu1 %v3880_v11 }
  0xfe   : > { %2716 = vmatprep.subr.bf16.mxu0 %v3886_v12  ;;  %2870 = vmatprep.subr.bf16.mxu1 %v3886_v12 }
 0x101   : > { %2717 = vmatpush3.bf16.msra.mxu0 %v3886_v12  ;;  %2878 = vmatpush3.bf16.msra.mxu1 %v3886_v12 }
 0x102   : > { %2718 = vmatprep.subr.bf16.mxu0 %v3892_v13  ;;  %2871 = vmatprep.subr.bf16.mxu1 %v3892_v13 }
 0x105   : > { %2719 = vmatpush3.bf16.msra.mxu0 %v3892_v13  ;;  %2879 = vmatpush3.bf16.msra.mxu1 %v3892_v13 }
 0x108   : > { %2721 = vmatmul.mubr.bf16.vlgmr.msra.gmra.mrb[0].mxu0 %v528_v18  ;;  %2725 = vmatmul.mubr.bf16.vlgmr.msra.gmra.mrb[0].mxu1 %v530_v19 }
 0x1db   : > { %v2722_v21 = vpop.f32.mrb[0].mxu0  ;;  %v2726_v22 = vpop.f32.mrb[0].mxu1 }
 0x1dc   : > { %v628_v23 = vadd.f32 %v2722_v21, %v3907_v20  ;;  %v644_v24 = vadd.f32 %v2726_v22, %v3907_v20  ;;  %v619_v25 = vpop.f32.mrb[1].mxu0  ;;  %v635_v26 = vpop.f32.mrb[1].mxu1 }
 0x1dd   : > { %v620_v27 = vadd.f32 %v3907_v20, %v619_v25  ;;  %v636_v28 = vadd.f32 %v3907_v20, %v635_v26  ;;  %v2723_v29 = vpop.f32.mrb[2].mxu0  ;;  %v2727_v30 = vpop.f32.mrb[2].mxu1  ;;  %669 = sbr.rel (%p2339_p13) target bundleno = 484 (0x1e4), region = 84 }
 0x1de   : > { %v652_v31 = vmax.f32 %v628_v23, 0.0  ;;  %v656_v32 = vmax.f32 %v644_v24, 0.0  ;;  %v631_v33 = vadd.f32 %v2723_v29, %v3907_v20  ;;  %v647_v34 = vadd.f32 %v2727_v30, %v3907_v20  ;;  %v622_v35 = vpop.f32.mrb[3].mxu0  ;;  %v638_v36 = vpop.f32.mrb[3].mxu1 }
 0x1df   : > { %v650_v37 = vmax.f32 %v620_v27, 0.0  ;;  %v654_v38 = vmax.f32 %v636_v28, 0.0  ;;  %v623_v39 = vadd.f32 %v3907_v20, %v622_v35  ;;  %v639_v40 = vadd.f32 %v3907_v20, %v638_v36 }
 0x1e0   : > { %660 = vst [vmem:[#allocation2 + $0x20] sm:$0xff] %v652_v31  ;;  %664 = vst [vmem:[#allocation2 + $0x40] sm:$0xff] %v656_v32  ;;  %v653_v41 = vmax.f32 %v631_v33, 0.0  ;;  %v657_v42 = vmax.f32 %v647_v34, 0.0 }
 0x1e1   : > { %658 = vst [vmem:[#allocation2 + $0x10] sm:$0xff] %v650_v37  ;;  %662 = vst [vmem:[#allocation2 + $0x30] sm:$0xff] %v654_v38  ;;  %v651_v43 = vmax.f32 %v623_v39, 0.0  ;;  %v655_v44 = vmax.f32 %v639_v40, 0.0 }
 0x1e2   : > { %661 = vst [vmem:[#allocation2 + $0x28] sm:$0xff] %v653_v41  ;;  %665 = vst [vmem:[#allocation2 + $0x48] sm:$0xff] %v657_v42 }
 0x1e3   : > { %659 = vst [vmem:[#allocation2 + $0x18] sm:$0xff] %v651_v43  ;;  %663 = vst [vmem:[#allocation2 + $0x38] sm:$0xff] %v655_v44 }
 0x1e4 PF: > { %s4350_s16 = sld [smem:[#allocation24_spill]] }
 0x1ea   : > { %p2340_p4 = scmp.le.s32.totalorder %s4350_s16, 0 }
 0x1eb   : > { %v3453_v46 = vmov (!%p2340_p4), 0.0   ;;  %vm3454_vm0 = vmmov (!%p2340_p4), 0   ;;  %v676_v47 = vld [vmem:[%s3832_s4] sm:$0xff] (!%p2340_p4)  ;;  %v677_v48 = vld [vmem:[%s3832_s4 + $0x8] sm:$0xff] (!%p2340_p4) }
 0x1ec   : > { %675 = sbr.rel (%p2340_p4) target bundleno = 743 (0x2e7), region = 88  ;;  %2728 = vmatprep.subr.bf16.mxu0 (!%p2340_p4), %v3453_v46  ;;  %2744 = vmatprep.mubr.msk.bf16.mxu0 (!%p2340_p4), %vm3454_vm0, %v3453_v46  ;;  %v678_v49 = vpack.c.bf16 (!%p2340_p4), %v677_v48, %v676_v47 }
 0x1ed   : > { %2729 = vmatpush3.bf16.msra.mxu0 (!%p2340_p4), %v3848_v0 }
 0x1ee   : > { %2730 = vmatprep.subr.bf16.mxu0 (!%p2340_p4), %v3453_v46 }
 0x1f1   : > { %2731 = vmatpush3.bf16.msra.mxu0 (!%p2340_p4), %v3850_v1 }
 0x1f2   : > { %2732 = vmatprep.subr.bf16.mxu0 (!%p2340_p4), %v3453_v46 }
 0x1f5   : > { %2733 = vmatpush3.bf16.msra.mxu0 %v3858_v2 }
 0x1f6   : > { %2734 = vmatprep.subr.bf16.mxu0 %v3453_v46 }
 0x1f9   : > { %2735 = vmatpush3.bf16.msra.mxu0 %v3862_v3 }
 0x1fa   : > { %2736 = vmatprep.subr.bf16.mxu0 %v3453_v46 }
 0x1fd   : > { %2737 = vmatpush3.bf16.msra.mxu0 %v3874_v10 }
 0x1fe   : > { %2738 = vmatprep.subr.bf16.mxu0 %v3453_v46 }
 0x201   : > { %2739 = vmatpush3.bf16.msra.mxu0 %v3880_v11 }
 0x202   : > { %2740 = vmatprep.subr.bf16.mxu0 %v3453_v46 }
 0x205   : > { %2741 = vmatpush3.bf16.msra.mxu0 %v3886_v12 }
 0x206   : > { %2742 = vmatprep.subr.bf16.mxu0 %v3453_v46 }
 0x209   : > { %2743 = vmatpush3.bf16.msra.mxu0 %v3892_v13 }
 0x20c   : > { %2745 = vmatmul.mubr.bf16.vlgmr.msra.gmra.mrb[0].mxu0 %v678_v49 }
 0x2df   : > { %v713_v50 = vpop.f32.mrb[0].mxu0 }
 0x2e0   : > { %v714_v51 = vadd.f32 %v3907_v20, %v713_v50  ;;  %v2746_v52 = vpop.f32.mrb[1].mxu0 }
 0x2e1   : > { %v716_v53 = vpop.f32.mrb[2].mxu0 }
 0x2e2   : > { %v720_v54 = vmax.f32 %v714_v51, 0.0  ;;  %v717_v55 = vadd.f32 %v3907_v20, %v716_v53  ;;  %v2747_v56 = vpop.f32.mrb[3].mxu0 }
 0x2e4   : > { %722 = vst [vmem:[#allocation2] sm:$0xff] %v720_v54  ;;  %v721_v57 = vmax.f32 %v717_v55, 0.0 }
 0x2e6   : > { %723 = vst [vmem:[#allocation2 + $0x8] sm:$0xff] %v721_v57 }
 0x2e7 PF: > { %s4351_s17 = sld [smem:[#allocation24_spill]] }
 0x2ed   : > { %p2341_p0 = scmp.ne.s32.totalorder %s4351_s17, 3 }
 0x2ee   : > { %v3455_v58 = vmov (!%p2341_p0), 0.0  }
 0x2ef   : > { %727 = sbr.rel (%p2341_p0) target bundleno = 758 (0x2f6), region = 92  ;;  %728 = vst [vmem:[#allocation2 + $0x50] sm:$0xff] (!%p2341_p0), %v3455_v58  ;;  %729 = vst [vmem:[#allocation2 + $0x58] sm:$0xff] (!%p2341_p0), %v3455_v58 }
 0x2f6 PF: > { %s4352_s10 = sld [smem:[#allocation24_spill]] }
 0x2fc   : > { %p2342_p8 = scmp.ge.s32.totalorder %s4352_s10, 3 }
 0x2fd   : > { %v3456_v59 = vmov (!%p2342_p8), 0.0   ;;  %vm3457_vm1 = vmmov (!%p2342_p8), 0   ;;  %v734_v60 = vld [vmem:[%s3838_s22] sm:$0xff] (!%p2342_p8)  ;;  %v735_v61 = vld [vmem:[%s3838_s22 + $0x8] sm:$0xff] (!%p2342_p8) }
 0x2fe   : > { %733 = sbr.rel (%p2342_p8) target bundleno = 1017 (0x3f9), region = 96  ;;  %2748 = vmatprep.subr.bf16.mxu0 (!%p2342_p8), %v3456_v59  ;;  %2764 = vmatprep.mubr.msk.bf16.mxu0 (!%p2342_p8), %vm3457_vm1, %v3456_v59  ;;  %v736_v62 = vpack.c.bf16 (!%p2342_p8), %v735_v61, %v734_v60 }
 0x2ff   : > { %2749 = vmatpush3.bf16.msra.mxu0 (!%p2342_p8), %v3848_v0 }
 0x300   : > { %2750 = vmatprep.subr.bf16.mxu0 (!%p2342_p8), %v3456_v59 }
 0x303   : > { %2751 = vmatpush3.bf16.msra.mxu0 (!%p2342_p8), %v3850_v1 }
 0x304   : > { %2752 = vmatprep.subr.bf16.mxu0 (!%p2342_p8), %v3456_v59 }
 0x307   : > { %2753 = vmatpush3.bf16.msra.mxu0 %v3858_v2 }
 0x308   : > { %2754 = vmatprep.subr.bf16.mxu0 %v3456_v59 }
 0x30b   : > { %2755 = vmatpush3.bf16.msra.mxu0 %v3862_v3 }
 0x30c   : > { %2756 = vmatprep.subr.bf16.mxu0 %v3456_v59 }
 0x30f   : > { %2757 = vmatpush3.bf16.msra.mxu0 %v3874_v10 }
 0x310   : > { %2758 = vmatprep.subr.bf16.mxu0 %v3456_v59 }
 0x313   : > { %2759 = vmatpush3.bf16.msra.mxu0 %v3880_v11 }
 0x314   : > { %2760 = vmatprep.subr.bf16.mxu0 %v3456_v59 }
 0x317   : > { %2761 = vmatpush3.bf16.msra.mxu0 %v3886_v12 }
 0x318   : > { %2762 = vmatprep.subr.bf16.mxu0 %v3456_v59 }
 0x31b   : > { %2763 = vmatpush3.bf16.msra.mxu0 %v3892_v13 }
 0x31e   : > { %2765 = vmatmul.mubr.bf16.vlgmr.msra.gmra.mrb[0].mxu0 %v736_v62 }
 0x3f1   : > { %v771_v63 = vpop.f32.mrb[0].mxu0 }
 0x3f2   : > { %v772_v0 = vadd.f32 %v3907_v20, %v771_v63  ;;  %v2766_v1 = vpop.f32.mrb[1].mxu0 }
 0x3f3   : > { %v774_v2 = vpop.f32.mrb[2].mxu0 }
 0x3f4   : > { %v778_v3 = vmax.f32 %v772_v0, 0.0  ;;  %v775_v4 = vadd.f32 %v3907_v20, %v774_v2  ;;  %v2767_v5 = vpop.f32.mrb[3].mxu0 }
 0x3f6   : > { %780 = vst [vmem:[#allocation2 + $0x50] sm:$0xff] %v778_v3  ;;  %v779_v6 = vmax.f32 %v775_v4, 0.0 }
 0x3f8   : > { %781 = vst [vmem:[#allocation2 + $0x58] sm:$0xff] %v779_v6 }
 0x3f9 PF: > { %v3076_v7 = vld [vmem:[#allocation12 + $0x100] sm:$0xff]   ;;  %v3079_v10 = vld [vmem:[#allocation12 + $0x108] sm:$0xff]   ;;  %v3082_v13 = vld [vmem:[#allocation12 + $0x110] sm:$0xff]   ;;  %v794_v19 = vlaneseq  ;;  %vm3458_vm5 = vmmov 1   ;;  %s4357_s8 = sld [smem:[#allocation37_spill]]  ;;  %s4358_s6 = sld [smem:[#allocation38_spill]] }
 0x3fa   : > { %v3077_v8 = vld [vmem:[#allocation12 + $0x140] sm:$0xff]   ;;  %2536 = vmatprep.subr.bf16.mxu0 %v3076_v7  ;;  %v3080_v11 = vld [vmem:[#allocation12 + $0x148] sm:$0xff]   ;;  %v3083_v14 = vld [vmem:[#allocation12 + $0x150] sm:$0xff]   ;;  %s4359_s12 = sld [smem:[#allocation24_spill]]  ;;  %s4360_s25 = sld [smem:[#allocation25_spill]] }
 0x3fb   : > { %v3078_v9 = vld [vmem:[#allocation12 + $0xc0] sm:$0xff]   ;;  %2768 = vmatprep.subr.bf16.mxu1 %v3077_v8  ;;  %v3081_v12 = vld [vmem:[#allocation12 + $0xc8] sm:$0xff]   ;;  %v3084_v15 = vld [vmem:[#allocation12 + $0xd0] sm:$0xff]   ;;  %v3949_v23 = vshrl.u32 %v794_v19, 7  ;;  %s2134_s30 = sshll.u32 %s3919_s18, 4  ;;  %s4361_s4 = sld [smem:[#allocation29_spill]]  ;;  %s4203_s30 = int_to_ptr.vmem [resolvable:$true] %s2134_s30 }
 0x3fc   : > { %2537 = vmatpush3.bf16.msra.mxu0 %v3078_v9  ;;  %2769 = vmatpush3.bf16.msra.mxu1 %v3077_v8  ;;  %v3085_v16 = vld [vmem:[#allocation12 + $0x118] sm:$0xff]   ;;  %v3088_v20 = vld [vmem:[#allocation12 + $0x120] sm:$0xff]   ;;  %v3091_v24 = vld [vmem:[#allocation12 + $0x128] sm:$0xff]   ;;  %s4362_s28 = sld [smem:[#allocation39_spill]]  ;;  %s3330_s27 = scalar_lea.vmem %s4203_s30, 1024 }
 0x3fd   : > { %2538 = vmatprep.subr.bf16.mxu0 %v3079_v10  ;;  %2770 = vmatprep.subr.bf16.mxu1 %v3080_v11  ;;  %v3086_v17 = vld [vmem:[#allocation12 + $0x158] sm:$0xff]   ;;  %v3089_v21 = vld [vmem:[#allocation12 + $0x160] sm:$0xff]   ;;  %v3092_v25 = vld [vmem:[#allocation12 + $0x168] sm:$0xff]   ;;  %v796_v27 = vadd.s32 8, %v3949_v23  ;;  %vm817_vm3 = vcmp.lt.s32.totalorder %v3949_v23, 1  ;;  %vm866_vm4 = vcmp.lt.s32.totalorder %v3949_v23, 7  ;;  %p3331_p3 = scmp.ne.s32.totalorder %s4203_s30, %s3330_s27 }
 0x3fe   : > { %v3087_v18 = vld [vmem:[#allocation12 + $0xd8] sm:$0xff]   ;;  %v3090_v22 = vld [vmem:[#allocation12 + $0xe0] sm:$0xff]   ;;  %v3093_v26 = vld [vmem:[#allocation12 + $0xe8] sm:$0xff]   ;;  %vm803_vm7 = vcmp.gt.s32.totalorder %v3949_v23, 0  ;;  %s3459_s16 = smov [#allocation15]  }
 0x3ff   : > { %v3094_v28 = vld [vmem:[#allocation12 + $0x130] sm:$0xff]   ;;  %v3097_v31 = vld [vmem:[#allocation12 + $0x138] sm:$0xff]   ;;  %vm853_vm2 = vcmp.lt.s32.totalorder %v796_v27, 15  ;;  %v3954_v35 = vld [vmem:[#allocation2 + $0x8] sm:$0xff]  ;;  %s3334_s17 = sshll.u32 %s3459_s16, 4  ;;  %s3335_s17 = int_to_ptr.vmem [resolvable:$false] %s3334_s17 }
 0x400   : > { %2539 = vmatpush3.bf16.msra.mxu0 %v3081_v12  ;;  %2771 = vmatpush3.bf16.msra.mxu1 %v3080_v11  ;;  %v3095_v29 = vld [vmem:[#allocation12 + $0x170] sm:$0xff]   ;;  %v3098_v32 = vld [vmem:[#allocation12 + $0x178] sm:$0xff]   ;;  %v786_v40 = vld [vmem:[#allocation2 + $0x20] sm:$0xff]  ;;  %v806_v43 = vrot.slane %v3954_v35, 7  ;;  %s2433_s20 = sshll.u32 %s4359_s12, 3  ;;  %s2428_s3 = sshll.u32 %s4360_s25, 5 }
 0x401   : > { %2540 = vmatprep.subr.bf16.mxu0 %v3082_v13  ;;  %2772 = vmatprep.subr.bf16.mxu1 %v3083_v14  ;;  %v3096_v30 = vld [vmem:[#allocation12 + $0xf0] sm:$0xff]   ;;  %v785_v34 = vld [vmem:[#allocation2 + $0x18] sm:$0xff]  ;;  %v858_v44 = vrot.slane %v786_v40, 1  ;;  %vm3966_vm6 = vmpackc.low %vm853_vm2, %vm3458_vm5  ;;  %v809_v59 = vrot.slane %v786_v40, 7  ;;  %s2131_s24 = sadd.s32 %s2433_s20, %s2428_s3  ;;  %p4363_p5 = scmp.ne.s32.totalorder %s4361_s4, 0 }
 0x402   : > { %v3952_v33 = vld [vmem:[#allocation2 + $0x10] sm:$0xff]  ;;  %v808_v38 = vrot.slane %v785_v34, 7  ;;  %v3099_v41 = vld [vmem:[#allocation12 + $0xf8] sm:$0xff]   ;;  %v857_v42 = vrot.slane %v785_v34, 1  ;;  %v3100_v47 = vld [vmem:[#allocation12 + $0x40] sm:$0xff]   ;;  %s2429_s9 = sshll.u32 %s2131_s24, 7  ;;  %p3337_p2 = scmp.lt.s32.totalorder %s4203_s30, %s3335_s17 }
 0x403   : > { %v3959_v36 = vpack.c.bf16 %v785_v34, %v3952_v33  ;;  %v807_v37 = vrot.slane %v3952_v33, 7  ;;  %v856_v39 = vrot.slane %v3952_v33, 1  ;;  %v3101_v51 = vld [vmem:[#allocation12 + $0x80] sm:$0xff]   ;;  %v787_v52 = vld [vmem:[#allocation2 + $0x28] sm:$0xff]  ;;  %v3984_v53 = vld [vmem:[#allocation2 + $0x30] sm:$0xff]  ;;  %s4201_s29 = scalar_lea.hbm %s4362_s28, %s2429_s9  ;;  %p3332_p9 = pnand %p3331_p3, %p4363_p5 }
 0x404   : > { %2541 = vmatpush3.bf16.msra.mxu0 %v3084_v15  ;;  %2773 = vmatpush3.bf16.msra.mxu1 %v3083_v14  ;;  %v874_v49 = vsel %vm866_vm4, %v857_v42, %v858_v44  ;;  %v859_v55 = vrot.slane %v787_v52, 1  ;;  %v860_v56 = vrot.slane %v3984_v53, 1  ;;  %vm3992_vm8 = vmpackc.low %vm3458_vm5, %vm803_vm7  ;;  %v3102_v62 = vld [vmem:[#allocation12] sm:$0xff]   ;;  %v3103_v0 = vld [vmem:[#allocation12 + $0x48] sm:$0xff]   ;;  %v810_v1 = vrot.slane %v787_v52, 7  ;;  %s3336_s10 = scalar_lea.vmem %s3335_s17, 2048 }
 0x405   : > { %2542 = vmatprep.subr.bf16.mxu0 %v3085_v16  ;;  %2774 = vmatprep.subr.bf16.mxu1 %v3086_v17  ;;  %v826_v46 = vsel %vm817_vm3, %v807_v37, %v808_v38  ;;  %v827_v48 = vsel %vm817_vm3, %v806_v43, %v807_v37  ;;  %v875_v50 = vsel %vm866_vm4, %v856_v39, %v857_v42  ;;  %v3104_v2 = vld [vmem:[#allocation12 + $0x88] sm:$0xff]   ;;  %v3106_v7 = vld [vmem:[#allocation12 + $0x50] sm:$0xff]   ;;  %v789_v11 = vld [vmem:[#allocation2 + $0x38] sm:$0xff]  ;;  %v811_v15 = vrot.slane %v3984_v53, 7  ;;  %p3333_p12 = pneg %p3332_p9  ;;  %p3338_p7 = scmp.lt.s32.totalorder %s3336_s10, %s3330_s27 }
 0x406   : > { %1207 = vmatprep.mubr.bf16.mxu0 %v3959_v36  ;;  %v3986_v54 = vpack.c.bf16 %v874_v49, %v875_v50  ;;  %v3996_v58 = vpack.c.bf16 %v826_v46, %v827_v48  ;;  %v872_v60 = vsel %vm866_vm4, %v859_v55, %v860_v56  ;;  %v873_v61 = vsel %vm866_vm4, %v858_v44, %v859_v55  ;;  %v3105_v4 = vld [vmem:[#allocation12 + $0x8] sm:$0xff]   ;;  %v3107_v8 = vld [vmem:[#allocation12 + $0x90] sm:$0xff]   ;;  %v3109_v12 = vld [vmem:[#allocation12 + $0x58] sm:$0xff]  }
 0x407   : > { %v4005_v63 = vpack.c.bf16 %v872_v60, %v873_v61  ;;  %v4007_v3 = vpack.c.bf16 %v787_v52, %v786_v40  ;;  %v824_v5 = vsel %vm817_vm3, %v809_v59, %v810_v1  ;;  %v825_v6 = vsel %vm817_vm3, %v808_v38, %v809_v59  ;;  %v3108_v10 = vld [vmem:[#allocation12 + $0x10] sm:$0xff]   ;;  %v3110_v13 = vld [vmem:[#allocation12 + $0x98] sm:$0xff]   ;;  %v4071_v60 = vld [vmem:[#allocation2] sm:$0xff]  ;;  %p3339_p10 = por %p3338_p7, %p3337_p2 }
 0x408   : > { %2543 = vmatpush3.bf16.msra.mxu0 %v3087_v18  ;;  %2775 = vmatpush3.bf16.msra.mxu1 %v3086_v17  ;;  %v4020_v9 = vpack.c.bf16 %v824_v5, %v825_v6  ;;  %v812_v14 = vrot.slane %v789_v11, 7  ;;  %v4024_v16 = vpack.c.bf16 %v789_v11, %v3984_v53  ;;  %v861_v17 = vrot.slane %v789_v11, 1  ;;  %v3111_v18 = vld [vmem:[#allocation12 + $0x18] sm:$0xff]   ;;  %v4040_v38 = vld [vmem:[#allocation2 + $0x50] sm:$0xff]  ;;  %v3148_v23 = vld [vmem:[#allocation13] sm:$0xff]  }
 0x409   : > { %2544 = vmatprep.subr.bf16.mxu0 %v3088_v20  ;;  %2776 = vmatprep.subr.bf16.mxu1 %v3089_v21  ;;  %v823_v20 = vsel %vm817_vm3, %v810_v1, %v811_v15  ;;  %v855_v40 = vrot.slane %v3954_v35, 1  ;;  %v864_v44 = vrot.slane %v4040_v38, 1  ;;  %v815_v49 = vrot.slane %v4040_v38, 7  ;;  %v3119_v55 = vld [vmem:[#allocation12 + $0xb0] sm:$0xff]   ;;  %v4073_v61 = vld [vmem:[#allocation2 + $0x58] sm:$0xff]  ;;  %v3149_v45 = vld [vmem:[#allocation13 + $0x8] sm:$0xff]   ;;  %p3340_p1 = pnand %p3339_p10, %p3333_p12 }
 0x40a   : > { %2784 = vmatprep.mubr.msk.bf16.mxu1 %vm3966_vm6, %v3986_v54  ;;  %v822_v19 = vsel %vm817_vm3, %v811_v15, %v812_v14  ;;  %v805_v5 = vrot.slane %v4071_v60, 7  ;;  %v816_v6 = vrot.slane %v4073_v61, 7  ;;  %v3122_v33 = vld [vmem:[#allocation12 + $0xb8] sm:$0xff]   ;;  %v3124_v15 = vld [vmem:[#allocation12 + $0x1c0] sm:$0xff]  }
 0x40b   : > { %v876_v1 = vsel %vm866_vm4, %v855_v40, %v856_v39  ;;  %v797_v39 = vpack.c.bf16 %v3954_v35, %v4071_v60  ;;  %v3123_v11 = vld [vmem:[#allocation12 + $0x38] sm:$0xff]   ;;  %v3129_v35 = vld [vmem:[#allocation12 + $0x188] sm:$0xff]   ;;  %v3152_v57 = vld [vmem:[#allocation13 + $0x20] sm:$0xff]  }
 0x40c   : > { %2545 = vmatpush3.bf16.msra.mxu0 %v3090_v22  ;;  %2777 = vmatpush3.bf16.msra.mxu1 %v3089_v21  ;;  %v3112_v21 = vld [vmem:[#allocation12 + $0x60] sm:$0xff]  }
 0x40d   : > { %2546 = vmatprep.subr.bf16.mxu0 %v3091_v24  ;;  %2778 = vmatprep.subr.bf16.mxu1 %v3092_v25  ;;  %v3113_v22 = vld [vmem:[#allocation12 + $0xa0] sm:$0xff]  }
 0x40e   : > { %v790_v24 = vld [vmem:[#allocation2 + $0x40] sm:$0xff] }
 0x40f   : > { %v862_v27 = vrot.slane %v790_v24, 1 }
 0x410   : > { %2547 = vmatpush3.bf16.msra.mxu0 %v3093_v26  ;;  %2779 = vmatpush3.bf16.msra.mxu1 %v3092_v25  ;;  %v3114_v25 = vld [vmem:[#allocation12 + $0x20] sm:$0xff]   ;;  %v791_v26 = vld [vmem:[#allocation2 + $0x48] sm:$0xff] }
 0x411   : > { %2548 = vmatprep.subr.bf16.mxu0 %v3094_v28  ;;  %2780 = vmatprep.subr.bf16.mxu1 %v3095_v29  ;;  %v871_v28 = vsel %vm866_vm4, %v860_v56, %v861_v17  ;;  %v814_v34 = vrot.slane %v791_v26, 7  ;;  %v870_v37 = vsel %vm866_vm4, %v861_v17, %v862_v27  ;;  %v4048_v48 = vpack.c.bf16 %v791_v26, %v790_v24  ;;  %v3125_v17 = vld [vmem:[#allocation12 + $0x200] sm:$0xff]  }
 0x412   : > { %v4043_v42 = vpack.c.bf16 %v870_v37, %v871_v28  ;;  %v3138_v28 = vld [vmem:[#allocation12 + $0x1a0] sm:$0xff]   ;;  %v3145_v37 = vld [vmem:[#allocation12 + $0x1f8] sm:$0xff]  }
 0x413   : > { %v4069_v59 = vsel %vm817_vm3, %v814_v34, %v815_v49 }
 0x414   : > { %2549 = vmatpush3.bf16.msra.mxu0 %v3096_v30  ;;  %2781 = vmatpush3.bf16.msra.mxu1 %v3095_v29  ;;  %v4036_v29 = vpack.c.bf16 %v822_v19, %v823_v20  ;;  %v813_v30 = vrot.slane %v790_v24, 7  ;;  %v3126_v19 = vld [vmem:[#allocation12 + $0x180] sm:$0xff]   ;;  %v3127_v20 = vld [vmem:[#allocation12 + $0x1c8] sm:$0xff]   ;;  %v3132_v24 = vld [vmem:[#allocation12 + $0x190] sm:$0xff]  }
 0x415   : > { %2550 = vmatprep.subr.bf16.mxu0 %v3097_v31  ;;  %2782 = vmatprep.subr.bf16.mxu1 %v3098_v32  ;;  %v863_v31 = vrot.slane %v791_v26, 1  ;;  %v3135_v26 = vld [vmem:[#allocation12 + $0x198] sm:$0xff]  }
 0x416   : > { %v821_v50 = vsel %vm817_vm3, %v812_v14, %v813_v30  ;;  %v820_v53 = vsel %vm817_vm3, %v813_v30, %v814_v34  ;;  %v829_v14 = vsel %vm817_vm3, %v816_v6, %v805_v5  ;;  %v3139_v30 = vld [vmem:[#allocation12 + $0x1e8] sm:$0xff]   ;;  %v3143_v34 = vld [vmem:[#allocation12 + $0x230] sm:$0xff]  }
 0x417   : > { %v869_v46 = vsel %vm866_vm4, %v862_v27, %v863_v31  ;;  %v868_v52 = vsel %vm866_vm4, %v863_v31, %v864_v44  ;;  %v3137_v27 = vld [vmem:[#allocation12 + $0x220] sm:$0xff]   ;;  %v3141_v31 = vld [vmem:[#allocation12 + $0x1a8] sm:$0xff]  }
 0x418   : > { %2551 = vmatpush3.bf16.msra.mxu0 %v3099_v41  ;;  %2783 = vmatpush3.bf16.msra.mxu1 %v3098_v32  ;;  %v3115_v32 = vld [vmem:[#allocation12 + $0x68] sm:$0xff]   ;;  %v4065_v56 = vpack.c.bf16 %v868_v52, %v869_v46  ;;  %v865_v46 = vrot.slane %v4073_v61, 1 }
 0x419   : > { %2588 = vmatprep.subr.bf16.mxu0 %v3100_v47  ;;  %2792 = vmatprep.subr.bf16.mxu1 %v3101_v51  ;;  %v3116_v41 = vld [vmem:[#allocation12 + $0xa8] sm:$0xff]  }
 0x41a   : > { %v3117_v47 = vld [vmem:[#allocation12 + $0x28] sm:$0xff]  }
 0x41b   : > { %2436 = vmatmul.mubr.msk.bf16.vlgmr.msra.gmra.mrb[0].mxu0 %vm3992_vm8, %v3996_v58  ;;  %2785 = vmatmul.mubr.msk.bf16.vlgmr.msra.gmra.mrb[0].mxu1 %vm3966_vm6, %v4005_v63 }
 0x41c   : > { %2589 = vmatpush3.bf16.msra.mxu0 %v3102_v62  ;;  %2793 = vmatpush3.bf16.msra.mxu1 %v3101_v51  ;;  %v3118_v51 = vld [vmem:[#allocation12 + $0x70] sm:$0xff]  }
 0x41d   : > { %2590 = vmatprep.subr.bf16.mxu0 %v3103_v0  ;;  %2794 = vmatprep.subr.bf16.mxu1 %v3104_v2  ;;  %v3120_v62 = vld [vmem:[#allocation12 + $0x30] sm:$0xff]   ;;  %v854_v0 = vrot.slane %v4071_v60, 1 }
 0x41e   : > { %1215 = vmatprep.mubr.bf16.mxu0 %v4007_v3  ;;  %2788 = vmatprep.mubr.msk.bf16.mxu1 %vm3966_vm6, %v4043_v42 }
 0x420   : > { %2591 = vmatpush3.bf16.msra.mxu0 %v3105_v4  ;;  %2795 = vmatpush3.bf16.msra.mxu1 %v3104_v2  ;;  %v4084_v2 = vpack.c.bf16 %v820_v53, %v821_v50  ;;  %v3121_v4 = vld [vmem:[#allocation12 + $0x78] sm:$0xff]  }
 0x421   : > { %2592 = vmatprep.subr.bf16.mxu0 %v3106_v7  ;;  %2796 = vmatprep.subr.bf16.mxu1 %v3107_v8  ;;  %v877_v7 = vsel %vm866_vm4, %v854_v0, %v855_v40  ;;  %v3146_v40 = vld [vmem:[#allocation12 + $0x238] sm:$0xff]  }
 0x423   : > { %2439 = vmatmul.mubr.msk.bf16.gmra.mrb[4].mxu0 %vm3992_vm8, %v4020_v9  ;;  %2789 = vmatmul.mubr.msk.bf16.gmra.mrb[4].mxu1 %vm3966_vm6, %v4065_v56 }
 0x424   : > { %2593 = vmatpush3.bf16.msra.mxu0 %v3108_v10  ;;  %2797 = vmatpush3.bf16.msra.mxu1 %v3107_v8  ;;  %v2471_v8 = vpack.c.bf16 %v876_v1, %v877_v7  ;;  %v4096_v10 = vsel %vm817_vm3, %v815_v49, %v816_v6 }
 0x425   : > { %2594 = vmatprep.subr.bf16.mxu0 %v3109_v12  ;;  %2798 = vmatprep.subr.bf16.mxu1 %v3110_v13  ;;  %v2492_v12 = vpack.c.bf16 %v4096_v10, %v4069_v59 }
 0x426   : > { %1223 = vmatprep.mubr.bf16.mxu0 %v4024_v16  ;;  %2808 = vmatprep.mubr.msk.bf16.mxu1 %vm3966_vm6, %v2471_v8 }
 0x428   : > { %2595 = vmatpush3.bf16.msra.mxu0 %v3111_v18  ;;  %2799 = vmatpush3.bf16.msra.mxu1 %v3110_v13  ;;  %v828_v13 = vsel %vm817_vm3, %v805_v5, %v806_v43  ;;  %v3130_v43 = vld [vmem:[#allocation12 + $0x1d0] sm:$0xff]  }
 0x429   : > { %2596 = vmatprep.subr.bf16.mxu0 %v3112_v21  ;;  %2800 = vmatprep.subr.bf16.mxu1 %v3113_v22  ;;  %v2459_v18 = vpack.c.bf16 %v828_v13, %v829_v14  ;;  %v3128_v21 = vld [vmem:[#allocation12 + $0x208] sm:$0xff]  }
 0x42b   : > { %2442 = vmatmul.mubr.msk.bf16.gmra.mrb[8].mxu0 %vm3992_vm8, %v4036_v29 }
 0x42c   : > { %2597 = vmatpush3.bf16.msra.mxu0 %v3114_v25  ;;  %2801 = vmatpush3.bf16.msra.mxu1 %v3113_v22  ;;  %v3131_v22 = vld [vmem:[#allocation12 + $0x210] sm:$0xff]   ;;  %v3133_v25 = vld [vmem:[#allocation12 + $0x1d8] sm:$0xff]  }
 0x42d   : > { %2598 = vmatprep.subr.bf16.mxu0 %v3115_v32  ;;  %2802 = vmatprep.subr.bf16.mxu1 %v3116_v41  ;;  %v3142_v32 = vld [vmem:[#allocation12 + $0x1f0] sm:$0xff]  }
 0x42e   : > { %1231 = vmatprep.mubr.bf16.mxu0 %v4048_v48 }
 0x430   : > { %2599 = vmatpush3.bf16.msra.mxu0 %v3117_v47  ;;  %2803 = vmatpush3.bf16.msra.mxu1 %v3116_v41  ;;  %v3147_v41 = vld [vmem:[#allocation12 + $0x1b8] sm:$0xff]  }
 0x431   : > { %2600 = vmatprep.subr.bf16.mxu0 %v3118_v51  ;;  %2804 = vmatprep.subr.bf16.mxu1 %v3119_v55 }
 0x433   : > { %2445 = vmatmul.mubr.msk.bf16.gmra.mrb[12].mxu0 %vm3992_vm8, %v4084_v2 }
 0x434   : > { %2601 = vmatpush3.bf16.msra.mxu0 %v3120_v62  ;;  %2805 = vmatpush3.bf16.msra.mxu1 %v3119_v55 }
 0x435   : > { %2602 = vmatprep.subr.bf16.mxu0 %v3121_v4  ;;  %2806 = vmatprep.subr.bf16.mxu1 %v3122_v33 }
 0x436   : > { %1481 = vmatprep.mubr.bf16.mxu0 %v797_v39 }
 0x438   : > { %2603 = vmatpush3.bf16.msra.mxu0 %v3123_v11  ;;  %2807 = vmatpush3.bf16.msra.mxu1 %v3122_v33 }
 0x439   : > { %2640 = vmatprep.subr.bf16.mxu0 %v3124_v15  ;;  %2816 = vmatprep.subr.bf16.mxu1 %v3125_v17 }
 0x43b   : > { %2460 = vmatmul.mubr.msk.bf16.vlgmr.msra.gmra.mrb[16].mxu0 %vm3992_vm8, %v2459_v18  ;;  %2809 = vmatmul.mubr.msk.bf16.vlgmr.msra.gmra.mrb[0].mxu1 %vm3966_vm6, %v3986_v54  ;;  %v3134_v54 = vld [vmem:[#allocation12 + $0x218] sm:$0xff]  }
 0x43c   : > { %2641 = vmatpush3.bf16.msra.mxu0 %v3126_v19  ;;  %2817 = vmatpush3.bf16.msra.mxu1 %v3125_v17 }
 0x43d   : > { %2642 = vmatprep.subr.bf16.mxu0 %v3127_v20  ;;  %2818 = vmatprep.subr.bf16.mxu1 %v3128_v21 }
 0x43e   : > { %1489 = vmatprep.mubr.bf16.mxu0 %v3959_v36  ;;  %2812 = vmatprep.mubr.msk.bf16.mxu1 %vm3966_vm6, %v4005_v63  ;;  %v3136_v36 = vld [vmem:[#allocation12 + $0x1e0] sm:$0xff]  }
 0x440   : > { %2643 = vmatpush3.bf16.msra.mxu0 %v3129_v35  ;;  %2819 = vmatpush3.bf16.msra.mxu1 %v3128_v21 }
 0x441   : > { %2644 = vmatprep.subr.bf16.mxu0 %v3130_v43  ;;  %2820 = vmatprep.subr.bf16.mxu1 %v3131_v22 }
 0x443   : > { %2463 = vmatmul.mubr.msk.bf16.gmra.mrb[20].mxu0 %vm3992_vm8, %v3996_v58  ;;  %2813 = vmatmul.mubr.msk.bf16.gmra.mrb[4].mxu1 %vm3966_vm6, %v4043_v42  ;;  %v3140_v58 = vld [vmem:[#allocation12 + $0x228] sm:$0xff]  }
 0x444   : > { %2645 = vmatpush3.bf16.msra.mxu0 %v3132_v24  ;;  %2821 = vmatpush3.bf16.msra.mxu1 %v3131_v22 }
 0x445   : > { %2646 = vmatprep.subr.bf16.mxu0 %v3133_v25  ;;  %2822 = vmatprep.subr.bf16.mxu1 %v3134_v54 }
 0x446   : > { %1497 = vmatprep.mubr.bf16.mxu0 %v4007_v3  ;;  %2832 = vmatprep.mubr.msk.bf16.mxu1 %vm3966_vm6, %v4005_v63  ;;  %v3144_v63 = vld [vmem:[#allocation12 + $0x1b0] sm:$0xff]  }
 0x448   : > { %2647 = vmatpush3.bf16.msra.mxu0 %v3135_v26  ;;  %2823 = vmatpush3.bf16.msra.mxu1 %v3134_v54 }
 0x449   : > { %2648 = vmatprep.subr.bf16.mxu0 %v3136_v36  ;;  %2824 = vmatprep.subr.bf16.mxu1 %v3137_v27 }
 0x44b   : > { %2466 = vmatmul.mubr.msk.bf16.gmra.mrb[24].mxu0 %vm3992_vm8, %v4020_v9 }
 0x44c   : > { %2649 = vmatpush3.bf16.msra.mxu0 %v3138_v28  ;;  %2825 = vmatpush3.bf16.msra.mxu1 %v3137_v27 }
 0x44d   : > { %2650 = vmatprep.subr.bf16.mxu0 %v3139_v30  ;;  %2826 = vmatprep.subr.bf16.mxu1 %v3140_v58 }
 0x44e   : > { %1505 = vmatprep.mubr.bf16.mxu0 %v4024_v16 }
 0x450   : > { %2651 = vmatpush3.bf16.msra.mxu0 %v3141_v31  ;;  %2827 = vmatpush3.bf16.msra.mxu1 %v3140_v58 }
 0x451   : > { %2652 = vmatprep.subr.bf16.mxu0 %v3142_v32  ;;  %2828 = vmatprep.subr.bf16.mxu1 %v3143_v34 }
 0x453   : > { %2469 = vmatmul.mubr.msk.bf16.gmra.mrb[28].mxu0 %vm3992_vm8, %v4036_v29 }
 0x454   : > { %2653 = vmatpush3.bf16.msra.mxu0 %v3144_v63  ;;  %2829 = vmatpush3.bf16.msra.mxu1 %v3143_v34 }
 0x455   : > { %2654 = vmatprep.subr.bf16.mxu0 %v3145_v37  ;;  %2830 = vmatprep.subr.bf16.mxu1 %v3146_v40 }
 0x456   : > { %1816 = vmatprep.mubr.bf16.mxu0 %v4007_v3  ;;  %v867_v3 = vsel %vm866_vm4, %v864_v44, %v865_v46  ;;  %v3154_v44 = vld [vmem:[#allocation13 + $0x30] sm:$0xff]  }
 0x458   : > { %2655 = vmatpush3.bf16.msra.mxu0 %v3147_v41  ;;  %2831 = vmatpush3.bf16.msra.mxu1 %v3146_v40 }
 0x459   : > { %2840 = vmatprep.subr.bf16.mxu0 %v3148_v23  ;;  %2880 = vmatprep.subr.bf16.mxu1 %v3148_v23 }
 0x45b   : > { %2484 = vmatmul.mubr.msk.bf16.vlgmr.msra.gmra.mrb[32].mxu0 %vm3992_vm8, %v4020_v9  ;;  %2833 = vmatmul.mubr.msk.bf16.vlgmr.msra.gmra.mrb[0].mxu1 %vm3966_vm6, %v4043_v42  ;;  %v878_v9 = vsel %vm866_vm4, %v865_v46, %v854_v0  ;;  %v3153_v42 = vld [vmem:[#allocation13 + $0x28] sm:$0xff]  }
 0x45c   : > { %1824 = vmatprep.mubr.bf16.mxu0 %v4024_v16  ;;  %2836 = vmatprep.mubr.msk.bf16.mxu1 %vm3966_vm6, %v4065_v56  ;;  %v2504_v47 = vpack.c.bf16 %v878_v9, %v867_v3  ;;  %v802_v16 = vpack.c.bf16 %v4073_v61, %v4040_v38  ;;  %v3151_v38 = vld [vmem:[#allocation13 + $0x18] sm:$0xff]  }
 0x45d   : > { %2841 = vmatpush3.bf16.msra.mxu0 %v3148_v23  ;;  %2888 = vmatpush3.bf16.msra.mxu1 %v3148_v23 }
 0x45e   : > { %2842 = vmatprep.subr.bf16.mxu0 %v3149_v45  ;;  %2881 = vmatprep.subr.bf16.mxu1 %v3149_v45 }
 0x461   : > { %2843 = vmatpush3.bf16.msra.mxu0 %v3149_v45  ;;  %2889 = vmatpush3.bf16.msra.mxu1 %v3149_v45 }
 0x463   : > { %2487 = vmatmul.mubr.msk.bf16.gmra.mrb[36].mxu0 %vm3992_vm8, %v4036_v29  ;;  %2837 = vmatmul.mubr.msk.bf16.gmra.mrb[4].mxu1 %vm3966_vm6, %v2504_v47  ;;  %v3150_v29 = vld [vmem:[#allocation13 + $0x10] sm:$0xff]  }
 0x464   : > { %1832 = vmatprep.mubr.bf16.mxu0 %v4048_v48  ;;  %2844 = vmatprep.subr.bf16.mxu0 %v3150_v29  ;;  %v3155_v48 = vld [vmem:[#allocation13 + $0x38] sm:$0xff]  }
 0x465   : > { %2882 = vmatprep.subr.bf16.mxu1 %v3150_v29  ;;  %2845 = vmatpush3.bf16.msra.mxu0 %v3150_v29 }
 0x466   : > { %2890 = vmatpush3.bf16.msra.mxu1 %v3150_v29  ;;  %2846 = vmatprep.subr.bf16.mxu0 %v3151_v38 }
 0x467   : > { %2883 = vmatprep.subr.bf16.mxu1 %v3151_v38 }
 0x469   : > { %2847 = vmatpush3.bf16.msra.mxu0 %v3151_v38 }
 0x46a   : > { %2891 = vmatpush3.bf16.msra.mxu1 %v3151_v38  ;;  %2848 = vmatprep.subr.bf16.mxu0 %v3152_v57 }
 0x46b   : > { %2490 = vmatmul.mubr.msk.bf16.gmra.mrb[40].mxu0 %vm3992_vm8, %v4084_v2  ;;  %2884 = vmatprep.subr.bf16.mxu1 %v3152_v57 }
 0x46c   : > { %1840 = vmatprep.mubr.bf16.mxu0 %v802_v16 }
 0x46d   : > { %2849 = vmatpush3.bf16.msra.mxu0 %v3152_v57 }
 0x46e   : > { %2892 = vmatpush3.bf16.msra.mxu1 %v3152_v57  ;;  %2850 = vmatprep.subr.bf16.mxu0 %v3153_v42 }
 0x46f   : > { %2885 = vmatprep.subr.bf16.mxu1 %v3153_v42 }
 0x471   : > { %2851 = vmatpush3.bf16.msra.mxu0 %v3153_v42 }
 0x472   : > { %2893 = vmatpush3.bf16.msra.mxu1 %v3153_v42  ;;  %2852 = vmatprep.subr.bf16.mxu0 %v3154_v44 }
 0x473   : > { %2493 = vmatmul.mubr.msk.bf16.gmra.mrb[44].mxu0 %vm3992_vm8, %v2492_v12  ;;  %2886 = vmatprep.subr.bf16.mxu1 %v3154_v44 }
 0x475   : > { %2853 = vmatpush3.bf16.msra.mxu0 %v3154_v44 }
 0x476   : > { %2894 = vmatpush3.bf16.msra.mxu1 %v3154_v44  ;;  %2854 = vmatprep.subr.bf16.mxu0 %v3155_v48 }
 0x477   : > { %2887 = vmatprep.subr.bf16.mxu1 %v3155_v48 }
 0x479   : > { %2855 = vmatpush3.bf16.msra.mxu0 %v3155_v48 }
 0x47a   : > { %2895 = vmatpush3.bf16.msra.mxu1 %v3155_v48 }
 0x4ee   : > { %v2552_v49 = vpop.f32.mrb[0].mxu0 }
 0x4ef   : > { %v2553_v50 = vpop.f32.mrb[1].mxu0 }
 0x4f0   : > { %v2554_v51 = vadd.f32 %v2553_v50, %v2552_v49  ;;  %v2555_v52 = vpop.f32.mrb[2].mxu0 }
 0x4f1   : > { %v2556_v53 = vpop.f32.mrb[3].mxu0 }
 0x4f2   : > { %v2557_v55 = vadd.f32 %v2556_v53, %v2555_v52  ;;  %v2415_v52 = vld [vmem:[%s4357_s8] ss:$0 sm:$0xff] }
 0x4f6   : > { %v2558_v56 = vpop.f32.mrb[4].mxu0 }
 0x4f7   : > { %v2559_v59 = vpop.f32.mrb[5].mxu0 }
 0x4f8   : > { %v2560_v60 = vadd.f32 %v2559_v59, %v2558_v56  ;;  %v2561_v61 = vpop.f32.mrb[6].mxu0 }
 0x4f9   : > { %v2562_v62 = vpop.f32.mrb[7].mxu0 }
 0x4fa   : > { %v2563_v0 = vadd.f32 %v2562_v62, %v2561_v61 }
 0x4fe   : > { %v2564_v1 = vpop.f32.mrb[8].mxu0 }
 0x4ff   : > { %v2565_v2 = vpop.f32.mrb[9].mxu0 }
 0x500   : > { %v2566_v4 = vadd.f32 %v2565_v2, %v2564_v1  ;;  %v2567_v5 = vpop.f32.mrb[10].mxu0 }
 0x501   : > { %v2568_v6 = vpop.f32.mrb[11].mxu0 }
 0x502   : > { %v2569_v7 = vadd.f32 %v2568_v6, %v2567_v5 }
 0x506   : > { %v2570_v33 = vpop.f32.mrb[12].mxu0 }
 0x507   : > { %v2571_v8 = vpop.f32.mrb[13].mxu0 }
 0x508   : > { %v2572_v39 = vadd.f32 %v2571_v8, %v2570_v33  ;;  %v2573_v10 = vpop.f32.mrb[14].mxu0 }
 0x509   : > { %v2574_v11 = vpop.f32.mrb[15].mxu0 }
 0x50a   : > { %v2575_v12 = vadd.f32 %v2574_v11, %v2573_v10 }
 0x50e   : > { %v2604_v13 = vpop.f32.mrb[16].mxu0 }
 0x50f   : > { %v2605_v14 = vpop.f32.mrb[17].mxu0 }
 0x510   : > { %v2606_v15 = vadd.f32 %v2605_v14, %v2604_v13  ;;  %v2607_v17 = vpop.f32.mrb[18].mxu0 }
 0x511   : > { %v2608_v18 = vpop.f32.mrb[19].mxu0 }
 0x512   : > { %v2899_v19 = vadd.f32 %v2606_v15, %v2554_v51  ;;  %v2609_v20 = vadd.f32 %v2608_v18, %v2607_v17 }
 0x514   : > { %v2905_v21 = vadd.f32 %v2609_v20, %v2557_v55 }
 0x516   : > { %v2610_v35 = vpop.f32.mrb[20].mxu0 }
 0x517   : > { %v2611_v43 = vpop.f32.mrb[21].mxu0 }
 0x518   : > { %v2612_v22 = vadd.f32 %v2611_v43, %v2610_v35  ;;  %v2613_v24 = vpop.f32.mrb[22].mxu0 }
 0x519   : > { %v2614_v25 = vpop.f32.mrb[23].mxu0 }
 0x51a   : > { %v2896_v54 = vadd.f32 %v2612_v22, %v2560_v60  ;;  %v2615_v26 = vadd.f32 %v2614_v25, %v2613_v24 }
 0x51c   : > { %v2902_v36 = vadd.f32 %v2615_v26, %v2563_v0 }
 0x51e   : > { %v2616_v27 = vpop.f32.mrb[24].mxu0 }
 0x51f   : > { %v2617_v28 = vpop.f32.mrb[25].mxu0 }
 0x520   : > { %v2618_v30 = vadd.f32 %v2617_v28, %v2616_v27  ;;  %v2619_v58 = vpop.f32.mrb[26].mxu0 }
 0x521   : > { %v2620_v31 = vpop.f32.mrb[27].mxu0 }
 0x522   : > { %v2911_v32 = vadd.f32 %v2618_v30, %v2566_v4  ;;  %v2621_v34 = vadd.f32 %v2620_v31, %v2619_v58 }
 0x524   : > { %v2917_v63 = vadd.f32 %v2621_v34, %v2569_v7 }
 0x526   : > { %v2622_v37 = vpop.f32.mrb[28].mxu0 }
 0x527   : > { %v2623_v40 = vpop.f32.mrb[29].mxu0 }
 0x528   : > { %v2624_v41 = vadd.f32 %v2623_v40, %v2622_v37  ;;  %v2625_v46 = vpop.f32.mrb[30].mxu0 }
 0x529   : > { %v2626_v3 = vpop.f32.mrb[31].mxu0 }
 0x52a   : > { %v2908_v9 = vadd.f32 %v2624_v41, %v2572_v39  ;;  %v2627_v47 = vadd.f32 %v2626_v3, %v2625_v46 }
 0x52c   : > { %v4173_v16 = vadd.f32 %v2627_v47, %v2575_v12 }
 0x52e   : > { %v2656_v23 = vpop.f32.mrb[32].mxu0  ;;  %v2834_v45 = vpop.f32.mrb[0].mxu1 }
 0x52f   : > { %v2657_v29 = vpop.f32.mrb[33].mxu0  ;;  %v1883_v38 = vpop.f32.mrb[1].mxu1 }
 0x530   : > { %v2658_v57 = vadd.f32 %v2657_v29, %v2656_v23  ;;  %v2659_v42 = vpop.f32.mrb[34].mxu0  ;;  %v2835_v44 = vpop.f32.mrb[2].mxu1 }
 0x531   : > { %v2660_v48 = vpop.f32.mrb[35].mxu0  ;;  %v1886_v49 = vpop.f32.mrb[3].mxu1 }
 0x532   : > { %v2900_v50 = vadd.f32 %v2899_v19, %v2658_v57  ;;  %v2661_v51 = vadd.f32 %v2660_v48, %v2659_v42 }
 0x534   : > { %v2901_v53 = vadd.f32 %v2900_v50, %v1883_v38  ;;  %v2906_v55 = vadd.f32 %v2905_v21, %v2661_v51  ;;  %v2085_v51 = vld [vmem:[%s3824_s19] sm:$0xff] }
 0x536   : > { %v1929_v56 = vadd.f32 %v2901_v53, %v2415_v52  ;;  %v2907_v59 = vadd.f32 %v2906_v55, %v1886_v49  ;;  %v2662_v60 = vpop.f32.mrb[36].mxu0  ;;  %v2838_v61 = vpop.f32.mrb[4].mxu1  ;;  %v2087_v49 = vld [vmem:[%s3824_s19 + $0x10] sm:$0xff] }
 0x537   : > { %v2663_v62 = vpop.f32.mrb[37].mxu0  ;;  %v1899_v0 = vpop.f32.mrb[5].mxu1 }
 0x538   : > { %v1930_v1 = vadd.f32 %v2907_v59, %v2415_v52  ;;  %v2664_v2 = vadd.f32 %v2663_v62, %v2662_v60  ;;  %v2665_v4 = vpop.f32.mrb[38].mxu0  ;;  %v2839_v5 = vpop.f32.mrb[6].mxu1  ;;  %v1937_v33 = vmax.f32 %v1929_v56, 0.0 }
 0x539   : > { %v2666_v6 = vpop.f32.mrb[39].mxu0  ;;  %v1902_v7 = vpop.f32.mrb[7].mxu1 }
 0x53a   : > { %v1938_v8 = vmax.f32 %v1930_v1, 0.0  ;;  %v2897_v39 = vadd.f32 %v2896_v54, %v2664_v2  ;;  %v2667_v10 = vadd.f32 %v2666_v6, %v2665_v4 }
 0x53c   : > { %v2898_v11 = vadd.f32 %v2897_v39, %v2834_v45  ;;  %v2903_v12 = vadd.f32 %v2902_v36, %v2667_v10  ;;  %v1945_v13 = vpack.c.bf16 %v1938_v8, %v1937_v33  ;;  %v2091_v8 = vld [vmem:[%s3824_s19 + $0x30] sm:$0xff] }
 0x53e   : > { %v1931_v14 = vadd.f32 %v2898_v11, %v2415_v52  ;;  %v2904_v15 = vadd.f32 %v2903_v12, %v2835_v44  ;;  %v2668_v17 = vpop.f32.mrb[40].mxu0  ;;  %2856 = vmatprep.mubr.bf16.mxu0 %v1945_v13  ;;  %v2089_v11 = vld [vmem:[%s3824_s19 + $0x20] sm:$0xff] }
 0x53f   : > { %v2669_v18 = vpop.f32.mrb[41].mxu0 }
 0x540   : > { %v1932_v19 = vadd.f32 %v2904_v15, %v2415_v52  ;;  %v2670_v20 = vadd.f32 %v2669_v18, %v2668_v17  ;;  %v2671_v21 = vpop.f32.mrb[42].mxu0  ;;  %v1939_v43 = vmax.f32 %v1931_v14, 0.0  ;;  %v2092_v14 = vld [vmem:[%s3824_s19 + $0x38] sm:$0xff] }
 0x541   : > { %v2672_v35 = vpop.f32.mrb[43].mxu0 }
 0x542   : > { %v1940_v22 = vmax.f32 %v1932_v19, 0.0  ;;  %v2912_v24 = vadd.f32 %v2911_v32, %v2670_v20  ;;  %v2673_v25 = vadd.f32 %v2672_v35, %v2671_v21  ;;  %v2090_v19 = vld [vmem:[%s3824_s19 + $0x28] sm:$0xff] }
 0x544   : > { %v1946_v26 = vpack.c.bf16 %v1940_v22, %v1939_v43  ;;  %v2913_v27 = vadd.f32 %v2912_v24, %v1899_v0  ;;  %v2918_v54 = vadd.f32 %v2917_v63, %v2673_v25 }
 0x546   : > { %v2919_v28 = vadd.f32 %v2918_v54, %v1902_v7  ;;  %v2674_v30 = vpop.f32.mrb[44].mxu0  ;;  %2857 = vmatmul.mubr.bf16.vlgmr.msra.gmra.mrb[48].mxu0 %v1946_v26  ;;  %v1933_v36 = vadd.f32 %v2913_v27, %v2415_v52 }
 0x547   : > { %v2675_v58 = vpop.f32.mrb[45].mxu0 }
 0x548   : > { %v2676_v31 = vadd.f32 %v2675_v58, %v2674_v30  ;;  %v2677_v34 = vpop.f32.mrb[46].mxu0  ;;  %v1934_v37 = vadd.f32 %v2919_v28, %v2415_v52  ;;  %v1941_v3 = vmax.f32 %v1933_v36, 0.0 }
 0x549   : > { %v2678_v40 = vpop.f32.mrb[47].mxu0 }
 0x54a   : > { %v2909_v41 = vadd.f32 %v2908_v9, %v2676_v31  ;;  %v2679_v46 = vadd.f32 %v2678_v40, %v2677_v34  ;;  %v1942_v47 = vmax.f32 %v1934_v37, 0.0  ;;  %v2416_v9 = vld [vmem:[%s4358_s6] ss:$0 sm:$0xff] }
 0x54c   : > { %v2910_v23 = vadd.f32 %v2909_v41, %v2838_v61  ;;  %v2915_v32 = vadd.f32 %v4173_v16, %v2679_v46  ;;  %v1947_v45 = vpack.c.bf16 %v1942_v47, %v1941_v3  ;;  %v2086_v61 = vld [vmem:[%s3824_s19 + $0x8] sm:$0xff] }
 0x54e   : > { %v1935_v63 = vadd.f32 %v2910_v23, %v2415_v52  ;;  %v2916_v29 = vadd.f32 %v2915_v32, %v2839_v5  ;;  %2860 = vmatprep.mubr.bf16.mxu1 %v1947_v45 }
 0x550   : > { %v1936_v38 = vadd.f32 %v2916_v29, %v2415_v52  ;;  %v1943_v57 = vmax.f32 %v1935_v63, 0.0  ;;  %v2088_v52 = vld [vmem:[%s3824_s19 + $0x18] sm:$0xff]  ;;  %s2118_s19 = scalar_lea.sflag [#allocation6], %s3818_s21 }
 0x552   : > { %v1944_v42 = vmax.f32 %v1936_v38, 0.0 }
 0x554   : > { %v1948_v44 = vpack.c.bf16 %v1944_v42, %v1943_v57 }
 0x556   : > { %2861 = vmatmul.mubr.bf16.vlgmr.msra.gmra.mrb[8].mxu1 %v1948_v44 }
 0x619   : > { %v2858_v48 = vpop.f32.mrb[48].mxu0 }
 0x61a   : > { %v2063_v50 = vadd.f32 %v2858_v48, %v2416_v9  ;;  %v2054_v16 = vpop.f32.mrb[49].mxu0 }
 0x61b   : > { %v2055_v53 = vadd.f32 %v2416_v9, %v2054_v16  ;;  %v2859_v55 = vpop.f32.mrb[50].mxu0 }
 0x61c   : > { %v2095_v56 = vadd.f32 %v2087_v49, %v2063_v50  ;;  %v2066_v59 = vadd.f32 %v2859_v55, %v2416_v9  ;;  %v2057_v60 = vpop.f32.mrb[51].mxu0 }
 0x61d   : > { %v2093_v62 = vadd.f32 %v2085_v51, %v2055_v53  ;;  %v2058_v0 = vadd.f32 %v2416_v9, %v2057_v60 }
 0x61e   : > { %v2103_v1 = vmax.f32 %v2095_v56, 0.0  ;;  %v2096_v2 = vadd.f32 %v2088_v52, %v2066_v59 }
 0x61f   : > { %v2101_v4 = vmax.f32 %v2093_v62, 0.0  ;;  %v2094_v5 = vadd.f32 %v2086_v61, %v2058_v0 }
 0x620   : > { %2111 = vst [vmem:[%s3919_s18 + $0x10] sm:$0xff] %v2103_v1  ;;  %v2104_v6 = vmax.f32 %v2096_v2, 0.0 }
 0x621   : > { %2109 = vst [vmem:[%s3919_s18] sm:$0xff] %v2101_v4  ;;  %v2102_v7 = vmax.f32 %v2094_v5, 0.0 }
 0x622   : > { %2112 = vst [vmem:[%s3919_s18 + $0x18] sm:$0xff] %v2104_v6 }
 0x623   : > { %2110 = vst [vmem:[%s3919_s18 + $0x8] sm:$0xff] %v2102_v7 }
 0x629   : > { %v2862_v33 = vpop.f32.mrb[8].mxu1 }
 0x62a   : > { %v2079_v39 = vadd.f32 %v2862_v33, %v2416_v9  ;;  %v2070_v10 = vpop.f32.mrb[9].mxu1 }
 0x62b   : > { %v2071_v12 = vadd.f32 %v2416_v9, %v2070_v10  ;;  %v2863_v13 = vpop.f32.mrb[10].mxu1 }
 0x62c   : > { %v2099_v15 = vadd.f32 %v2091_v8, %v2079_v39  ;;  %v2082_v17 = vadd.f32 %v2863_v13, %v2416_v9  ;;  %v2073_v18 = vpop.f32.mrb[11].mxu1 }
 0x62d   : > { %v2097_v20 = vadd.f32 %v2089_v11, %v2071_v12  ;;  %v2074_v21 = vadd.f32 %v2416_v9, %v2073_v18 }
 0x62e   : > { %v2107_v35 = vmax.f32 %v2099_v15, 0.0  ;;  %v2100_v43 = vadd.f32 %v2092_v14, %v2082_v17 }
 0x62f   : > { %v2105_v22 = vmax.f32 %v2097_v20, 0.0  ;;  %v2098_v24 = vadd.f32 %v2090_v19, %v2074_v21 }
 0x630   : > { %2115 = vst [vmem:[%s3919_s18 + $0x30] sm:$0xff] %v2107_v35  ;;  %v2108_v25 = vmax.f32 %v2100_v43, 0.0 }
 0x631   : > { %2113 = vst [vmem:[%s3919_s18 + $0x20] sm:$0xff] %v2105_v22  ;;  %v2106_v26 = vmax.f32 %v2098_v24, 0.0 }
 0x632   : > { %2116 = vst [vmem:[%s3919_s18 + $0x38] sm:$0xff] %v2108_v25 }
 0x633   : > { %2114 = vst [vmem:[%s3919_s18 + $0x28] sm:$0xff] %v2106_v26 }
 0x634   : > { %3343 = shalt.err (!%p3340_p1)
}
 0x635   : > { %s3344_s18 = scalar_lea.hbm %s4201_s29, 1024  ;;  %s3348_s8 = scalar_lea.hbm %s4362_s28, 8192 }
 0x636   : > { %p3345_p6 = scmp.ne.s32.totalorder %s4201_s29, %s3344_s18  ;;  %p3349_p4 = scmp.lt.u32.totalorder %s4201_s29, %s4362_s28 }
 0x637   : > { %p3350_p0 = scmp.lt.u32.totalorder %s3348_s8, %s3344_s18  ;;  %p3352_p3 = scmp.lt.u32.totalorder %s3344_s18, %s4201_s29 }
 0x638   : > { %p3346_p11 = pnand %p3345_p6, %p4363_p5 }
 0x639   : > { %p3351_p8 = por %p3350_p0, %p3349_p4 }
 0x63a   : > { %p3347_p13 = pneg %p3346_p11 }
 0x63b   : > { %p3353_p9 = por %p3352_p3, %p3351_p8 }
 0x63d   : > { %p3354_p12 = pnand %p3353_p9, %p3347_p13 }
 0x63f   : > { %3357 = shalt.err (!%p3354_p12)
}
 0x640   : > { %s3460_s6 = smov 128   ;;  %s3461_s12 = smov 8  }
 0x641   : > { %2954 = dma.vmem_to_hbm [thread:$0]  (%p4363_p5), %s4203_s30, 1024, %s4201_s29, %s2118_s19, %s3460_s6, %s3460_s6, %s3461_s12  }
 0x642 PF: > { %s4364_s25 = sld [smem:[#allocation26_spill]]  ;;  %s4365_s20 = sld [smem:[#allocation21_spill]] }
 0x643   : > { %s4366_s3 = sld [smem:[#allocation30_spill]] }
 0x648   : > { %p2987_p2 = scmp.ge.s32.totalorder %s4364_s25, 2  ;;  %s2149_s24 = sand.u32 1, %s4365_s20  }
 0x649   : > { %p4367_p7 = scmp.ne.s32.totalorder %s4366_s3, 0  ;;  %s2150_s9 = scalar_lea.sflag [#allocation6], %s2149_s24 }
 0x64b   : > { %p2977_p10 = pnand %p2987_p2, %p4367_p7 }
 0x64d   : > { %3407 = dma.done.wait (!%p2977_p10), %s2150_s9, 1024  }
 0x64e   : > { %3409 = vsyncadd (!%p2977_p10), %s2150_s9, 4294966272  ;;  %s30_s16 = sadd.s32 1, %s4364_s25   ;;  %s4368_s30 = sld [smem:[#allocation22_spill]] }
 0x64f   : > { %p27_p1 = scmp.ge.s32.totalorder %s30_s16, 10   ;;  %s4369_s10 = sld [smem:[#allocation23_spill]] }
 0x650   : > { %s4370_s11 = sld [smem:[#allocation33_spill]]  ;;  %s4371_s21 = sld [smem:[#allocation31_spill]] }
 0x651   : > { %s4372_s4 = sld [smem:[#allocation32_spill]]  ;;  %s4373_s12 = smov %s3432_s14 }
 0x652   : > { %s4374_s13 = smov %s3436_s15  ;;  %29 = sbr.rel (!%p27_p1) target bundleno = 18 (0x12), region = 155 }
 0x656   : > { %s4375_s14 = smov %s4371_s21 }
 0x657   : > { %s4376_s15 = smov %s4372_s4 }
 0x659   :  { %2155 = vsyncpa [#allocation5], 1 }
 0x65a   :  { %2157 = vsyncpa [#allocation5 + $0x1], 1 }
 0x65b   :  { %2158 = vsyncpa [#allocation8], 1 }
 0x65c   :  { %2160 = vsyncpa [#allocation8 + $0x1], 1 }
 0x65d   :  { %2161 = vsyncpa [#allocation11], 1 }
 0x65e   :  { %2162 = vsyncpa [#allocation14], 1 }
 0x65f   :  { %2163 = vsyncpa [#allocation6], 1 }
 0x660   :  { %2165 = vsyncpa [#allocation6 + $0x1], 1 }

// kernel: tpu_custom_call.1
= control target key start
LH: loop header
LB: loop body
LE: loop exit
PB: predicated region body
PF: predicated region fallthrough
CT: control target
= control target key end

     0   :  { %s4260_s0 = inlined_call_operand.hbm [shape: f32[2,16,16,128], index: 0, kind: input, shape index: {}]   ;;  %s4261_s1 = inlined_call_operand.hbm [shape: f32[2,4,16,128], index: 1, kind: input, shape index: {}]   ;;  %s4262_s2 = inlined_call_operand.hbm [shape: f32[2,4,16,128], index: 2, kind: input, shape index: {}]   ;;  %s4263_s3 = inlined_call_operand.hbm [shape: bf16[128,128], index: 3, kind: input, shape index: {}]   ;;  %s4264_s4 = inlined_call_operand.vmem [shape: f32[1,128], index: 4, kind: input, shape index: {}]   ;;  %s4265_s5 = inlined_call_operand.hbm [shape: bf16[3,384,128], index: 5, kind: input, shape index: {}]   ;;  %s4266_s6 = inlined_call_operand.vmem [shape: f32[1,128], index: 6, kind: input, shape index: {}]   ;;  %s4267_s7 = inlined_call_operand.hbm [shape: bf16[128,128], index: 7, kind: input, shape index: {}]   ;;  %s4268_s8 = inlined_call_operand.vmem [shape: f32[1,128], index: 8, kind: input, shape index: {}]   ;;  %s4269_s9 = inlined_call_operand.hbm [shape: f32[2,16,16,128], index: 9, kind: output, shape index: {}]  }
   0x1   :  { %4301 = sst [smem:[#allocation34_spill]] %s4261_s1 }
   0x2   :  { %4302 = sst [smem:[#allocation35_spill]] %s4263_s3 }
   0x3   :  { %4303 = sst [smem:[#allocation36_spill]] %s4264_s4 }
   0x4   :  { %4304 = sst [smem:[#allocation37_spill]] %s4266_s6 }
   0x5   :  { %4305 = sst [smem:[#allocation38_spill]] %s4268_s8 }
   0x6   :  { %4306 = sst [smem:[#allocation39_spill]] %s4269_s9 }
   0x7   :  { %14 = vsyncpa [#allocation5], 0 }
   0x8   :  { %16 = vsyncpa [#allocation5 + $0x1], 0 }
   0x9   :  { %17 = vsyncpa [#allocation8], 0 }
   0xa   :  { %19 = vsyncpa [#allocation8 + $0x1], 0 }
   0xb   :  { %20 = vsyncpa [#allocation11], 0 }
   0xc   :  { %21 = vsyncpa [#allocation14], 0 }
   0xd   :  { %22 = vsyncpa [#allocation6], 0 }
   0xe   :  { %24 = vsyncpa [#allocation6 + $0x1], 0  ;;  %s3512_s30 = smov 0   ;;  %s3514_s10 = smov 0  }
   0xf   :  { %s3516_s11 = smov 0   ;;  %s3518_s12 = smov 0  }
  0x10   :  { %s3520_s13 = smov 0   ;;  %s3522_s14 = smov 0  }
  0x11   :  { %s3524_s15 = smov 0   ;;  %s3526_s16 = smov 0  }
  0x12 LB: > { %4307 = sst [smem:[#allocation21_spill]] %s3412_s30  ;;  %s3553_s17 = sadd.s32 4294967295, %s3440_s16   ;;  %s3440_s16 = sphi %s3526_s16, %s30_s16   ;;  %s3436_s15 = sphi %s3524_s15, %s4376_s15   ;;  %s3432_s14 = sphi %s3522_s14, %s4375_s14   ;;  %s3428_s13 = sphi %s3520_s13, %s4374_s13   ;;  %s3424_s12 = sphi %s3518_s12, %s4373_s12   ;;  %s3420_s11 = sphi %s3516_s11, %s4370_s11   ;;  %s3416_s10 = sphi %s3514_s10, %s4369_s10   ;;  %s3412_s30 = sphi %s3512_s30, %s4368_s30  }
  0x13   : > { %4308 = sst [smem:[#allocation22_spill]] %s3416_s10  ;;  %s2303_s18 = sadd.s32 4294967294, %s3440_s16  }
  0x14   : > { %4309 = sst [smem:[#allocation23_spill]] %s3420_s11  ;;  %p58_p0 = scmp.ne.s32.totalorder %s3420_s11, %s3416_s10 }
  0x15   : > { %4310 = sst [smem:[#allocation24_spill]] %s3424_s12  ;;  %p59_p1 = scmp.eq.s32.totalorder %s3440_s16, 0 }
  0x16   : > { %4311 = sst [smem:[#allocation25_spill]] %s3428_s13  ;;  %p64_p2 = scmp.ne.s32.totalorder %s3416_s10, %s3412_s30 }
  0x17   : > { %4312 = sst [smem:[#allocation26_spill]] %s3440_s16  ;;  %p4275_p3 = scmp.eq.s32.totalorder %s3553_s17, 0 }
  0x18   : > { %4313 = sst [smem:[#allocation27_spill]] %s3553_s17  ;;  %p272_p4 = scmp.eq.s32.totalorder %s3553_s17, 7 }
  0x19   : > { %p3564_p5 = por %p59_p1, %p58_p0  ;;  %p278_p6 = scmp.eq.s32.totalorder %s2303_s18, 7 }
  0x1a   : > { %p3570_p7 = por %p4275_p3, %p64_p2  ;;  %p3574_p8 = por %p272_p4, %p58_p0 }
  0x1b   : > { %s4314_s20 = scalar_select %p3564_p5, 1, 0 }
  0x1c   : > { %s4315_s21 = scalar_select %p3570_p7, 1, 0 }
  0x1d   : > { %s4317_s22 = scalar_select %p3574_p8, 1, 0 }
  0x1e   : > { %4316 = sst [smem:[#allocation28_spill]] %s4315_s21  ;;  %p3578_p9 = por %p278_p6, %p64_p2 }
  0x1f   : > { %4318 = sst [smem:[#allocation29_spill]] %s4317_s22  ;;  %p2304_p10 = scmp.ge.s32.totalorder %s3440_s16, 1 }
  0x20   : > { %s4319_s23 = scalar_select %p3578_p9, 1, 0 }
  0x21   : > { %p285_p11 = scmp.lt.s32.totalorder %s3440_s16, 9  ;;  %s3442_s25 = smov [#allocation10]  }
  0x22   : > { %4320 = sst [smem:[#allocation30_spill]] %s4319_s23  ;;  %s297_s26 = sshll.u32 %s3442_s25, 4  ;;  %s298_s26 = int_to_ptr.vmem [resolvable:$true] %s297_s26 }
  0x23   : > { %p3584_p12 = pnand %p2304_p10, %p285_p11  ;;  %s42_s28 = sadd.s32 1, %s3436_s15 }
  0x24   : > { %s39_s29 = sadd.s32 1, %s3432_s14  ;;  %s4323_s3 = sld [smem:[#allocation35_spill]] }
  0x25   : > { %s4321_s24 = scalar_select %p3584_p12, 1, 0 }
  0x26   : > { %p2956_p13 = pneg %p3584_p12 }
  0x28   : > { %p3592_p0 = pnand %p2956_p13, %p4275_p3 }
  0x2a   : > { %s4322_s27 = scalar_select %p3592_p0, 1, 0 }
  0x2b   : > { %s3156_s23 = scalar_lea.hbm %s4323_s3, 1024  ;;  %p3606_p2 = pneg %p3592_p0 }
  0x2c   : > { %p3157_p1 = scmp.ne.s32.totalorder %s4323_s3, %s3156_s23  ;;  %p3163_p10 = scmp.lt.u32.totalorder %s3156_s23, %s4323_s3 }
  0x2d   : > { %s4324_s25 = scalar_select %p3606_p2, 1, 0 }
  0x2e   : > { %p3159_p4 = pnand %p3606_p2, %p3157_p1 }
  0x30   : > { %p3160_p6 = pneg %p3159_p4 }
  0x32   : > { %p3165_p11 = pnand %p3163_p10, %p3160_p6 }
  0x34   : > { %3168 = shalt.err (!%p3165_p11)
}
  0x35   : > { %s3169_s19 = scalar_lea.vmem %s298_s26, 1024  ;;  %p3177_p8 = scmp.lt.s32.totalorder %s298_s26, %s298_s26 }
  0x36   : > { %p3170_p13 = scmp.ne.s32.totalorder %s298_s26, %s3169_s19  ;;  %p3178_p7 = scmp.lt.s32.totalorder %s3169_s19, %s3169_s19 }
  0x38   : > { %p3172_p3 = pnand %p3170_p13, %p3606_p2  ;;  %p3179_p12 = por %p3178_p7, %p3177_p8 }
  0x3a   : > { %p3173_p9 = pneg %p3172_p3 }
  0x3c   : > { %p3180_p5 = pnand %p3179_p12, %p3173_p9 }
  0x3e   : > { %3183 = shalt.err (!%p3180_p5)
}
  0x3f   : > { %s4279_s9 = smov 64   ;;  %s4281_s30 = smov 4  }
  0x40   : > { %2959 = dma.hbm_to_vmem [thread:$0]  (!%p3592_p0), %s4323_s3, 1024, %s298_s26, [#allocation11], %s4279_s9, %s4279_s9, %s4281_s30  }
  0x41   : > { %p40_p3 = scmp.ge.s32.totalorder %s39_s29, 4  ;;  %p2983_p5 = scmp.lt.s32.totalorder %s3440_s16, 8 }
  0x42   : > { %s3627_s23 = sand.u32 1, %s3420_s11   ;;  %p4326_p7 = scmp.ne.s32.totalorder %s4314_s20, 0 }
  0x43   : > { %s4378_s29 = smov (%p40_p3, %s39_s29), 0  ;;  %s4380_s28 = smov (!%p40_p3, %s42_s28), %s3436_s15 }
  0x44   : > { %4325 = sst [smem:[#allocation31_spill]] %s4378_s29  ;;  %s47_s18 = ssub.s32 %s3432_s14, %s4378_s29 }
  0x45   : > { %p3636_p8 = pnand %p2983_p5, %p4326_p7  ;;  %p44_p9 = scmp.ge.s32.totalorder %s4380_s28, 2 }
  0x46   : > { %s370_s26 = sand.u32 1, %s3440_s16   ;;  %s2314_s13 = sshll.u32 %s3627_s23, 4 }
  0x47   : > { %s4327_s19 = scalar_select %p3636_p8, 1, 0 }
  0x48   : > { %s4382_s28 = smov (%p44_p9, %s4380_s28), 0  ;;  %s2315_s30 = sshll.u32 %s3432_s14, 1 }
  0x49   : > { %4328 = sst [smem:[#allocation32_spill]] %s4382_s28  ;;  %s46_s22 = ssub.s32 %s3436_s15, %s4382_s28 }
  0x4a   : > { %s48_s9 = sor.u32 %s47_s18, %s46_s22  ;;  %s2316_s3 = sshll.u32 %s3436_s15, 3 }
  0x4b   : > { %p49_p12 = scmp.eq.s32.totalorder %s48_s9, 0  ;;  %s3648_s8 = sadd.s32 %s2316_s3, %s2315_s30 }
  0x4c   : > { %s374_s20 = scalar_lea.vmem [#allocation7], %s2314_s13  ;;  %s4329_s6 = sadd.s32 1, %s3420_s11 }
  0x4d   : > { %s383_s29 = sshll.u32 %s374_s20, 4  ;;  %s2317_s16 = sshll.u32 %s3648_s8, 7  ;;  %s3658_s29 = int_to_ptr.vmem [resolvable:$true] %s383_s29 }
  0x4e   : > { %s3655_s12 = scalar_select %p49_p12, %s3420_s11, %s4329_s6  }
  0x4f   : > { %s4331_s1 = sld [smem:[#allocation34_spill]]  ;;  %s3667_s3 = scalar_lea.sflag [#allocation8], %s370_s26 }
  0x50   : > { %4330 = sst [smem:[#allocation33_spill]] %s3655_s12  ;;  %p3673_p4 = pneg %p3636_p8 }
  0x52   : > { %s4332_s6 = scalar_select %p3673_p4, 1, 0 }
  0x55   : > { %s3665_s18 = scalar_lea.hbm %s4331_s1, %s2317_s16  ;;  %s3189_s30 = scalar_lea.hbm %s4331_s1, 2048 }
  0x56   : > { %s3184_s9 = scalar_lea.hbm %s3665_s18, 256  ;;  %p3190_p11 = scmp.lt.u32.totalorder %s3665_s18, %s4331_s1 }
  0x57   : > { %p3185_p1 = scmp.ne.s32.totalorder %s3665_s18, %s3184_s9  ;;  %p3191_p13 = scmp.lt.u32.totalorder %s3189_s30, %s3184_s9 }
  0x58   : > { %p3193_p5 = scmp.lt.u32.totalorder %s3184_s9, %s3665_s18 }
  0x59   : > { %p3187_p6 = pnand %p3673_p4, %p3185_p1  ;;  %p3192_p3 = por %p3191_p13, %p3190_p11 }
  0x5b   : > { %p3188_p10 = pneg %p3187_p6  ;;  %p3194_p7 = por %p3193_p5, %p3192_p3 }
  0x5d   : > { %p3195_p9 = pnand %p3194_p7, %p3188_p10 }
  0x5f   : > { %3198 = shalt.err (!%p3195_p9)
}
  0x60   : > { %s3199_s26 = scalar_lea.vmem %s3658_s29, 256  ;;  %s3445_s4 = smov [#allocation7]  }
  0x61   : > { %p3200_p12 = scmp.ne.s32.totalorder %s3658_s29, %s3199_s26  ;;  %s3204_s28 = sshll.u32 %s3445_s4, 4  ;;  %s3205_s28 = int_to_ptr.vmem [resolvable:$false] %s3204_s28 }
  0x62   : > { %s3206_s22 = scalar_lea.vmem %s3205_s28, 512  ;;  %p3207_p0 = scmp.lt.s32.totalorder %s3658_s29, %s3205_s28 }
  0x63   : > { %p3202_p1 = pnand %p3200_p12, %p3673_p4  ;;  %p3208_p2 = scmp.lt.s32.totalorder %s3206_s22, %s3199_s26 }
  0x65   : > { %p3203_p6 = pneg %p3202_p1  ;;  %p3209_p11 = por %p3208_p2, %p3207_p0 }
  0x67   : > { %p3210_p13 = pnand %p3209_p11, %p3203_p6 }
  0x69   : > { %3213 = shalt.err (!%p3210_p13)
}
  0x6a   : > { %s3446_s9 = smov 128   ;;  %s3447_s30 = smov 8  }
  0x6b   : > { %2972 = dma.hbm_to_vmem [thread:$0]  (!%p3636_p8), %s3665_s18, 256, %s3658_s29, %s3667_s3, %s3446_s9, %s3446_s9, %s3447_s30  }
  0x6c   : > { %s3705_s4 = scalar_lea.hbm %s4262_s2, %s2317_s16  ;;  %s397_s28 = scalar_lea.vmem [#allocation9], %s2314_s13 }
  0x6d   : > { %s406_s22 = sshll.u32 %s397_s28, 4  ;;  %s3448_s1 = smov [#allocation12]   ;;  %s3709_s22 = int_to_ptr.vmem [resolvable:$true] %s406_s22 }
  0x6e   : > { %s313_s12 = sshll.u32 %s3448_s1, 4  ;;  %s3449_s11 = smov [#allocation13]   ;;  %s314_s12 = int_to_ptr.vmem [resolvable:$true] %s313_s12 }
  0x6f   : > { %s329_s17 = sshll.u32 %s3449_s11, 4  ;;  %s3214_s29 = scalar_lea.hbm %s4265_s5, 9216  ;;  %s330_s17 = int_to_ptr.vmem [resolvable:$true] %s329_s17 }
  0x70   : > { %p3215_p0 = scmp.ne.s32.totalorder %s4265_s5, %s3214_s29  ;;  %p4333_p2 = scmp.ne.s32.totalorder %s4324_s25, 0 }
  0x71   : > { %p3221_p5 = scmp.lt.u32.totalorder %s3214_s29, %s4265_s5 }
  0x72   : > { %p3217_p10 = pnand %p3215_p0, %p4333_p2 }
  0x74   : > { %p3218_p3 = pneg %p3217_p10 }
  0x76   : > { %p3223_p7 = pnand %p3221_p5, %p3218_p3 }
  0x78   : > { %3226 = shalt.err (!%p3223_p7)
}
  0x79   : > { %s3227_s1 = scalar_lea.vmem %s314_s12, 9216  ;;  %p3235_p6 = scmp.lt.s32.totalorder %s314_s12, %s314_s12 }
  0x7a   : > { %p3228_p9 = scmp.ne.s32.totalorder %s314_s12, %s3227_s1  ;;  %p3236_p11 = scmp.lt.s32.totalorder %s3227_s1, %s3227_s1 }
  0x7c   : > { %p3230_p12 = pnand %p3228_p9, %p4333_p2  ;;  %p3237_p13 = por %p3236_p11, %p3235_p6 }
  0x7e   : > { %p3231_p1 = pneg %p3230_p12 }
  0x80   : > { %p3238_p8 = pnand %p3237_p13, %p3231_p1 }
  0x82   : > { %3241 = shalt.err (!%p3238_p8)
}
  0x83   : > { %p4334_p0 = scmp.ne.s32.totalorder %s4322_s27, 0  ;;  %s4335_s10 = smov 4  }
  0x84   : > { %s4336_s11 = smov 64   ;;  %s3242_s29 = scalar_lea.hbm %s4267_s7, 1024 }
  0x85   : > { %2962 = dma.hbm_to_vmem [thread:$0]  (!%p4334_p0), %s4265_s5, 9216, %s314_s12, [#allocation11], %s4336_s11, %s4336_s11, %s4335_s10  }
  0x86   : > { %p3243_p10 = scmp.ne.s32.totalorder %s4267_s7, %s3242_s29  ;;  %p3249_p5 = scmp.lt.u32.totalorder %s3242_s29, %s4267_s7 }
  0x88   : > { %p3245_p8 = pnand %p3243_p10, %p4333_p2 }
  0x8a   : > { %p3246_p3 = pneg %p3245_p8 }
  0x8c   : > { %p3251_p7 = pnand %p3249_p5, %p3246_p3 }
  0x8e   : > { %3254 = shalt.err (!%p3251_p7)
}
  0x8f   : > { %s3255_s1 = scalar_lea.vmem %s330_s17, 1024  ;;  %p3263_p6 = scmp.lt.s32.totalorder %s330_s17, %s330_s17 }
  0x90   : > { %p3256_p9 = scmp.ne.s32.totalorder %s330_s17, %s3255_s1  ;;  %p3264_p11 = scmp.lt.s32.totalorder %s3255_s1, %s3255_s1 }
  0x92   : > { %p3258_p12 = pnand %p3256_p9, %p4333_p2  ;;  %p3265_p13 = por %p3264_p11, %p3263_p6 }
  0x94   : > { %p3259_p1 = pneg %p3258_p12 }
  0x96   : > { %p3266_p4 = pnand %p3265_p13, %p3259_p1 }
  0x98   : > { %3269 = shalt.err (!%p3266_p4)
}
  0x99   : > { %2965 = dma.hbm_to_vmem [thread:$0]  (!%p4334_p0), %s4267_s7, 1024, %s330_s17, [#allocation14], %s4336_s11, %s4336_s11, %s4335_s10  }
  0x9a   : > { %s2309_s25 = sshll.u32 %s3627_s23, 6  ;;  %s2432_s20 = sshll.u32 %s3432_s14, 3 }
  0x9b   : > { %s2312_s26 = sshll.u32 %s3436_s15, 5  ;;  %s350_s29 = scalar_lea.vmem [#allocation4], %s2309_s25 }
  0x9c   : > { %s357_s28 = sadd.s32 %s2432_s20, %s2312_s26  ;;  %s360_s8 = sshll.u32 %s350_s29, 4  ;;  %s3756_s8 = int_to_ptr.vmem [resolvable:$true] %s360_s8 }
  0x9d   : > { %s2313_s18 = sshll.u32 %s357_s28, 7  ;;  %s347_s1 = scalar_lea.sflag [#allocation5], %s3627_s23 }
  0x9e   : > { %s3761_s13 = scalar_lea.hbm %s4260_s0, %s2313_s18  ;;  %p4337_p2 = scmp.ne.s32.totalorder %s4332_s6, 0 }
  0x9f   : > { %s3270_s17 = scalar_lea.hbm %s3761_s13, 1024  ;;  %s3275_s12 = scalar_lea.hbm %s4260_s0, 8192 }
  0xa0   : > { %p3271_p4 = scmp.ne.s32.totalorder %s3761_s13, %s3270_s17  ;;  %p3276_p8 = scmp.lt.u32.totalorder %s3761_s13, %s4260_s0 }
  0xa1   : > { %p3277_p3 = scmp.lt.u32.totalorder %s3275_s12, %s3270_s17  ;;  %p3279_p7 = scmp.lt.u32.totalorder %s3270_s17, %s3761_s13 }
  0xa2   : > { %p3273_p0 = pnand %p3271_p4, %p4337_p2 }
  0xa3   : > { %p3278_p5 = por %p3277_p3, %p3276_p8 }
  0xa4   : > { %p3274_p10 = pneg %p3273_p0 }
  0xa5   : > { %p3280_p9 = por %p3279_p7, %p3278_p5 }
  0xa7   : > { %p3281_p12 = pnand %p3280_p9, %p3274_p10 }
  0xa9   : > { %3284 = shalt.err (!%p3281_p12)
}
  0xaa   : > { %s3285_s20 = scalar_lea.vmem %s3756_s8, 1024  ;;  %s3450_s26 = smov [#allocation4]  }
  0xab   : > { %p3286_p1 = scmp.ne.s32.totalorder %s3756_s8, %s3285_s20  ;;  %s3290_s28 = sshll.u32 %s3450_s26, 4  ;;  %s3291_s28 = int_to_ptr.vmem [resolvable:$false] %s3290_s28 }
  0xac   : > { %s3292_s29 = scalar_lea.vmem %s3291_s28, 2048  ;;  %p3293_p13 = scmp.lt.s32.totalorder %s3756_s8, %s3291_s28 }
  0xad   : > { %p3288_p6 = pnand %p3286_p1, %p4337_p2  ;;  %p3294_p4 = scmp.lt.s32.totalorder %s3292_s29, %s3285_s20 }
  0xaf   : > { %p3289_p11 = pneg %p3288_p6  ;;  %p3295_p0 = por %p3294_p4, %p3293_p13 }
  0xb1   : > { %p3296_p8 = pnand %p3295_p0, %p3289_p11 }
  0xb3   : > { %3299 = shalt.err (!%p3296_p8)
}
  0xb4   : > { %p4338_p10 = scmp.ne.s32.totalorder %s4327_s19, 0  ;;  %s3300_s18 = scalar_lea.hbm %s3705_s4, 256 }
  0xb5   : > { %p3301_p3 = scmp.ne.s32.totalorder %s3705_s4, %s3300_s18  ;;  %s3305_s17 = scalar_lea.hbm %s4262_s2, 2048 }
  0xb6   : > { %2969 = dma.hbm_to_vmem [thread:$0]  (!%p4338_p10), %s3761_s13, 1024, %s3756_s8, %s347_s1, %s3446_s9, %s3446_s9, %s3447_s30  }
  0xb7   : > { %p3303_p5 = pnand %p3301_p3, %p4337_p2  ;;  %p3306_p9 = scmp.lt.u32.totalorder %s3705_s4, %s4262_s2 }
  0xb8   : > { %p3307_p12 = scmp.lt.u32.totalorder %s3305_s17, %s3300_s18  ;;  %p3309_p6 = scmp.lt.u32.totalorder %s3300_s18, %s3705_s4 }
  0xb9   : > { %p3304_p7 = pneg %p3303_p5 }
  0xba   : > { %p3308_p1 = por %p3307_p12, %p3306_p9 }
  0xbc   : > { %p3310_p11 = por %p3309_p6, %p3308_p1 }
  0xbe   : > { %p3311_p13 = pnand %p3310_p11, %p3304_p7 }
  0xc0   : > { %3314 = shalt.err (!%p3311_p13)
}
  0xc1   : > { %s3315_s23 = scalar_lea.vmem %s3709_s22, 256  ;;  %s3451_s8 = smov [#allocation9]  }
  0xc2   : > { %p3316_p4 = scmp.ne.s32.totalorder %s3709_s22, %s3315_s23  ;;  %s3320_s13 = sshll.u32 %s3451_s8, 4  ;;  %s3321_s13 = int_to_ptr.vmem [resolvable:$false] %s3320_s13 }
  0xc3   : > { %s3322_s1 = scalar_lea.vmem %s3321_s13, 512  ;;  %p3323_p3 = scmp.lt.s32.totalorder %s3709_s22, %s3321_s13 }
  0xc4   : > { %p3318_p0 = pnand %p3316_p4, %p4337_p2  ;;  %p3324_p5 = scmp.lt.s32.totalorder %s3322_s1, %s3315_s23 }
  0xc6   : > { %p3319_p8 = pneg %p3318_p0  ;;  %p3325_p9 = por %p3324_p5, %p3323_p3 }
  0xc8   : > { %p3326_p12 = pnand %p3325_p9, %p3319_p8 }
  0xca   : > { %3329 = shalt.err (!%p3326_p12)
}
  0xcb   : > { %2975 = dma.hbm_to_vmem [thread:$0]  (!%p4338_p10), %s3705_s4, 256, %s3709_s22, %s3667_s3, %s3446_s9, %s3446_s9, %s3447_s30  }
  0xcc   : > { %p4339_p2 = scmp.ne.s32.totalorder %s4321_s24, 0 }
  0xcd   : > { %s4340_s6 = sld [smem:[#allocation22_spill]] (!%p4339_p2)  ;;  %s4341_s12 = sld [smem:[#allocation28_spill]] (!%p4339_p2) }
  0xce   : > { %418 = sbr.rel (%p4339_p2) target bundleno = 1602 (0x642), region = 56 }
  0xd3   : > { %s3818_s21 = sand.u32 (!%p4339_p2), 1, %s4340_s6   ;;  %p4342_p7 = scmp.ne.s32.totalorder (!%p4339_p2), %s4341_s12, 0 }
  0xd4   : > { %s2323_s25 = sshll.u32 (!%p4339_p2), %s3818_s21, 6  ;;  %s421_s20 = scalar_lea.sflag (!%p4339_p2), [#allocation5], %s3818_s21 }
  0xd5   : > { %s3824_s19 = scalar_lea.vmem [#allocation4], %s2323_s25 }
  0xd6   : > { %3391 = dma.done.wait (%p4342_p7), %s421_s20, 1024  }
  0xd7   : > { %3393 = vsyncadd (%p4342_p7), %s421_s20, 4294966272  ;;  %s4343_s3 = sld [smem:[#allocation27_spill]]  ;;  %s2324_s9 = sshll.u32 %s3818_s21, 4 }
  0xd8   : > { %s3832_s4 = scalar_lea.vmem [#allocation7], %s2324_s9 }
  0xdd   : > { %s429_s24 = sand.u32 1, %s4343_s3  }
  0xde   : > { %s430_s30 = scalar_lea.sflag [#allocation8], %s429_s24 }
  0xdf   : > { %3395 = dma.done.wait (%p4342_p7), %s430_s30, 512  }
  0xe0   : > { %3397 = vsyncadd (%p4342_p7), %s430_s30, 4294966784  ;;  %s3838_s22 = scalar_lea.vmem [#allocation9], %s2324_s9  ;;  %p4344_p10 = scmp.eq.s32.totalorder %s4343_s3, 0 }
  0xe2   : > { %3399 = dma.done.wait (%p4344_p10), [#allocation11], 10240   ;;  %p4345_p1 = pmov %p4344_p10 }
  0xe4   : > { %3401 = vsyncadd (%p4345_p1), [#allocation11], 4294957056  ;;  %p4346_p6 = pmov %p4345_p1 }
  0xe5   : > { %p4347_p11 = pmov %p4345_p1 }
  0xe6   : > { %3403 = dma.done.wait (%p4346_p6), [#allocation14], 1024  }
  0xe7   : > { %3405 = vsyncadd (%p4347_p11), [#allocation14], 4294966272  ;;  %v3848_v0 = vld [vmem:[#allocation10] sm:$0xff]   ;;  %v3850_v1 = vld [vmem:[#allocation10 + $0x8] sm:$0xff]   ;;  %s4348_s29 = sld [smem:[#allocation36_spill]]  ;;  %s3919_s18 = scalar_lea.vmem [#allocation15], %s2323_s25 }
  0xe8   : > { %2704 = vmatprep.subr.bf16.mxu0 %v3848_v0  ;;  %2864 = vmatprep.subr.bf16.mxu1 %v3848_v0  ;;  %v3858_v2 = vld [vmem:[#allocation10 + $0x10] sm:$0xff]   ;;  %v3862_v3 = vld [vmem:[#allocation10 + $0x18] sm:$0xff]   ;;  %v519_v4 = vld [vmem:[%s3824_s19] sm:$0xff]  ;;  %s4349_s27 = sld [smem:[#allocation24_spill]] }
  0xe9   : > { %2705 = vmatpush3.bf16.msra.mxu0 %v3848_v0  ;;  %2872 = vmatpush3.bf16.msra.mxu1 %v3848_v0  ;;  %v520_v5 = vld [vmem:[%s3824_s19 + $0x8] sm:$0xff]  ;;  %v523_v6 = vld [vmem:[%s3824_s19 + $0x20] sm:$0xff]  ;;  %v3886_v12 = vld [vmem:[#allocation10 + $0x30] sm:$0xff]  }
  0xea   : > { %2706 = vmatprep.subr.bf16.mxu0 %v3850_v1  ;;  %2865 = vmatprep.subr.bf16.mxu1 %v3850_v1  ;;  %v527_v7 = vpack.c.bf16 %v520_v5, %v519_v4  ;;  %v524_v8 = vld [vmem:[%s3824_s19 + $0x28] sm:$0xff]  ;;  %v3874_v10 = vld [vmem:[#allocation10 + $0x20] sm:$0xff]   ;;  %v3892_v13 = vld [vmem:[#allocation10 + $0x38] sm:$0xff]  }
  0xeb   : > { %v529_v9 = vpack.c.bf16 %v524_v8, %v523_v6  ;;  %v3880_v11 = vld [vmem:[#allocation10 + $0x28] sm:$0xff]   ;;  %v521_v14 = vld [vmem:[%s3824_s19 + $0x10] sm:$0xff]  ;;  %v522_v15 = vld [vmem:[%s3824_s19 + $0x18] sm:$0xff] }
  0xec   : > { %2720 = vmatprep.mubr.bf16.mxu0 %v527_v7  ;;  %v525_v16 = vld [vmem:[%s3824_s19 + $0x30] sm:$0xff]  ;;  %v526_v17 = vld [vmem:[%s3824_s19 + $0x38] sm:$0xff]  ;;  %v528_v18 = vpack.c.bf16 %v522_v15, %v521_v14 }
  0xed   : > { %2707 = vmatpush3.bf16.msra.mxu0 %v3850_v1  ;;  %2873 = vmatpush3.bf16.msra.mxu1 %v3850_v1  ;;  %v530_v19 = vpack.c.bf16 %v526_v17, %v525_v16  ;;  %v3907_v20 = vld [vmem:[%s4348_s29] ss:$0 sm:$0xff] }
  0xee   : > { %2708 = vmatprep.subr.bf16.mxu0 %v3858_v2  ;;  %2866 = vmatprep.subr.bf16.mxu1 %v3858_v2  ;;  %p2339_p13 = scmp.ne.s32.totalorder %s4349_s27, 0 }
  0xef   : > { %2724 = vmatprep.mubr.bf16.mxu1 %v529_v9  ;;  %v3452_v45 = vmov (!%p2339_p13), 0.0  }
  0xf0   : > { %670 = vst [vmem:[#allocation2] sm:$0xff] (!%p2339_p13), %v3452_v45  ;;  %671 = vst [vmem:[#allocation2 + $0x8] sm:$0xff] (!%p2339_p13), %v3452_v45 }
  0xf1   : > { %2709 = vmatpush3.bf16.msra.mxu0 %v3858_v2  ;;  %2874 = vmatpush3.bf16.msra.mxu1 %v3858_v2 }
  0xf2   : > { %2710 = vmatprep.subr.bf16.mxu0 %v3862_v3  ;;  %2867 = vmatprep.subr.bf16.mxu1 %v3862_v3 }
  0xf5   : > { %2711 = vmatpush3.bf16.msra.mxu0 %v3862_v3  ;;  %2875 = vmatpush3.bf16.msra.mxu1 %v3862_v3 }
  0xf6   : > { %2712 = vmatprep.subr.bf16.mxu0 %v3874_v10  ;;  %2868 = vmatprep.subr.bf16.mxu1 %v3874_v10 }
  0xf9   : > { %2713 = vmatpush3.bf16.msra.mxu0 %v3874_v10  ;;  %2876 = vmatpush3.bf16.msra.mxu1 %v3874_v10 }
  0xfa   : > { %2714 = vmatprep.subr.bf16.mxu0 %v3880_v11  ;;  %2869 = vmatprep.subr.bf16.mxu1 %v3880_v11 }
  0xfd   : > { %2715 = vmatpush3.bf16.msra.mxu0 %v3880_v11  ;;  %2877 = vmatpush3.bf16.msra.mxu1 %v3880_v11 }
  0xfe   : > { %2716 = vmatprep.subr.bf16.mxu0 %v3886_v12  ;;  %2870 = vmatprep.subr.bf16.mxu1 %v3886_v12 }
 0x101   : > { %2717 = vmatpush3.bf16.msra.mxu0 %v3886_v12  ;;  %2878 = vmatpush3.bf16.msra.mxu1 %v3886_v12 }
 0x102   : > { %2718 = vmatprep.subr.bf16.mxu0 %v3892_v13  ;;  %2871 = vmatprep.subr.bf16.mxu1 %v3892_v13 }
 0x105   : > { %2719 = vmatpush3.bf16.msra.mxu0 %v3892_v13  ;;  %2879 = vmatpush3.bf16.msra.mxu1 %v3892_v13 }
 0x108   : > { %2721 = vmatmul.mubr.bf16.vlgmr.msra.gmra.mrb[0].mxu0 %v528_v18  ;;  %2725 = vmatmul.mubr.bf16.vlgmr.msra.gmra.mrb[0].mxu1 %v530_v19 }
 0x1db   : > { %v2722_v21 = vpop.f32.mrb[0].mxu0  ;;  %v2726_v22 = vpop.f32.mrb[0].mxu1 }
 0x1dc   : > { %v628_v23 = vadd.f32 %v2722_v21, %v3907_v20  ;;  %v644_v24 = vadd.f32 %v2726_v22, %v3907_v20  ;;  %v619_v25 = vpop.f32.mrb[1].mxu0  ;;  %v635_v26 = vpop.f32.mrb[1].mxu1 }
 0x1dd   : > { %v620_v27 = vadd.f32 %v3907_v20, %v619_v25  ;;  %v636_v28 = vadd.f32 %v3907_v20, %v635_v26  ;;  %v2723_v29 = vpop.f32.mrb[2].mxu0  ;;  %v2727_v30 = vpop.f32.mrb[2].mxu1  ;;  %669 = sbr.rel (%p2339_p13) target bundleno = 484 (0x1e4), region = 84 }
 0x1de   : > { %v652_v31 = vmax.f32 %v628_v23, 0.0  ;;  %v656_v32 = vmax.f32 %v644_v24, 0.0  ;;  %v631_v33 = vadd.f32 %v2723_v29, %v3907_v20  ;;  %v647_v34 = vadd.f32 %v2727_v30, %v3907_v20  ;;  %v622_v35 = vpop.f32.mrb[3].mxu0  ;;  %v638_v36 = vpop.f32.mrb[3].mxu1 }
 0x1df   : > { %v650_v37 = vmax.f32 %v620_v27, 0.0  ;;  %v654_v38 = vmax.f32 %v636_v28, 0.0  ;;  %v623_v39 = vadd.f32 %v3907_v20, %v622_v35  ;;  %v639_v40 = vadd.f32 %v3907_v20, %v638_v36 }
 0x1e0   : > { %660 = vst [vmem:[#allocation2 + $0x20] sm:$0xff] %v652_v31  ;;  %664 = vst [vmem:[#allocation2 + $0x40] sm:$0xff] %v656_v32  ;;  %v653_v41 = vmax.f32 %v631_v33, 0.0  ;;  %v657_v42 = vmax.f32 %v647_v34, 0.0 }
 0x1e1   : > { %658 = vst [vmem:[#allocation2 + $0x10] sm:$0xff] %v650_v37  ;;  %662 = vst [vmem:[#allocation2 + $0x30] sm:$0xff] %v654_v38  ;;  %v651_v43 = vmax.f32 %v623_v39, 0.0  ;;  %v655_v44 = vmax.f32 %v639_v40, 0.0 }
 0x1e2   : > { %661 = vst [vmem:[#allocation2 + $0x28] sm:$0xff] %v653_v41  ;;  %665 = vst [vmem:[#allocation2 + $0x48] sm:$0xff] %v657_v42 }
 0x1e3   : > { %659 = vst [vmem:[#allocation2 + $0x18] sm:$0xff] %v651_v43  ;;  %663 = vst [vmem:[#allocation2 + $0x38] sm:$0xff] %v655_v44 }
 0x1e4 PF: > { %s4350_s16 = sld [smem:[#allocation24_spill]] }
 0x1ea   : > { %p2340_p4 = scmp.le.s32.totalorder %s4350_s16, 0 }
 0x1eb   : > { %v3453_v46 = vmov (!%p2340_p4), 0.0   ;;  %vm3454_vm0 = vmmov (!%p2340_p4), 0   ;;  %v676_v47 = vld [vmem:[%s3832_s4] sm:$0xff] (!%p2340_p4)  ;;  %v677_v48 = vld [vmem:[%s3832_s4 + $0x8] sm:$0xff] (!%p2340_p4) }
 0x1ec   : > { %675 = sbr.rel (%p2340_p4) target bundleno = 743 (0x2e7), region = 88  ;;  %2728 = vmatprep.subr.bf16.mxu0 (!%p2340_p4), %v3453_v46  ;;  %2744 = vmatprep.mubr.msk.bf16.mxu0 (!%p2340_p4), %vm3454_vm0, %v3453_v46  ;;  %v678_v49 = vpack.c.bf16 (!%p2340_p4), %v677_v48, %v676_v47 }
 0x1ed   : > { %2729 = vmatpush3.bf16.msra.mxu0 (!%p2340_p4), %v3848_v0 }
 0x1ee   : > { %2730 = vmatprep.subr.bf16.mxu0 (!%p2340_p4), %v3453_v46 }
 0x1f1   : > { %2731 = vmatpush3.bf16.msra.mxu0 (!%p2340_p4), %v3850_v1 }
 0x1f2   : > { %2732 = vmatprep.subr.bf16.mxu0 (!%p2340_p4), %v3453_v46 }
 0x1f5   : > { %2733 = vmatpush3.bf16.msra.mxu0 %v3858_v2 }
 0x1f6   : > { %2734 = vmatprep.subr.bf16.mxu0 %v3453_v46 }
 0x1f9   : > { %2735 = vmatpush3.bf16.msra.mxu0 %v3862_v3 }
 0x1fa   : > { %2736 = vmatprep.subr.bf16.mxu0 %v3453_v46 }
 0x1fd   : > { %2737 = vmatpush3.bf16.msra.mxu0 %v3874_v10 }
 0x1fe   : > { %2738 = vmatprep.subr.bf16.mxu0 %v3453_v46 }
 0x201   : > { %2739 = vmatpush3.bf16.msra.mxu0 %v3880_v11 }
 0x202   : > { %2740 = vmatprep.subr.bf16.mxu0 %v3453_v46 }
 0x205   : > { %2741 = vmatpush3.bf16.msra.mxu0 %v3886_v12 }
 0x206   : > { %2742 = vmatprep.subr.bf16.mxu0 %v3453_v46 }
 0x209   : > { %2743 = vmatpush3.bf16.msra.mxu0 %v3892_v13 }
 0x20c   : > { %2745 = vmatmul.mubr.bf16.vlgmr.msra.gmra.mrb[0].mxu0 %v678_v49 }
 0x2df   : > { %v713_v50 = vpop.f32.mrb[0].mxu0 }
 0x2e0   : > { %v714_v51 = vadd.f32 %v3907_v20, %v713_v50  ;;  %v2746_v52 = vpop.f32.mrb[1].mxu0 }
 0x2e1   : > { %v716_v53 = vpop.f32.mrb[2].mxu0 }
 0x2e2   : > { %v720_v54 = vmax.f32 %v714_v51, 0.0  ;;  %v717_v55 = vadd.f32 %v3907_v20, %v716_v53  ;;  %v2747_v56 = vpop.f32.mrb[3].mxu0 }
 0x2e4   : > { %722 = vst [vmem:[#allocation2] sm:$0xff] %v720_v54  ;;  %v721_v57 = vmax.f32 %v717_v55, 0.0 }
 0x2e6   : > { %723 = vst [vmem:[#allocation2 + $0x8] sm:$0xff] %v721_v57 }
 0x2e7 PF: > { %s4351_s17 = sld [smem:[#allocation24_spill]] }
 0x2ed   : > { %p2341_p0 = scmp.ne.s32.totalorder %s4351_s17, 3 }
 0x2ee   : > { %v3455_v58 = vmov (!%p2341_p0), 0.0  }
 0x2ef   : > { %727 = sbr.rel (%p2341_p0) target bundleno = 758 (0x2f6), region = 92  ;;  %728 = vst [vmem:[#allocation2 + $0x50] sm:$0xff] (!%p2341_p0), %v3455_v58  ;;  %729 = vst [vmem:[#allocation2 + $0x58] sm:$0xff] (!%p2341_p0), %v3455_v58 }
 0x2f6 PF: > { %s4352_s10 = sld [smem:[#allocation24_spill]] }
 0x2fc   : > { %p2342_p8 = scmp.ge.s32.totalorder %s4352_s10, 3 }
 0x2fd   : > { %v3456_v59 = vmov (!%p2342_p8), 0.0   ;;  %vm3457_vm1 = vmmov (!%p2342_p8), 0   ;;  %v734_v60 = vld [vmem:[%s3838_s22] sm:$0xff] (!%p2342_p8)  ;;  %v735_v61 = vld [vmem:[%s3838_s22 + $0x8] sm:$0xff] (!%p2342_p8) }
 0x2fe   : > { %733 = sbr.rel (%p2342_p8) target bundleno = 1017 (0x3f9), region = 96  ;;  %2748 = vmatprep.subr.bf16.mxu0 (!%p2342_p8), %v3456_v59  ;;  %2764 = vmatprep.mubr.msk.bf16.mxu0 (!%p2342_p8), %vm3457_vm1, %v3456_v59  ;;  %v736_v62 = vpack.c.bf16 (!%p2342_p8), %v735_v61, %v734_v60 }
 0x2ff   : > { %2749 = vmatpush3.bf16.msra.mxu0 (!%p2342_p8), %v3848_v0 }
 0x300   : > { %2750 = vmatprep.subr.bf16.mxu0 (!%p2342_p8), %v3456_v59 }
 0x303   : > { %2751 = vmatpush3.bf16.msra.mxu0 (!%p2342_p8), %v3850_v1 }
 0x304   : > { %2752 = vmatprep.subr.bf16.mxu0 (!%p2342_p8), %v3456_v59 }
 0x307   : > { %2753 = vmatpush3.bf16.msra.mxu0 %v3858_v2 }
 0x308   : > { %2754 = vmatprep.subr.bf16.mxu0 %v3456_v59 }
 0x30b   : > { %2755 = vmatpush3.bf16.msra.mxu0 %v3862_v3 }
 0x30c   : > { %2756 = vmatprep.subr.bf16.mxu0 %v3456_v59 }
 0x30f   : > { %2757 = vmatpush3.bf16.msra.mxu0 %v3874_v10 }
 0x310   : > { %2758 = vmatprep.subr.bf16.mxu0 %v3456_v59 }
 0x313   : > { %2759 = vmatpush3.bf16.msra.mxu0 %v3880_v11 }
 0x314   : > { %2760 = vmatprep.subr.bf16.mxu0 %v3456_v59 }
 0x317   : > { %2761 = vmatpush3.bf16.msra.mxu0 %v3886_v12 }
 0x318   : > { %2762 = vmatprep.subr.bf16.mxu0 %v3456_v59 }
 0x31b   : > { %2763 = vmatpush3.bf16.msra.mxu0 %v3892_v13 }
 0x31e   : > { %2765 = vmatmul.mubr.bf16.vlgmr.msra.gmra.mrb[0].mxu0 %v736_v62 }
 0x3f1   : > { %v771_v63 = vpop.f32.mrb[0].mxu0 }
 0x3f2   : > { %v772_v0 = vadd.f32 %v3907_v20, %v771_v63  ;;  %v2766_v1 = vpop.f32.mrb[1].mxu0 }
 0x3f3   : > { %v774_v2 = vpop.f32.mrb[2].mxu0 }
 0x3f4   : > { %v778_v3 = vmax.f32 %v772_v0, 0.0  ;;  %v775_v4 = vadd.f32 %v3907_v20, %v774_v2  ;;  %v2767_v5 = vpop.f32.mrb[3].mxu0 }
 0x3f6   : > { %780 = vst [vmem:[#allocation2 + $0x50] sm:$0xff] %v778_v3  ;;  %v779_v6 = vmax.f32 %v775_v4, 0.0 }
 0x3f8   : > { %781 = vst [vmem:[#allocation2 + $0x58] sm:$0xff] %v779_v6 }
 0x3f9 PF: > { %v3076_v7 = vld [vmem:[#allocation12 + $0x100] sm:$0xff]   ;;  %v3079_v10 = vld [vmem:[#allocation12 + $0x108] sm:$0xff]   ;;  %v3082_v13 = vld [vmem:[#allocation12 + $0x110] sm:$0xff]   ;;  %v794_v19 = vlaneseq  ;;  %vm3458_vm5 = vmmov 1   ;;  %s4357_s8 = sld [smem:[#allocation37_spill]]  ;;  %s4358_s6 = sld [smem:[#allocation38_spill]] }
 0x3fa   : > { %v3077_v8 = vld [vmem:[#allocation12 + $0x140] sm:$0xff]   ;;  %2536 = vmatprep.subr.bf16.mxu0 %v3076_v7  ;;  %v3080_v11 = vld [vmem:[#allocation12 + $0x148] sm:$0xff]   ;;  %v3083_v14 = vld [vmem:[#allocation12 + $0x150] sm:$0xff]   ;;  %s4359_s12 = sld [smem:[#allocation24_spill]]  ;;  %s4360_s25 = sld [smem:[#allocation25_spill]] }
 0x3fb   : > { %v3078_v9 = vld [vmem:[#allocation12 + $0xc0] sm:$0xff]   ;;  %2768 = vmatprep.subr.bf16.mxu1 %v3077_v8  ;;  %v3081_v12 = vld [vmem:[#allocation12 + $0xc8] sm:$0xff]   ;;  %v3084_v15 = vld [vmem:[#allocation12 + $0xd0] sm:$0xff]   ;;  %v3949_v23 = vshrl.u32 %v794_v19, 7  ;;  %s2134_s30 = sshll.u32 %s3919_s18, 4  ;;  %s4361_s4 = sld [smem:[#allocation29_spill]]  ;;  %s4203_s30 = int_to_ptr.vmem [resolvable:$true] %s2134_s30 }
 0x3fc   : > { %2537 = vmatpush3.bf16.msra.mxu0 %v3078_v9  ;;  %2769 = vmatpush3.bf16.msra.mxu1 %v3077_v8  ;;  %v3085_v16 = vld [vmem:[#allocation12 + $0x118] sm:$0xff]   ;;  %v3088_v20 = vld [vmem:[#allocation12 + $0x120] sm:$0xff]   ;;  %v3091_v24 = vld [vmem:[#allocation12 + $0x128] sm:$0xff]   ;;  %s4362_s28 = sld [smem:[#allocation39_spill]]  ;;  %s3330_s27 = scalar_lea.vmem %s4203_s30, 1024 }
 0x3fd   : > { %2538 = vmatprep.subr.bf16.mxu0 %v3079_v10  ;;  %2770 = vmatprep.subr.bf16.mxu1 %v3080_v11  ;;  %v3086_v17 = vld [vmem:[#allocation12 + $0x158] sm:$0xff]   ;;  %v3089_v21 = vld [vmem:[#allocation12 + $0x160] sm:$0xff]   ;;  %v3092_v25 = vld [vmem:[#allocation12 + $0x168] sm:$0xff]   ;;  %v796_v27 = vadd.s32 8, %v3949_v23  ;;  %vm817_vm3 = vcmp.lt.s32.totalorder %v3949_v23, 1  ;;  %vm866_vm4 = vcmp.lt.s32.totalorder %v3949_v23, 7  ;;  %p3331_p3 = scmp.ne.s32.totalorder %s4203_s30, %s3330_s27 }
 0x3fe   : > { %v3087_v18 = vld [vmem:[#allocation12 + $0xd8] sm:$0xff]   ;;  %v3090_v22 = vld [vmem:[#allocation12 + $0xe0] sm:$0xff]   ;;  %v3093_v26 = vld [vmem:[#allocation12 + $0xe8] sm:$0xff]   ;;  %vm803_vm7 = vcmp.gt.s32.totalorder %v3949_v23, 0  ;;  %s3459_s16 = smov [#allocation15]  }
 0x3ff   : > { %v3094_v28 = vld [vmem:[#allocation12 + $0x130] sm:$0xff]   ;;  %v3097_v31 = vld [vmem:[#allocation12 + $0x138] sm:$0xff]   ;;  %vm853_vm2 = vcmp.lt.s32.totalorder %v796_v27, 15  ;;  %v3954_v35 = vld [vmem:[#allocation2 + $0x8] sm:$0xff]  ;;  %s3334_s17 = sshll.u32 %s3459_s16, 4  ;;  %s3335_s17 = int_to_ptr.vmem [resolvable:$false] %s3334_s17 }
 0x400   : > { %2539 = vmatpush3.bf16.msra.mxu0 %v3081_v12  ;;  %2771 = vmatpush3.bf16.msra.mxu1 %v3080_v11  ;;  %v3095_v29 = vld [vmem:[#allocation12 + $0x170] sm:$0xff]   ;;  %v3098_v32 = vld [vmem:[#allocation12 + $0x178] sm:$0xff]   ;;  %v786_v40 = vld [vmem:[#allocation2 + $0x20] sm:$0xff]  ;;  %v806_v43 = vrot.slane %v3954_v35, 7  ;;  %s2433_s20 = sshll.u32 %s4359_s12, 3  ;;  %s2428_s3 = sshll.u32 %s4360_s25, 5 }
 0x401   : > { %2540 = vmatprep.subr.bf16.mxu0 %v3082_v13  ;;  %2772 = vmatprep.subr.bf16.mxu1 %v3083_v14  ;;  %v3096_v30 = vld [vmem:[#allocation12 + $0xf0] sm:$0xff]   ;;  %v785_v34 = vld [vmem:[#allocation2 + $0x18] sm:$0xff]  ;;  %v858_v44 = vrot.slane %v786_v40, 1  ;;  %vm3966_vm6 = vmpackc.low %vm853_vm2, %vm3458_vm5  ;;  %v809_v59 = vrot.slane %v786_v40, 7  ;;  %s2131_s24 = sadd.s32 %s2433_s20, %s2428_s3  ;;  %p4363_p5 = scmp.ne.s32.totalorder %s4361_s4, 0 }
 0x402   : > { %v3952_v33 = vld [vmem:[#allocation2 + $0x10] sm:$0xff]  ;;  %v808_v38 = vrot.slane %v785_v34, 7  ;;  %v3099_v41 = vld [vmem:[#allocation12 + $0xf8] sm:$0xff]   ;;  %v857_v42 = vrot.slane %v785_v34, 1  ;;  %v3100_v47 = vld [vmem:[#allocation12 + $0x40] sm:$0xff]   ;;  %s2429_s9 = sshll.u32 %s2131_s24, 7  ;;  %p3337_p2 = scmp.lt.s32.totalorder %s4203_s30, %s3335_s17 }
 0x403   : > { %v3959_v36 = vpack.c.bf16 %v785_v34, %v3952_v33  ;;  %v807_v37 = vrot.slane %v3952_v33, 7  ;;  %v856_v39 = vrot.slane %v3952_v33, 1  ;;  %v3101_v51 = vld [vmem:[#allocation12 + $0x80] sm:$0xff]   ;;  %v787_v52 = vld [vmem:[#allocation2 + $0x28] sm:$0xff]  ;;  %v3984_v53 = vld [vmem:[#allocation2 + $0x30] sm:$0xff]  ;;  %s4201_s29 = scalar_lea.hbm %s4362_s28, %s2429_s9  ;;  %p3332_p9 = pnand %p3331_p3, %p4363_p5 }
 0x404   : > { %2541 = vmatpush3.bf16.msra.mxu0 %v3084_v15  ;;  %2773 = vmatpush3.bf16.msra.mxu1 %v3083_v14  ;;  %v874_v49 = vsel %vm866_vm4, %v857_v42, %v858_v44  ;;  %v859_v55 = vrot.slane %v787_v52, 1  ;;  %v860_v56 = vrot.slane %v3984_v53, 1  ;;  %vm3992_vm8 = vmpackc.low %vm3458_vm5, %vm803_vm7  ;;  %v3102_v62 = vld [vmem:[#allocation12] sm:$0xff]   ;;  %v3103_v0 = vld [vmem:[#allocation12 + $0x48] sm:$0xff]   ;;  %v810_v1 = vrot.slane %v787_v52, 7  ;;  %s3336_s10 = scalar_lea.vmem %s3335_s17, 2048 }
 0x405   : > { %2542 = vmatprep.subr.bf16.mxu0 %v3085_v16  ;;  %2774 = vmatprep.subr.bf16.mxu1 %v3086_v17  ;;  %v826_v46 = vsel %vm817_vm3, %v807_v37, %v808_v38  ;;  %v827_v48 = vsel %vm817_vm3, %v806_v43, %v807_v37  ;;  %v875_v50 = vsel %vm866_vm4, %v856_v39, %v857_v42  ;;  %v3104_v2 = vld [vmem:[#allocation12 + $0x88] sm:$0xff]   ;;  %v3106_v7 = vld [vmem:[#allocation12 + $0x50] sm:$0xff]   ;;  %v789_v11 = vld [vmem:[#allocation2 + $0x38] sm:$0xff]  ;;  %v811_v15 = vrot.slane %v3984_v53, 7  ;;  %p3333_p12 = pneg %p3332_p9  ;;  %p3338_p7 = scmp.lt.s32.totalorder %s3336_s10, %s3330_s27 }
 0x406   : > { %1207 = vmatprep.mubr.bf16.mxu0 %v3959_v36  ;;  %v3986_v54 = vpack.c.bf16 %v874_v49, %v875_v50  ;;  %v3996_v58 = vpack.c.bf16 %v826_v46, %v827_v48  ;;  %v872_v60 = vsel %vm866_vm4, %v859_v55, %v860_v56  ;;  %v873_v61 = vsel %vm866_vm4, %v858_v44, %v859_v55  ;;  %v3105_v4 = vld [vmem:[#allocation12 + $0x8] sm:$0xff]   ;;  %v3107_v8 = vld [vmem:[#allocation12 + $0x90] sm:$0xff]   ;;  %v3109_v12 = vld [vmem:[#allocation12 + $0x58] sm:$0xff]  }
 0x407   : > { %v4005_v63 = vpack.c.bf16 %v872_v60, %v873_v61  ;;  %v4007_v3 = vpack.c.bf16 %v787_v52, %v786_v40  ;;  %v824_v5 = vsel %vm817_vm3, %v809_v59, %v810_v1  ;;  %v825_v6 = vsel %vm817_vm3, %v808_v38, %v809_v59  ;;  %v3108_v10 = vld [vmem:[#allocation12 + $0x10] sm:$0xff]   ;;  %v3110_v13 = vld [vmem:[#allocation12 + $0x98] sm:$0xff]   ;;  %v4071_v60 = vld [vmem:[#allocation2] sm:$0xff]  ;;  %p3339_p10 = por %p3338_p7, %p3337_p2 }
 0x408   : > { %2543 = vmatpush3.bf16.msra.mxu0 %v3087_v18  ;;  %2775 = vmatpush3.bf16.msra.mxu1 %v3086_v17  ;;  %v4020_v9 = vpack.c.bf16 %v824_v5, %v825_v6  ;;  %v812_v14 = vrot.slane %v789_v11, 7  ;;  %v4024_v16 = vpack.c.bf16 %v789_v11, %v3984_v53  ;;  %v861_v17 = vrot.slane %v789_v11, 1  ;;  %v3111_v18 = vld [vmem:[#allocation12 + $0x18] sm:$0xff]   ;;  %v4040_v38 = vld [vmem:[#allocation2 + $0x50] sm:$0xff]  ;;  %v3148_v23 = vld [vmem:[#allocation13] sm:$0xff]  }
 0x409   : > { %2544 = vmatprep.subr.bf16.mxu0 %v3088_v20  ;;  %2776 = vmatprep.subr.bf16.mxu1 %v3089_v21  ;;  %v823_v20 = vsel %vm817_vm3, %v810_v1, %v811_v15  ;;  %v855_v40 = vrot.slane %v3954_v35, 1  ;;  %v864_v44 = vrot.slane %v4040_v38, 1  ;;  %v815_v49 = vrot.slane %v4040_v38, 7  ;;  %v3119_v55 = vld [vmem:[#allocation12 + $0xb0] sm:$0xff]   ;;  %v4073_v61 = vld [vmem:[#allocation2 + $0x58] sm:$0xff]  ;;  %v3149_v45 = vld [vmem:[#allocation13 + $0x8] sm:$0xff]   ;;  %p3340_p1 = pnand %p3339_p10, %p3333_p12 }
 0x40a   : > { %2784 = vmatprep.mubr.msk.bf16.mxu1 %vm3966_vm6, %v3986_v54  ;;  %v822_v19 = vsel %vm817_vm3, %v811_v15, %v812_v14  ;;  %v805_v5 = vrot.slane %v4071_v60, 7  ;;  %v816_v6 = vrot.slane %v4073_v61, 7  ;;  %v3122_v33 = vld [vmem:[#allocation12 + $0xb8] sm:$0xff]   ;;  %v3124_v15 = vld [vmem:[#allocation12 + $0x1c0] sm:$0xff]  }
 0x40b   : > { %v876_v1 = vsel %vm866_vm4, %v855_v40, %v856_v39  ;;  %v797_v39 = vpack.c.bf16 %v3954_v35, %v4071_v60  ;;  %v3123_v11 = vld [vmem:[#allocation12 + $0x38] sm:$0xff]   ;;  %v3129_v35 = vld [vmem:[#allocation12 + $0x188] sm:$0xff]   ;;  %v3152_v57 = vld [vmem:[#allocation13 + $0x20] sm:$0xff]  }
 0x40c   : > { %2545 = vmatpush3.bf16.msra.mxu0 %v3090_v22  ;;  %2777 = vmatpush3.bf16.msra.mxu1 %v3089_v21  ;;  %v3112_v21 = vld [vmem:[#allocation12 + $0x60] sm:$0xff]  }
 0x40d   : > { %2546 = vmatprep.subr.bf16.mxu0 %v3091_v24  ;;  %2778 = vmatprep.subr.bf16.mxu1 %v3092_v25  ;;  %v3113_v22 = vld [vmem:[#allocation12 + $0xa0] sm:$0xff]  }
 0x40e   : > { %v790_v24 = vld [vmem:[#allocation2 + $0x40] sm:$0xff] }
 0x40f   : > { %v862_v27 = vrot.slane %v790_v24, 1 }
 0x410   : > { %2547 = vmatpush3.bf16.msra.mxu0 %v3093_v26  ;;  %2779 = vmatpush3.bf16.msra.mxu1 %v3092_v25  ;;  %v3114_v25 = vld [vmem:[#allocation12 + $0x20] sm:$0xff]   ;;  %v791_v26 = vld [vmem:[#allocation2 + $0x48] sm:$0xff] }
 0x411   : > { %2548 = vmatprep.subr.bf16.mxu0 %v3094_v28  ;;  %2780 = vmatprep.subr.bf16.mxu1 %v3095_v29  ;;  %v871_v28 = vsel %vm866_vm4, %v860_v56, %v861_v17  ;;  %v814_v34 = vrot.slane %v791_v26, 7  ;;  %v870_v37 = vsel %vm866_vm4, %v861_v17, %v862_v27  ;;  %v4048_v48 = vpack.c.bf16 %v791_v26, %v790_v24  ;;  %v3125_v17 = vld [vmem:[#allocation12 + $0x200] sm:$0xff]  }
 0x412   : > { %v4043_v42 = vpack.c.bf16 %v870_v37, %v871_v28  ;;  %v3138_v28 = vld [vmem:[#allocation12 + $0x1a0] sm:$0xff]   ;;  %v3145_v37 = vld [vmem:[#allocation12 + $0x1f8] sm:$0xff]  }
 0x413   : > { %v4069_v59 = vsel %vm817_vm3, %v814_v34, %v815_v49 }
 0x414   : > { %2549 = vmatpush3.bf16.msra.mxu0 %v3096_v30  ;;  %2781 = vmatpush3.bf16.msra.mxu1 %v3095_v29  ;;  %v4036_v29 = vpack.c.bf16 %v822_v19, %v823_v20  ;;  %v813_v30 = vrot.slane %v790_v24, 7  ;;  %v3126_v19 = vld [vmem:[#allocation12 + $0x180] sm:$0xff]   ;;  %v3127_v20 = vld [vmem:[#allocation12 + $0x1c8] sm:$0xff]   ;;  %v3132_v24 = vld [vmem:[#allocation12 + $0x190] sm:$0xff]  }
 0x415   : > { %2550 = vmatprep.subr.bf16.mxu0 %v3097_v31  ;;  %2782 = vmatprep.subr.bf16.mxu1 %v3098_v32  ;;  %v863_v31 = vrot.slane %v791_v26, 1  ;;  %v3135_v26 = vld [vmem:[#allocation12 + $0x198] sm:$0xff]  }
 0x416   : > { %v821_v50 = vsel %vm817_vm3, %v812_v14, %v813_v30  ;;  %v820_v53 = vsel %vm817_vm3, %v813_v30, %v814_v34  ;;  %v829_v14 = vsel %vm817_vm3, %v816_v6, %v805_v5  ;;  %v3139_v30 = vld [vmem:[#allocation12 + $0x1e8] sm:$0xff]   ;;  %v3143_v34 = vld [vmem:[#allocation12 + $0x230] sm:$0xff]  }
 0x417   : > { %v869_v46 = vsel %vm866_vm4, %v862_v27, %v863_v31  ;;  %v868_v52 = vsel %vm866_vm4, %v863_v31, %v864_v44  ;;  %v3137_v27 = vld [vmem:[#allocation12 + $0x220] sm:$0xff]   ;;  %v3141_v31 = vld [vmem:[#allocation12 + $0x1a8] sm:$0xff]  }
 0x418   : > { %2551 = vmatpush3.bf16.msra.mxu0 %v3099_v41  ;;  %2783 = vmatpush3.bf16.msra.mxu1 %v3098_v32  ;;  %v3115_v32 = vld [vmem:[#allocation12 + $0x68] sm:$0xff]   ;;  %v4065_v56 = vpack.c.bf16 %v868_v52, %v869_v46  ;;  %v865_v46 = vrot.slane %v4073_v61, 1 }
 0x419   : > { %2588 = vmatprep.subr.bf16.mxu0 %v3100_v47  ;;  %2792 = vmatprep.subr.bf16.mxu1 %v3101_v51  ;;  %v3116_v41 = vld [vmem:[#allocation12 + $0xa8] sm:$0xff]  }
 0x41a   : > { %v3117_v47 = vld [vmem:[#allocation12 + $0x28] sm:$0xff]  }
 0x41b   : > { %2436 = vmatmul.mubr.msk.bf16.vlgmr.msra.gmra.mrb[0].mxu0 %vm3992_vm8, %v3996_v58  ;;  %2785 = vmatmul.mubr.msk.bf16.vlgmr.msra.gmra.mrb[0].mxu1 %vm3966_vm6, %v4005_v63 }
 0x41c   : > { %2589 = vmatpush3.bf16.msra.mxu0 %v3102_v62  ;;  %2793 = vmatpush3.bf16.msra.mxu1 %v3101_v51  ;;  %v3118_v51 = vld [vmem:[#allocation12 + $0x70] sm:$0xff]  }
 0x41d   : > { %2590 = vmatprep.subr.bf16.mxu0 %v3103_v0  ;;  %2794 = vmatprep.subr.bf16.mxu1 %v3104_v2  ;;  %v3120_v62 = vld [vmem:[#allocation12 + $0x30] sm:$0xff]   ;;  %v854_v0 = vrot.slane %v4071_v60, 1 }
 0x41e   : > { %1215 = vmatprep.mubr.bf16.mxu0 %v4007_v3  ;;  %2788 = vmatprep.mubr.msk.bf16.mxu1 %vm3966_vm6, %v4043_v42 }
 0x420   : > { %2591 = vmatpush3.bf16.msra.mxu0 %v3105_v4  ;;  %2795 = vmatpush3.bf16.msra.mxu1 %v3104_v2  ;;  %v4084_v2 = vpack.c.bf16 %v820_v53, %v821_v50  ;;  %v3121_v4 = vld [vmem:[#allocation12 + $0x78] sm:$0xff]  }
 0x421   : > { %2592 = vmatprep.subr.bf16.mxu0 %v3106_v7  ;;  %2796 = vmatprep.subr.bf16.mxu1 %v3107_v8  ;;  %v877_v7 = vsel %vm866_vm4, %v854_v0, %v855_v40  ;;  %v3146_v40 = vld [vmem:[#allocation12 + $0x238] sm:$0xff]  }
 0x423   : > { %2439 = vmatmul.mubr.msk.bf16.gmra.mrb[4].mxu0 %vm3992_vm8, %v4020_v9  ;;  %2789 = vmatmul.mubr.msk.bf16.gmra.mrb[4].mxu1 %vm3966_vm6, %v4065_v56 }
 0x424   : > { %2593 = vmatpush3.bf16.msra.mxu0 %v3108_v10  ;;  %2797 = vmatpush3.bf16.msra.mxu1 %v3107_v8  ;;  %v2471_v8 = vpack.c.bf16 %v876_v1, %v877_v7  ;;  %v4096_v10 = vsel %vm817_vm3, %v815_v49, %v816_v6 }
 0x425   : > { %2594 = vmatprep.subr.bf16.mxu0 %v3109_v12  ;;  %2798 = vmatprep.subr.bf16.mxu1 %v3110_v13  ;;  %v2492_v12 = vpack.c.bf16 %v4096_v10, %v4069_v59 }
 0x426   : > { %1223 = vmatprep.mubr.bf16.mxu0 %v4024_v16  ;;  %2808 = vmatprep.mubr.msk.bf16.mxu1 %vm3966_vm6, %v2471_v8 }
 0x428   : > { %2595 = vmatpush3.bf16.msra.mxu0 %v3111_v18  ;;  %2799 = vmatpush3.bf16.msra.mxu1 %v3110_v13  ;;  %v828_v13 = vsel %vm817_vm3, %v805_v5, %v806_v43  ;;  %v3130_v43 = vld [vmem:[#allocation12 + $0x1d0] sm:$0xff]  }
 0x429   : > { %2596 = vmatprep.subr.bf16.mxu0 %v3112_v21  ;;  %2800 = vmatprep.subr.bf16.mxu1 %v3113_v22  ;;  %v2459_v18 = vpack.c.bf16 %v828_v13, %v829_v14  ;;  %v3128_v21 = vld [vmem:[#allocation12 + $0x208] sm:$0xff]  }
 0x42b   : > { %2442 = vmatmul.mubr.msk.bf16.gmra.mrb[8].mxu0 %vm3992_vm8, %v4036_v29 }
 0x42c   : > { %2597 = vmatpush3.bf16.msra.mxu0 %v3114_v25  ;;  %2801 = vmatpush3.bf16.msra.mxu1 %v3113_v22  ;;  %v3131_v22 = vld [vmem:[#allocation12 + $0x210] sm:$0xff]   ;;  %v3133_v25 = vld [vmem:[#allocation12 + $0x1d8] sm:$0xff]  }
 0x42d   : > { %2598 = vmatprep.subr.bf16.mxu0 %v3115_v32  ;;  %2802 = vmatprep.subr.bf16.mxu1 %v3116_v41  ;;  %v3142_v32 = vld [vmem:[#allocation12 + $0x1f0] sm:$0xff]  }
 0x42e   : > { %1231 = vmatprep.mubr.bf16.mxu0 %v4048_v48 }
 0x430   : > { %2599 = vmatpush3.bf16.msra.mxu0 %v3117_v47  ;;  %2803 = vmatpush3.bf16.msra.mxu1 %v3116_v41  ;;  %v3147_v41 = vld [vmem:[#allocation12 + $0x1b8] sm:$0xff]  }
 0x431   : > { %2600 = vmatprep.subr.bf16.mxu0 %v3118_v51  ;;  %2804 = vmatprep.subr.bf16.mxu1 %v3119_v55 }
 0x433   : > { %2445 = vmatmul.mubr.msk.bf16.gmra.mrb[12].mxu0 %vm3992_vm8, %v4084_v2 }
 0x434   : > { %2601 = vmatpush3.bf16.msra.mxu0 %v3120_v62  ;;  %2805 = vmatpush3.bf16.msra.mxu1 %v3119_v55 }
 0x435   : > { %2602 = vmatprep.subr.bf16.mxu0 %v3121_v4  ;;  %2806 = vmatprep.subr.bf16.mxu1 %v3122_v33 }
 0x436   : > { %1481 = vmatprep.mubr.bf16.mxu0 %v797_v39 }
 0x438   : > { %2603 = vmatpush3.bf16.msra.mxu0 %v3123_v11  ;;  %2807 = vmatpush3.bf16.msra.mxu1 %v3122_v33 }
 0x439   : > { %2640 = vmatprep.subr.bf16.mxu0 %v3124_v15  ;;  %2816 = vmatprep.subr.bf16.mxu1 %v3125_v17 }
 0x43b   : > { %2460 = vmatmul.mubr.msk.bf16.vlgmr.msra.gmra.mrb[16].mxu0 %vm3992_vm8, %v2459_v18  ;;  %2809 = vmatmul.mubr.msk.bf16.vlgmr.msra.gmra.mrb[0].mxu1 %vm3966_vm6, %v3986_v54  ;;  %v3134_v54 = vld [vmem:[#allocation12 + $0x218] sm:$0xff]  }
 0x43c   : > { %2641 = vmatpush3.bf16.msra.mxu0 %v3126_v19  ;;  %2817 = vmatpush3.bf16.msra.mxu1 %v3125_v17 }
 0x43d   : > { %2642 = vmatprep.subr.bf16.mxu0 %v3127_v20  ;;  %2818 = vmatprep.subr.bf16.mxu1 %v3128_v21 }
 0x43e   : > { %1489 = vmatprep.mubr.bf16.mxu0 %v3959_v36  ;;  %2812 = vmatprep.mubr.msk.bf16.mxu1 %vm3966_vm6, %v4005_v63  ;;  %v3136_v36 = vld [vmem:[#allocation12 + $0x1e0] sm:$0xff]  }
 0x440   : > { %2643 = vmatpush3.bf16.msra.mxu0 %v3129_v35  ;;  %2819 = vmatpush3.bf16.msra.mxu1 %v3128_v21 }
 0x441   : > { %2644 = vmatprep.subr.bf16.mxu0 %v3130_v43  ;;  %2820 = vmatprep.subr.bf16.mxu1 %v3131_v22 }
 0x443   : > { %2463 = vmatmul.mubr.msk.bf16.gmra.mrb[20].mxu0 %vm3992_vm8, %v3996_v58  ;;  %2813 = vmatmul.mubr.msk.bf16.gmra.mrb[4].mxu1 %vm3966_vm6, %v4043_v42  ;;  %v3140_v58 = vld [vmem:[#allocation12 + $0x228] sm:$0xff]  }
 0x444   : > { %2645 = vmatpush3.bf16.msra.mxu0 %v3132_v24  ;;  %2821 = vmatpush3.bf16.msra.mxu1 %v3131_v22 }
 0x445   : > { %2646 = vmatprep.subr.bf16.mxu0 %v3133_v25  ;;  %2822 = vmatprep.subr.bf16.mxu1 %v3134_v54 }
 0x446   : > { %1497 = vmatprep.mubr.bf16.mxu0 %v4007_v3  ;;  %2832 = vmatprep.mubr.msk.bf16.mxu1 %vm3966_vm6, %v4005_v63  ;;  %v3144_v63 = vld [vmem:[#allocation12 + $0x1b0] sm:$0xff]  }
 0x448   : > { %2647 = vmatpush3.bf16.msra.mxu0 %v3135_v26  ;;  %2823 = vmatpush3.bf16.msra.mxu1 %v3134_v54 }
 0x449   : > { %2648 = vmatprep.subr.bf16.mxu0 %v3136_v36  ;;  %2824 = vmatprep.subr.bf16.mxu1 %v3137_v27 }
 0x44b   : > { %2466 = vmatmul.mubr.msk.bf16.gmra.mrb[24].mxu0 %vm3992_vm8, %v4020_v9 }
 0x44c   : > { %2649 = vmatpush3.bf16.msra.mxu0 %v3138_v28  ;;  %2825 = vmatpush3.bf16.msra.mxu1 %v3137_v27 }
 0x44d   : > { %2650 = vmatprep.subr.bf16.mxu0 %v3139_v30  ;;  %2826 = vmatprep.subr.bf16.mxu1 %v3140_v58 }
 0x44e   : > { %1505 = vmatprep.mubr.bf16.mxu0 %v4024_v16 }
 0x450   : > { %2651 = vmatpush3.bf16.msra.mxu0 %v3141_v31  ;;  %2827 = vmatpush3.bf16.msra.mxu1 %v3140_v58 }
 0x451   : > { %2652 = vmatprep.subr.bf16.mxu0 %v3142_v32  ;;  %2828 = vmatprep.subr.bf16.mxu1 %v3143_v34 }
 0x453   : > { %2469 = vmatmul.mubr.msk.bf16.gmra.mrb[28].mxu0 %vm3992_vm8, %v4036_v29 }
 0x454   : > { %2653 = vmatpush3.bf16.msra.mxu0 %v3144_v63  ;;  %2829 = vmatpush3.bf16.msra.mxu1 %v3143_v34 }
 0x455   : > { %2654 = vmatprep.subr.bf16.mxu0 %v3145_v37  ;;  %2830 = vmatprep.subr.bf16.mxu1 %v3146_v40 }
 0x456   : > { %1816 = vmatprep.mubr.bf16.mxu0 %v4007_v3  ;;  %v867_v3 = vsel %vm866_vm4, %v864_v44, %v865_v46  ;;  %v3154_v44 = vld [vmem:[#allocation13 + $0x30] sm:$0xff]  }
 0x458   : > { %2655 = vmatpush3.bf16.msra.mxu0 %v3147_v41  ;;  %2831 = vmatpush3.bf16.msra.mxu1 %v3146_v40 }
 0x459   : > { %2840 = vmatprep.subr.bf16.mxu0 %v3148_v23  ;;  %2880 = vmatprep.subr.bf16.mxu1 %v3148_v23 }
 0x45b   : > { %2484 = vmatmul.mubr.msk.bf16.vlgmr.msra.gmra.mrb[32].mxu0 %vm3992_vm8, %v4020_v9  ;;  %2833 = vmatmul.mubr.msk.bf16.vlgmr.msra.gmra.mrb[0].mxu1 %vm3966_vm6, %v4043_v42  ;;  %v878_v9 = vsel %vm866_vm4, %v865_v46, %v854_v0  ;;  %v3153_v42 = vld [vmem:[#allocation13 + $0x28] sm:$0xff]  }
 0x45c   : > { %1824 = vmatprep.mubr.bf16.mxu0 %v4024_v16  ;;  %2836 = vmatprep.mubr.msk.bf16.mxu1 %vm3966_vm6, %v4065_v56  ;;  %v2504_v47 = vpack.c.bf16 %v878_v9, %v867_v3  ;;  %v802_v16 = vpack.c.bf16 %v4073_v61, %v4040_v38  ;;  %v3151_v38 = vld [vmem:[#allocation13 + $0x18] sm:$0xff]  }
 0x45d   : > { %2841 = vmatpush3.bf16.msra.mxu0 %v3148_v23  ;;  %2888 = vmatpush3.bf16.msra.mxu1 %v3148_v23 }
 0x45e   : > { %2842 = vmatprep.subr.bf16.mxu0 %v3149_v45  ;;  %2881 = vmatprep.subr.bf16.mxu1 %v3149_v45 }
 0x461   : > { %2843 = vmatpush3.bf16.msra.mxu0 %v3149_v45  ;;  %2889 = vmatpush3.bf16.msra.mxu1 %v3149_v45 }
 0x463   : > { %2487 = vmatmul.mubr.msk.bf16.gmra.mrb[36].mxu0 %vm3992_vm8, %v4036_v29  ;;  %2837 = vmatmul.mubr.msk.bf16.gmra.mrb[4].mxu1 %vm3966_vm6, %v2504_v47  ;;  %v3150_v29 = vld [vmem:[#allocation13 + $0x10] sm:$0xff]  }
 0x464   : > { %1832 = vmatprep.mubr.bf16.mxu0 %v4048_v48  ;;  %2844 = vmatprep.subr.bf16.mxu0 %v3150_v29  ;;  %v3155_v48 = vld [vmem:[#allocation13 + $0x38] sm:$0xff]  }
 0x465   : > { %2882 = vmatprep.subr.bf16.mxu1 %v3150_v29  ;;  %2845 = vmatpush3.bf16.msra.mxu0 %v3150_v29 }
 0x466   : > { %2890 = vmatpush3.bf16.msra.mxu1 %v3150_v29  ;;  %2846 = vmatprep.subr.bf16.mxu0 %v3151_v38 }
 0x467   : > { %2883 = vmatprep.subr.bf16.mxu1 %v3151_v38 }
 0x469   : > { %2847 = vmatpush3.bf16.msra.mxu0 %v3151_v38 }
 0x46a   : > { %2891 = vmatpush3.bf16.msra.mxu1 %v3151_v38  ;;  %2848 = vmatprep.subr.bf16.mxu0 %v3152_v57 }
 0x46b   : > { %2490 = vmatmul.mubr.msk.bf16.gmra.mrb[40].mxu0 %vm3992_vm8, %v4084_v2  ;;  %2884 = vmatprep.subr.bf16.mxu1 %v3152_v57 }
 0x46c   : > { %1840 = vmatprep.mubr.bf16.mxu0 %v802_v16 }
 0x46d   : > { %2849 = vmatpush3.bf16.msra.mxu0 %v3152_v57 }
 0x46e   : > { %2892 = vmatpush3.bf16.msra.mxu1 %v3152_v57  ;;  %2850 = vmatprep.subr.bf16.mxu0 %v3153_v42 }
 0x46f   : > { %2885 = vmatprep.subr.bf16.mxu1 %v3153_v42 }
 0x471   : > { %2851 = vmatpush3.bf16.msra.mxu0 %v3153_v42 }
 0x472   : > { %2893 = vmatpush3.bf16.msra.mxu1 %v3153_v42  ;;  %2852 = vmatprep.subr.bf16.mxu0 %v3154_v44 }
 0x473   : > { %2493 = vmatmul.mubr.msk.bf16.gmra.mrb[44].mxu0 %vm3992_vm8, %v2492_v12  ;;  %2886 = vmatprep.subr.bf16.mxu1 %v3154_v44 }
 0x475   : > { %2853 = vmatpush3.bf16.msra.mxu0 %v3154_v44 }
 0x476   : > { %2894 = vmatpush3.bf16.msra.mxu1 %v3154_v44  ;;  %2854 = vmatprep.subr.bf16.mxu0 %v3155_v48 }
 0x477   : > { %2887 = vmatprep.subr.bf16.mxu1 %v3155_v48 }
 0x479   : > { %2855 = vmatpush3.bf16.msra.mxu0 %v3155_v48 }
 0x47a   : > { %2895 = vmatpush3.bf16.msra.mxu1 %v3155_v48 }
 0x4ee   : > { %v2552_v49 = vpop.f32.mrb[0].mxu0 }
 0x4ef   : > { %v2553_v50 = vpop.f32.mrb[1].mxu0 }
 0x4f0   : > { %v2554_v51 = vadd.f32 %v2553_v50, %v2552_v49  ;;  %v2555_v52 = vpop.f32.mrb[2].mxu0 }
 0x4f1   : > { %v2556_v53 = vpop.f32.mrb[3].mxu0 }
 0x4f2   : > { %v2557_v55 = vadd.f32 %v2556_v53, %v2555_v52  ;;  %v2415_v52 = vld [vmem:[%s4357_s8] ss:$0 sm:$0xff] }
 0x4f6   : > { %v2558_v56 = vpop.f32.mrb[4].mxu0 }
 0x4f7   : > { %v2559_v59 = vpop.f32.mrb[5].mxu0 }
 0x4f8   : > { %v2560_v60 = vadd.f32 %v2559_v59, %v2558_v56  ;;  %v2561_v61 = vpop.f32.mrb[6].mxu0 }
 0x4f9   : > { %v2562_v62 = vpop.f32.mrb[7].mxu0 }
 0x4fa   : > { %v2563_v0 = vadd.f32 %v2562_v62, %v2561_v61 }
 0x4fe   : > { %v2564_v1 = vpop.f32.mrb[8].mxu0 }
 0x4ff   : > { %v2565_v2 = vpop.f32.mrb[9].mxu0 }
 0x500   : > { %v2566_v4 = vadd.f32 %v2565_v2, %v2564_v1  ;;  %v2567_v5 = vpop.f32.mrb[10].mxu0 }
 0x501   : > { %v2568_v6 = vpop.f32.mrb[11].mxu0 }
 0x502   : > { %v2569_v7 = vadd.f32 %v2568_v6, %v2567_v5 }
 0x506   : > { %v2570_v33 = vpop.f32.mrb[12].mxu0 }
 0x507   : > { %v2571_v8 = vpop.f32.mrb[13].mxu0 }
 0x508   : > { %v2572_v39 = vadd.f32 %v2571_v8, %v2570_v33  ;;  %v2573_v10 = vpop.f32.mrb[14].mxu0 }
 0x509   : > { %v2574_v11 = vpop.f32.mrb[15].mxu0 }
 0x50a   : > { %v2575_v12 = vadd.f32 %v2574_v11, %v2573_v10 }
 0x50e   : > { %v2604_v13 = vpop.f32.mrb[16].mxu0 }
 0x50f   : > { %v2605_v14 = vpop.f32.mrb[17].mxu0 }
 0x510   : > { %v2606_v15 = vadd.f32 %v2605_v14, %v2604_v13  ;;  %v2607_v17 = vpop.f32.mrb[18].mxu0 }
 0x511   : > { %v2608_v18 = vpop.f32.mrb[19].mxu0 }
 0x512   : > { %v2899_v19 = vadd.f32 %v2606_v15, %v2554_v51  ;;  %v2609_v20 = vadd.f32 %v2608_v18, %v2607_v17 }
 0x514   : > { %v2905_v21 = vadd.f32 %v2609_v20, %v2557_v55 }
 0x516   : > { %v2610_v35 = vpop.f32.mrb[20].mxu0 }
 0x517   : > { %v2611_v43 = vpop.f32.mrb[21].mxu0 }
 0x518   : > { %v2612_v22 = vadd.f32 %v2611_v43, %v2610_v35  ;;  %v2613_v24 = vpop.f32.mrb[22].mxu0 }
 0x519   : > { %v2614_v25 = vpop.f32.mrb[23].mxu0 }
 0x51a   : > { %v2896_v54 = vadd.f32 %v2612_v22, %v2560_v60  ;;  %v2615_v26 = vadd.f32 %v2614_v25, %v2613_v24 }
 0x51c   : > { %v2902_v36 = vadd.f32 %v2615_v26, %v2563_v0 }
 0x51e   : > { %v2616_v27 = vpop.f32.mrb[24].mxu0 }
 0x51f   : > { %v2617_v28 = vpop.f32.mrb[25].mxu0 }
 0x520   : > { %v2618_v30 = vadd.f32 %v2617_v28, %v2616_v27  ;;  %v2619_v58 = vpop.f32.mrb[26].mxu0 }
 0x521   : > { %v2620_v31 = vpop.f32.mrb[27].mxu0 }
 0x522   : > { %v2911_v32 = vadd.f32 %v2618_v30, %v2566_v4  ;;  %v2621_v34 = vadd.f32 %v2620_v31, %v2619_v58 }
 0x524   : > { %v2917_v63 = vadd.f32 %v2621_v34, %v2569_v7 }
 0x526   : > { %v2622_v37 = vpop.f32.mrb[28].mxu0 }
 0x527   : > { %v2623_v40 = vpop.f32.mrb[29].mxu0 }
 0x528   : > { %v2624_v41 = vadd.f32 %v2623_v40, %v2622_v37  ;;  %v2625_v46 = vpop.f32.mrb[30].mxu0 }
 0x529   : > { %v2626_v3 = vpop.f32.mrb[31].mxu0 }
 0x52a   : > { %v2908_v9 = vadd.f32 %v2624_v41, %v2572_v39  ;;  %v2627_v47 = vadd.f32 %v2626_v3, %v2625_v46 }
 0x52c   : > { %v4173_v16 = vadd.f32 %v2627_v47, %v2575_v12 }
 0x52e   : > { %v2656_v23 = vpop.f32.mrb[32].mxu0  ;;  %v2834_v45 = vpop.f32.mrb[0].mxu1 }
 0x52f   : > { %v2657_v29 = vpop.f32.mrb[33].mxu0  ;;  %v1883_v38 = vpop.f32.mrb[1].mxu1 }
 0x530   : > { %v2658_v57 = vadd.f32 %v2657_v29, %v2656_v23  ;;  %v2659_v42 = vpop.f32.mrb[34].mxu0  ;;  %v2835_v44 = vpop.f32.mrb[2].mxu1 }
 0x531   : > { %v2660_v48 = vpop.f32.mrb[35].mxu0  ;;  %v1886_v49 = vpop.f32.mrb[3].mxu1 }
 0x532   : > { %v2900_v50 = vadd.f32 %v2899_v19, %v2658_v57  ;;  %v2661_v51 = vadd.f32 %v2660_v48, %v2659_v42 }
 0x534   : > { %v2901_v53 = vadd.f32 %v2900_v50, %v1883_v38  ;;  %v2906_v55 = vadd.f32 %v2905_v21, %v2661_v51  ;;  %v2085_v51 = vld [vmem:[%s3824_s19] sm:$0xff] }
 0x536   : > { %v1929_v56 = vadd.f32 %v2901_v53, %v2415_v52  ;;  %v2907_v59 = vadd.f32 %v2906_v55, %v1886_v49  ;;  %v2662_v60 = vpop.f32.mrb[36].mxu0  ;;  %v2838_v61 = vpop.f32.mrb[4].mxu1  ;;  %v2087_v49 = vld [vmem:[%s3824_s19 + $0x10] sm:$0xff] }
 0x537   : > { %v2663_v62 = vpop.f32.mrb[37].mxu0  ;;  %v1899_v0 = vpop.f32.mrb[5].mxu1 }
 0x538   : > { %v1930_v1 = vadd.f32 %v2907_v59, %v2415_v52  ;;  %v2664_v2 = vadd.f32 %v2663_v62, %v2662_v60  ;;  %v2665_v4 = vpop.f32.mrb[38].mxu0  ;;  %v2839_v5 = vpop.f32.mrb[6].mxu1  ;;  %v1937_v33 = vmax.f32 %v1929_v56, 0.0 }
 0x539   : > { %v2666_v6 = vpop.f32.mrb[39].mxu0  ;;  %v1902_v7 = vpop.f32.mrb[7].mxu1 }
 0x53a   : > { %v1938_v8 = vmax.f32 %v1930_v1, 0.0  ;;  %v2897_v39 = vadd.f32 %v2896_v54, %v2664_v2  ;;  %v2667_v10 = vadd.f32 %v2666_v6, %v2665_v4 }
 0x53c   : > { %v2898_v11 = vadd.f32 %v2897_v39, %v2834_v45  ;;  %v2903_v12 = vadd.f32 %v2902_v36, %v2667_v10  ;;  %v1945_v13 = vpack.c.bf16 %v1938_v8, %v1937_v33  ;;  %v2091_v8 = vld [vmem:[%s3824_s19 + $0x30] sm:$0xff] }
 0x53e   : > { %v1931_v14 = vadd.f32 %v2898_v11, %v2415_v52  ;;  %v2904_v15 = vadd.f32 %v2903_v12, %v2835_v44  ;;  %v2668_v17 = vpop.f32.mrb[40].mxu0  ;;  %2856 = vmatprep.mubr.bf16.mxu0 %v1945_v13  ;;  %v2089_v11 = vld [vmem:[%s3824_s19 + $0x20] sm:$0xff] }
 0x53f   : > { %v2669_v18 = vpop.f32.mrb[41].mxu0 }
 0x540   : > { %v1932_v19 = vadd.f32 %v2904_v15, %v2415_v52  ;;  %v2670_v20 = vadd.f32 %v2669_v18, %v2668_v17  ;;  %v2671_v21 = vpop.f32.mrb[42].mxu0  ;;  %v1939_v43 = vmax.f32 %v1931_v14, 0.0  ;;  %v2092_v14 = vld [vmem:[%s3824_s19 + $0x38] sm:$0xff] }
 0x541   : > { %v2672_v35 = vpop.f32.mrb[43].mxu0 }
 0x542   : > { %v1940_v22 = vmax.f32 %v1932_v19, 0.0  ;;  %v2912_v24 = vadd.f32 %v2911_v32, %v2670_v20  ;;  %v2673_v25 = vadd.f32 %v2672_v35, %v2671_v21  ;;  %v2090_v19 = vld [vmem:[%s3824_s19 + $0x28] sm:$0xff] }
 0x544   : > { %v1946_v26 = vpack.c.bf16 %v1940_v22, %v1939_v43  ;;  %v2913_v27 = vadd.f32 %v2912_v24, %v1899_v0  ;;  %v2918_v54 = vadd.f32 %v2917_v63, %v2673_v25 }
 0x546   : > { %v2919_v28 = vadd.f32 %v2918_v54, %v1902_v7  ;;  %v2674_v30 = vpop.f32.mrb[44].mxu0  ;;  %2857 = vmatmul.mubr.bf16.vlgmr.msra.gmra.mrb[48].mxu0 %v1946_v26  ;;  %v1933_v36 = vadd.f32 %v2913_v27, %v2415_v52 }
 0x547   : > { %v2675_v58 = vpop.f32.mrb[45].mxu0 }
 0x548   : > { %v2676_v31 = vadd.f32 %v2675_v58, %v2674_v30  ;;  %v2677_v34 = vpop.f32.mrb[46].mxu0  ;;  %v1934_v37 = vadd.f32 %v2919_v28, %v2415_v52  ;;  %v1941_v3 = vmax.f32 %v1933_v36, 0.0 }
 0x549   : > { %v2678_v40 = vpop.f32.mrb[47].mxu0 }
 0x54a   : > { %v2909_v41 = vadd.f32 %v2908_v9, %v2676_v31  ;;  %v2679_v46 = vadd.f32 %v2678_v40, %v2677_v34  ;;  %v1942_v47 = vmax.f32 %v1934_v37, 0.0  ;;  %v2416_v9 = vld [vmem:[%s4358_s6] ss:$0 sm:$0xff] }
 0x54c   : > { %v2910_v23 = vadd.f32 %v2909_v41, %v2838_v61  ;;  %v2915_v32 = vadd.f32 %v4173_v16, %v2679_v46  ;;  %v1947_v45 = vpack.c.bf16 %v1942_v47, %v1941_v3  ;;  %v2086_v61 = vld [vmem:[%s3824_s19 + $0x8] sm:$0xff] }
 0x54e   : > { %v1935_v63 = vadd.f32 %v2910_v23, %v2415_v52  ;;  %v2916_v29 = vadd.f32 %v2915_v32, %v2839_v5  ;;  %2860 = vmatprep.mubr.bf16.mxu1 %v1947_v45 }
 0x550   : > { %v1936_v38 = vadd.f32 %v2916_v29, %v2415_v52  ;;  %v1943_v57 = vmax.f32 %v1935_v63, 0.0  ;;  %v2088_v52 = vld [vmem:[%s3824_s19 + $0x18] sm:$0xff]  ;;  %s2118_s19 = scalar_lea.sflag [#allocation6], %s3818_s21 }
 0x552   : > { %v1944_v42 = vmax.f32 %v1936_v38, 0.0 }
 0x554   : > { %v1948_v44 = vpack.c.bf16 %v1944_v42, %v1943_v57 }
 0x556   : > { %2861 = vmatmul.mubr.bf16.vlgmr.msra.gmra.mrb[8].mxu1 %v1948_v44 }
 0x619   : > { %v2858_v48 = vpop.f32.mrb[48].mxu0 }
 0x61a   : > { %v2063_v50 = vadd.f32 %v2858_v48, %v2416_v9  ;;  %v2054_v16 = vpop.f32.mrb[49].mxu0 }
 0x61b   : > { %v2055_v53 = vadd.f32 %v2416_v9, %v2054_v16  ;;  %v2859_v55 = vpop.f32.mrb[50].mxu0 }
 0x61c   : > { %v2095_v56 = vadd.f32 %v2087_v49, %v2063_v50  ;;  %v2066_v59 = vadd.f32 %v2859_v55, %v2416_v9  ;;  %v2057_v60 = vpop.f32.mrb[51].mxu0 }
 0x61d   : > { %v2093_v62 = vadd.f32 %v2085_v51, %v2055_v53  ;;  %v2058_v0 = vadd.f32 %v2416_v9, %v2057_v60 }
 0x61e   : > { %v2103_v1 = vmax.f32 %v2095_v56, 0.0  ;;  %v2096_v2 = vadd.f32 %v2088_v52, %v2066_v59 }
 0x61f   : > { %v2101_v4 = vmax.f32 %v2093_v62, 0.0  ;;  %v2094_v5 = vadd.f32 %v2086_v61, %v2058_v0 }
 0x620   : > { %2111 = vst [vmem:[%s3919_s18 + $0x10] sm:$0xff] %v2103_v1  ;;  %v2104_v6 = vmax.f32 %v2096_v2, 0.0 }
 0x621   : > { %2109 = vst [vmem:[%s3919_s18] sm:$0xff] %v2101_v4  ;;  %v2102_v7 = vmax.f32 %v2094_v5, 0.0 }
 0x622   : > { %2112 = vst [vmem:[%s3919_s18 + $0x18] sm:$0xff] %v2104_v6 }
 0x623   : > { %2110 = vst [vmem:[%s3919_s18 + $0x8] sm:$0xff] %v2102_v7 }
 0x629   : > { %v2862_v33 = vpop.f32.mrb[8].mxu1 }
 0x62a   : > { %v2079_v39 = vadd.f32 %v2862_v33, %v2416_v9  ;;  %v2070_v10 = vpop.f32.mrb[9].mxu1 }
 0x62b   : > { %v2071_v12 = vadd.f32 %v2416_v9, %v2070_v10  ;;  %v2863_v13 = vpop.f32.mrb[10].mxu1 }
 0x62c   : > { %v2099_v15 = vadd.f32 %v2091_v8, %v2079_v39  ;;  %v2082_v17 = vadd.f32 %v2863_v13, %v2416_v9  ;;  %v2073_v18 = vpop.f32.mrb[11].mxu1 }
 0x62d   : > { %v2097_v20 = vadd.f32 %v2089_v11, %v2071_v12  ;;  %v2074_v21 = vadd.f32 %v2416_v9, %v2073_v18 }
 0x62e   : > { %v2107_v35 = vmax.f32 %v2099_v15, 0.0  ;;  %v2100_v43 = vadd.f32 %v2092_v14, %v2082_v17 }
 0x62f   : > { %v2105_v22 = vmax.f32 %v2097_v20, 0.0  ;;  %v2098_v24 = vadd.f32 %v2090_v19, %v2074_v21 }
 0x630   : > { %2115 = vst [vmem:[%s3919_s18 + $0x30] sm:$0xff] %v2107_v35  ;;  %v2108_v25 = vmax.f32 %v2100_v43, 0.0 }
 0x631   : > { %2113 = vst [vmem:[%s3919_s18 + $0x20] sm:$0xff] %v2105_v22  ;;  %v2106_v26 = vmax.f32 %v2098_v24, 0.0 }
 0x632   : > { %2116 = vst [vmem:[%s3919_s18 + $0x38] sm:$0xff] %v2108_v25 }
 0x633   : > { %2114 = vst [vmem:[%s3919_s18 + $0x28] sm:$0xff] %v2106_v26 }
 0x634   : > { %3343 = shalt.err (!%p3340_p1)
}
 0x635   : > { %s3344_s18 = scalar_lea.hbm %s4201_s29, 1024  ;;  %s3348_s8 = scalar_lea.hbm %s4362_s28, 8192 }
 0x636   : > { %p3345_p6 = scmp.ne.s32.totalorder %s4201_s29, %s3344_s18  ;;  %p3349_p4 = scmp.lt.u32.totalorder %s4201_s29, %s4362_s28 }
 0x637   : > { %p3350_p0 = scmp.lt.u32.totalorder %s3348_s8, %s3344_s18  ;;  %p3352_p3 = scmp.lt.u32.totalorder %s3344_s18, %s4201_s29 }
 0x638   : > { %p3346_p11 = pnand %p3345_p6, %p4363_p5 }
 0x639   : > { %p3351_p8 = por %p3350_p0, %p3349_p4 }
 0x63a   : > { %p3347_p13 = pneg %p3346_p11 }
 0x63b   : > { %p3353_p9 = por %p3352_p3, %p3351_p8 }
 0x63d   : > { %p3354_p12 = pnand %p3353_p9, %p3347_p13 }
 0x63f   : > { %3357 = shalt.err (!%p3354_p12)
}
 0x640   : > { %s3460_s6 = smov 128   ;;  %s3461_s12 = smov 8  }
 0x641   : > { %2954 = dma.vmem_to_hbm [thread:$0]  (%p4363_p5), %s4203_s30, 1024, %s4201_s29, %s2118_s19, %s3460_s6, %s3460_s6, %s3461_s12  }
 0x642 PF: > { %s4364_s25 = sld [smem:[#allocation26_spill]]  ;;  %s4365_s20 = sld [smem:[#allocation21_spill]] }
 0x643   : > { %s4366_s3 = sld [smem:[#allocation30_spill]] }
 0x648   : > { %p2987_p2 = scmp.ge.s32.totalorder %s4364_s25, 2  ;;  %s2149_s24 = sand.u32 1, %s4365_s20  }
 0x649   : > { %p4367_p7 = scmp.ne.s32.totalorder %s4366_s3, 0  ;;  %s2150_s9 = scalar_lea.sflag [#allocation6], %s2149_s24 }
 0x64b   : > { %p2977_p10 = pnand %p2987_p2, %p4367_p7 }
 0x64d   : > { %3407 = dma.done.wait (!%p2977_p10), %s2150_s9, 1024  }
 0x64e   : > { %3409 = vsyncadd (!%p2977_p10), %s2150_s9, 4294966272  ;;  %s30_s16 = sadd.s32 1, %s4364_s25   ;;  %s4368_s30 = sld [smem:[#allocation22_spill]] }
 0x64f   : > { %p27_p1 = scmp.ge.s32.totalorder %s30_s16, 10   ;;  %s4369_s10 = sld [smem:[#allocation23_spill]] }
 0x650   : > { %s4370_s11 = sld [smem:[#allocation33_spill]]  ;;  %s4371_s21 = sld [smem:[#allocation31_spill]] }
 0x651   : > { %s4372_s4 = sld [smem:[#allocation32_spill]]  ;;  %s4373_s12 = smov %s3432_s14 }
 0x652   : > { %s4374_s13 = smov %s3436_s15  ;;  %29 = sbr.rel (!%p27_p1) target bundleno = 18 (0x12), region = 155 }
 0x656   : > { %s4375_s14 = smov %s4371_s21 }
 0x657   : > { %s4376_s15 = smov %s4372_s4 }
 0x659   :  { %2155 = vsyncpa [#allocation5], 1 }
 0x65a   :  { %2157 = vsyncpa [#allocation5 + $0x1], 1 }
 0x65b   :  { %2158 = vsyncpa [#allocation8], 1 }
 0x65c   :  { %2160 = vsyncpa [#allocation8 + $0x1], 1 }
 0x65d   :  { %2161 = vsyncpa [#allocation11], 1 }
 0x65e   :  { %2162 = vsyncpa [#allocation14], 1 }
 0x65f   :  { %2163 = vsyncpa [#allocation6], 1 }
 0x660   :  { %2165 = vsyncpa [#allocation6 + $0x1], 1 }

</bundles_post_ra>
